<compile_context>
chip_gen: v7x
topology: tpu7x:2x2x1
jax: 0.10.0
libtpu: 0.0.40
codegen_flags: <defaults>
</compile_context>

<pallas_src>
import functools
import math

import jax
import jax.numpy as jnp
from jax.experimental import pallas as pl
from jax.experimental.pallas import tpu as pltpu

LN_EPS = 1e-5
NEG_INF = -1e9

# ----------------------------- TPU-aware helpers -----------------------------

_VMEM_CAP = None
_SINGLE_BUFFER_OK = None


def _vmem_capacity_bytes():
    global _VMEM_CAP
    if _VMEM_CAP is None:
        try:
            _VMEM_CAP = int(pltpu.get_tpu_info().vmem_capacity_bytes)
        except Exception:
            _VMEM_CAP = 64 * 1024 * 1024          # conservative (v7x-sized)
    return _VMEM_CAP


def _vmem_limit_bytes():
    # ~3/4 of physical VMEM, capped at 100 MiB: ~96 MiB on 128 MiB parts
    # (v5e/v6e), ~48 MiB on 64 MiB parts (v7x).
    return int(min(_vmem_capacity_bytes() * 3 // 4, 100 * 1024 * 1024))


def _probe_kernel(x_ref, o_ref):
    o_ref[...] = x_ref[...] + 1.0


def _single_buffer_supported():
    """Probe whether pipeline_mode=pl.Buffered(1) works on this jax / TPU."""
    global _SINGLE_BUFFER_OK
    if _SINGLE_BUFFER_OK is None:
        try:
            spec = pl.BlockSpec((8, 128), lambda i: (0, 0),
                                pipeline_mode=pl.Buffered(1))
            f = pl.pallas_call(
                _probe_kernel,
                out_shape=jax.ShapeDtypeStruct((8, 128), jnp.float32),
                grid=(1,),
                in_specs=[spec],
                out_specs=pl.BlockSpec((8, 128), lambda i: (0, 0)))
            jax.block_until_ready(f(jnp.zeros((8, 128), jnp.float32)))
            _SINGLE_BUFFER_OK = True
        except Exception:
            _SINGLE_BUFFER_OK = False
    return _SINGLE_BUFFER_OK


def _w_spec(shape):
    """BlockSpec for a grid-invariant (weight-like) operand.

    Single-buffered (pl.Buffered(1)) so it is not needlessly double-buffered in
    VMEM; falls back to default pipelining when unsupported.
    """
    nd = len(shape)
    idx = lambda *args: (0,) * nd
    if _single_buffer_supported():
        return pl.BlockSpec(shape, idx, pipeline_mode=pl.Buffered(1))
    return pl.BlockSpec(shape, idx)


def _pick_q_tile(s, q_tile):
    if q_tile is not None:
        assert s % q_tile == 0 and (q_tile % 8 == 0 or q_tile == s)
        return q_tile
    pref = 256 if _vmem_capacity_bytes() >= (96 << 20) else 128
    for c in (pref, 128, 64, 32, 16, 8):
        if c <= s and s % c == 0:
            return c
    return s


def _pick_row_tile(m):
    cands = (512, 256, 128, 64, 32, 16, 8)
    if _vmem_capacity_bytes() < (96 << 20):       # smaller-VMEM (v7x-class) parts
        cands = (256, 128, 64, 32, 16, 8)
    for c in cands:
        if m % c == 0:
            return c
    return m


# ----------------------------- in-kernel helpers -----------------------------

def _layernorm(x, g, b):
    mu = jnp.mean(x, axis=-1, keepdims=True)
    var = jnp.mean(jnp.square(x - mu), axis=-1, keepdims=True)
    return (x - mu) * jax.lax.rsqrt(var + LN_EPS) * g + b


# ----------------------------- Pallas kernels -----------------------------

def _embed_ln_kernel(e_ref, pe_ref, g_ref, b_ref, o_ref, *, scale):
    x = e_ref[0] * scale + pe_ref[...]                       # (S, D) f32
    o_ref[0] = _layernorm(x, g_ref[...], b_ref[...]).astype(o_ref.dtype)


def _attn_ln_kernel(xq_ref, kv_ref, pad_ref, wq_ref, bq_ref, wkv_ref, bkv_ref,
                    wo3_ref, bo_ref, g_ref, b_ref, o_ref, k_scr, v_scr,
                    *, n_head, causal):
    """Fused Q-proj + (KV-proj once/batch) + MHA + out-proj + residual + LN.

    grid = (batch, q_tiles).  K/V live in head-split bf16 VMEM scratch that
    persists across the 'arbitrary' q-tile axis.  All matmuls are head-batched;
    the head merge is folded into the output projection (no concatenate).
    """
    d = xq_ref.shape[-1]
    dh = d // n_head
    tq = xq_ref.shape[1]
    s_kv = kv_ref.shape[1]
    qi = pl.program_id(1)

    @pl.when(qi == 0)
    def _():
        kv = jnp.dot(kv_ref[0], wkv_ref[...],
                     preferred_element_type=jnp.float32) + bkv_ref[...]
        for h in range(n_head):                              # slice-stores only
            lo = h * dh
            k_scr[h] = kv[:, lo:lo + dh].astype(jnp.bfloat16)
            v_scr[h] = kv[:, d + lo:d + lo + dh].astype(jnp.bfloat16)

    xq = xq_ref[0]                                           # (tq, D) bf16
    q = jnp.dot(xq, wq_ref[...],
                preferred_element_type=jnp.float32) + bq_ref[...]
    q = q * (1.0 / math.sqrt(dh))                            # fold scale into q
    q3 = jnp.stack([q[:, h * dh:(h + 1) * dh] for h in range(n_head)],
                   axis=0).astype(jnp.bfloat16)              # (H, tq, dh)

    if causal:                                               # mask built in-kernel
        q_idx = qi * tq + jax.lax.broadcasted_iota(jnp.int32, (tq, s_kv), 0)
        k_idx = jax.lax.broadcasted_iota(jnp.int32, (tq, s_kv), 1)
        keep = (k_idx <= q_idx) & (pad_ref[0] > 0.0)         # (tq, S_kv)
    else:
        keep = pad_ref[0] > 0.0                              # (1, S_kv)

    s = jnp.einsum('hqd,hkd->hqk', q3, k_scr[...],
                   preferred_element_type=jnp.float32)       # (H, tq, S_kv)
    s = jnp.where(keep[None], s, NEG_INF)
    s = s - jnp.max(s, axis=-1, keepdims=True)
    p = jnp.exp(s)
    p = p * pl.reciprocal(jnp.sum(p, axis=-1, keepdims=True), approx=True)
    ctx = jnp.einsum('hqk,hkd->hqd', p.astype(jnp.bfloat16), v_scr[...],
                     preferred_element_type=jnp.float32)     # (H, tq, dh)
    o = jnp.einsum('hqd,hdn->hqn', ctx.astype(jnp.bfloat16), wo3_ref[...],
                   preferred_element_type=jnp.float32)       # (H, tq, D)
    o = jnp.sum(o, axis=0) + bo_ref[...]
    o_ref[0] = _layernorm(o + xq.astype(jnp.float32),
                          g_ref[...], b_ref[...]).astype(o_ref.dtype)


def _ffn_ln_kernel(x_ref, w1_ref, b1_ref, w2_ref, b2_ref, g_ref, b_ref, o_ref):
    x = x_ref[...]                                           # (tm, D) bf16
    h = jnp.dot(x, w1_ref[...], preferred_element_type=jnp.float32) + b1_ref[...]
    h = jnp.maximum(h, 0.0)
    o = jnp.dot(h.astype(jnp.bfloat16), w2_ref[...],
                preferred_element_type=jnp.float32) + b2_ref[...]
    o_ref[...] = _layernorm(o + x.astype(jnp.float32),
                            g_ref[...], b_ref[...]).astype(o_ref.dtype)


# ----------------------------- Pallas wrappers -----------------------------

def pallas_embed_ln(emb, pe, g, b, *, scale):
    B, S, D = emb.shape
    return pl.pallas_call(
        functools.partial(_embed_ln_kernel, scale=scale),
        out_shape=jax.ShapeDtypeStruct((B, S, D), jnp.bfloat16),
        grid=(B,),
        in_specs=[pl.BlockSpec((1, S, D), lambda i: (i, 0, 0)),
                  _w_spec((S, D)), _w_spec((1, D)), _w_spec((1, D))],
        out_specs=pl.BlockSpec((1, S, D), lambda i: (i, 0, 0)),
        compiler_params=pltpu.CompilerParams(
            dimension_semantics=("parallel",),
            vmem_limit_bytes=_vmem_limit_bytes()),
    )(emb, pe, g, b)


def pallas_attention(xq, kv_src, pad3, p, *, n_head, causal, q_tile=None):
    B, Sq, D = xq.shape
    Sk = kv_src.shape[1]
    dh = D // n_head
    tq = _pick_q_tile(Sq, q_tile)
    kernel = functools.partial(_attn_ln_kernel, n_head=n_head, causal=causal)
    return pl.pallas_call(
        kernel,
        out_shape=jax.ShapeDtypeStruct((B, Sq, D), jnp.bfloat16),
        grid=(B, Sq // tq),
        in_specs=[
            pl.BlockSpec((1, tq, D), lambda b, q: (b, q, 0)),   # queries+residual
            pl.BlockSpec((1, Sk, D), lambda b, q: (b, 0, 0)),   # K/V source
            pl.BlockSpec((1, 1, Sk), lambda b, q: (b, 0, 0)),   # key pad vector
            _w_spec((D, D)), _w_spec((1, D)),
            _w_spec((D, 2 * D)), _w_spec((1, 2 * D)),
            _w_spec((n_head, dh, D)), _w_spec((1, D)),
            _w_spec((1, D)), _w_spec((1, D)),
        ],
        out_specs=pl.BlockSpec((1, tq, D), lambda b, q: (b, q, 0)),
        scratch_shapes=[pltpu.VMEM((n_head, Sk, dh), jnp.bfloat16),
                        pltpu.VMEM((n_head, Sk, dh), jnp.bfloat16)],
        compiler_params=pltpu.CompilerParams(
            dimension_semantics=("parallel", "arbitrary"),
            vmem_limit_bytes=_vmem_limit_bytes()),
    )(xq, kv_src, pad3, p['wq'], p['bq'], p['wkv'], p['bkv'],
      p['wo3'], p['bo'], p['ln_g'], p['ln_b'])


def pallas_ffn(x2d, p):
    M, D = x2d.shape
    H = p['w1'].shape[1]
    tm = _pick_row_tile(M)
    return pl.pallas_call(
        _ffn_ln_kernel,
        out_shape=jax.ShapeDtypeStruct((M, D), jnp.bfloat16),
        grid=(M // tm,),
        in_specs=[pl.BlockSpec((tm, D), lambda i: (i, 0)),
                  _w_spec((D, H)), _w_spec((1, H)),
                  _w_spec((H, D)), _w_spec((1, D)),
                  _w_spec((1, D)), _w_spec((1, D))],
        out_specs=pl.BlockSpec((tm, D), lambda i: (i, 0)),
        compiler_params=pltpu.CompilerParams(
            dimension_semantics=("parallel",),
            vmem_limit_bytes=_vmem_limit_bytes()),
    )(x2d, p['w1'], p['b1'], p['w2'], p['b2'], p['ln_g'], p['ln_b'])


# ----------------------------- Decoder forward -----------------------------

def decoder_forward(params, tgt, src, tgt_pad, src_pad, *, n_head, d_model,
                    q_tile=None):
    """Matches Decoder.forward(tgt, src, tgt_mask, src_mask).

    tgt:     (B, St) int32 token ids
    src:     (B, Ss, D) f32 encoder memory
    tgt_pad: (B, St) 1 = real token.  (tgt_mask = tgt_pad * causal is built
             in-kernel, so the O(S^2) mask never touches HBM.)
    src_pad: (B, Ss) 1 = real token  (== src_mask squeezed)
    """
    B, St = tgt.shape
    # TODO(synk): dropout (p_drop) treated as identity (inference mode).
    # TODO(synk): embedding lookup is a data-dependent gather -> XLA jnp.take.
    emb = jnp.take(params['emb'], tgt, axis=0)                # (B, St, D) f32
    x = pallas_embed_ln(emb, params['pe'][:St], params['ln_g'], params['ln_b'],
                        scale=math.sqrt(d_model))
    src_b = src.astype(jnp.bfloat16)                          # cast memory once
    tgt_pad3 = tgt_pad.astype(jnp.float32)[:, None, :]        # (B, 1, St)
    src_pad3 = src_pad.astype(jnp.float32)[:, None, :]        # (B, 1, Ss)
    for lp in params['layers']:
        x = pallas_attention(x, x, tgt_pad3, lp['self'], n_head=n_head,
                             causal=True, q_tile=q_tile)
        x = pallas_attention(x, src_b, src_pad3, lp['cross'], n_head=n_head,
                             causal=False, q_tile=q_tile)
        Bx, Sx, Dx = x.shape
        x = pallas_ffn(x.reshape(Bx * Sx, Dx), lp['ffn']).reshape(Bx, Sx, Dx)
    # TODO(synk): fusing embed+LN into the first self-attn call (one fewer
    # residual-stream HBM round trip) is left as a follow-up.
    return x.astype(jnp.float32)


# ----------------------------- pure-JAX reference -----------------------------

def _ref_attention(xq, kv_src, pad, p, *, n_head, causal):
    D = xq.shape[-1]
    dh = D // n_head
    q = jnp.einsum('bsd,de->bse', xq, p['wq'],
                   preferred_element_type=jnp.float32) + p['bq']
    q = q * (1.0 / math.sqrt(dh))
    kv = jnp.einsum('bsd,de->bse', kv_src, p['wkv'],
                    preferred_element_type=jnp.float32) + p['bkv']
    k, v = kv[..., :D], kv[..., D:]
    B, Sq, _ = q.shape
    Sk = k.shape[1]
    qh = q.reshape(B, Sq, n_head, dh).transpose(0, 2, 1, 3).astype(jnp.bfloat16)
    kh = k.reshape(B, Sk, n_head, dh).transpose(0, 2, 1, 3).astype(jnp.bfloat16)
    vh = v.reshape(B, Sk, n_head, dh).transpose(0, 2, 1, 3).astype(jnp.bfloat16)
    s = jnp.einsum('bhqd,bhkd->bhqk', qh, kh, preferred_element_type=jnp.float32)
    keep = (pad > 0.0)[:, None, None, :]
    if causal:
        keep = keep & jnp.tril(jnp.ones((Sq, Sk), bool))[None, None]
    s = jnp.where(keep, s, NEG_INF)
    a = jax.nn.softmax(s, axis=-1)
    ctx = jnp.einsum('bhqk,bhkd->bhqd', a.astype(jnp.bfloat16), vh,
                     preferred_element_type=jnp.float32)
    ctx = ctx.transpose(0, 2, 1, 3).reshape(B, Sq, D)
    wo = p['wo3'].reshape(D, D)
    o = jnp.einsum('bsd,de->bse', ctx.astype(jnp.bfloat16), wo,
                   preferred_element_type=jnp.float32) + p['bo']
    return _layernorm(o + xq.astype(jnp.float32),
                      p['ln_g'], p['ln_b']).astype(jnp.bfloat16)


def _ref_ffn(x, p):
    h = jnp.einsum('bsd,dh->bsh', x, p['w1'],
                   preferred_element_type=jnp.float32) + p['b1']
    h = jnp.maximum(h, 0.0)
    o = jnp.einsum('bsh,hd->bsd', h.astype(jnp.bfloat16), p['w2'],
                   preferred_element_type=jnp.float32) + p['b2']
    return _layernorm(o + x.astype(jnp.float32),
                      p['ln_g'], p['ln_b']).astype(jnp.bfloat16)


def decoder_forward_ref(params, tgt, src, tgt_pad, src_pad, *, n_head, d_model):
    St = tgt.shape[1]
    emb = jnp.take(params['emb'], tgt, axis=0) * math.sqrt(d_model)
    x = _layernorm(emb + params['pe'][:St][None], params['ln_g'],
                   params['ln_b']).astype(jnp.bfloat16)
    src_b = src.astype(jnp.bfloat16)
    for lp in params['layers']:
        x = _ref_attention(x, x, tgt_pad, lp['self'], n_head=n_head, causal=True)
        x = _ref_attention(x, src_b, src_pad, lp['cross'], n_head=n_head,
                           causal=False)
        x = _ref_ffn(x, lp['ffn'])
    return x.astype(jnp.float32)


# ----------------------------- param init -----------------------------

def _xavier(key, shape, dtype=jnp.float32):
    limit = math.sqrt(6.0 / (shape[0] + shape[1]))
    return jax.random.uniform(key, shape, jnp.float32, -limit, limit).astype(dtype)


def _positional_encoding(max_len, d_model):
    position = jnp.arange(max_len, dtype=jnp.float32)[:, None]
    div_term = jnp.exp(jnp.arange(0, d_model, 2, dtype=jnp.float32)
                       * (-math.log(10000.0) / d_model))
    pe = jnp.zeros((max_len, d_model), jnp.float32)
    pe = pe.at[:, 0::2].set(jnp.sin(position * div_term))
    pe = pe.at[:, 1::2].set(jnp.cos(position * div_term))
    return pe


def init_params(key, *, vocab, d_model, n_head, d_hidden, n_layer, max_len,
                pad_idx):
    keys = iter(jax.random.split(key, 4 + 8 * n_layer))
    nk = lambda: next(keys)
    wdt = jnp.bfloat16            # MXU weights in bf16 (f32 accumulation)
    dh = d_model // n_head

    def attn_params():
        wo = _xavier(nk(), (d_model, d_model), wdt)
        return dict(
            wq=_xavier(nk(), (d_model, d_model), wdt),
            bq=jnp.zeros((1, d_model), jnp.float32),
            wkv=_xavier(nk(), (d_model, 2 * d_model), wdt),
            bkv=jnp.zeros((1, 2 * d_model), jnp.float32),
            wo3=wo.reshape(n_head, dh, d_model),   # head-split output projection
            bo=jnp.zeros((1, d_model), jnp.float32),
            ln_g=jnp.ones((1, d_model), jnp.float32),
            ln_b=jnp.zeros((1, d_model), jnp.float32),
        )

    def ffn_params():
        return dict(
            w1=_xavier(nk(), (d_model, d_hidden), wdt),
            b1=jnp.zeros((1, d_hidden), jnp.float32),
            w2=_xavier(nk(), (d_hidden, d_model), wdt),
            b2=jnp.zeros((1, d_model), jnp.float32),
            ln_g=jnp.ones((1, d_model), jnp.float32),
            ln_b=jnp.zeros((1, d_model), jnp.float32),
        )

    emb = _xavier(nk(), (vocab, d_model))
    emb = emb.at[pad_idx].set(0.0)       # nn.Embedding(padding_idx=...) zero row
    return dict(
        emb=emb,
        pe=_positional_encoding(max_len, d_model),
        ln_g=jnp.ones((1, d_model), jnp.float32),
        ln_b=jnp.zeros((1, d_model), jnp.float32),
        layers=[dict(self=attn_params(), cross=attn_params(),
                     ffn=ffn_params()) for _ in range(n_layer)],
    )


# ----------------------------- main -----------------------------

if __name__ == "__main__":
    PAD_IDX = 0
    VOCAB = 97
    D_MODEL = 128            # lane-dense (multiple of 128)
    N_HEAD = 4               # dh = 32
    MAX_LEN = 32
    D_HIDDEN = 256
    N_LAYER = 2
    B, S_SRC, S_TGT = 2, 16, 16
    Q_TILE = 8               # 2 q-tiles: exercises the scratch-persistent KV path

    _single_buffer_supported()           # probe Buffered(1) once, outside jit
    _vmem_capacity_bytes()

    root = jax.random.PRNGKey(0)
    k_params, k_tgt, k_mem, k_src = jax.random.split(root, 4)

    params = init_params(k_params, vocab=VOCAB, d_model=D_MODEL, n_head=N_HEAD,
                         d_hidden=D_HIDDEN, n_layer=N_LAYER, max_len=MAX_LEN,
                         pad_idx=PAD_IDX)

    # target token ids with some padding
    tgt = jax.random.randint(k_tgt, (B, S_TGT), 1, VOCAB, dtype=jnp.int32)
    tgt = tgt.at[0, 12:].set(PAD_IDX)

    # `src` in Decoder.forward is the encoder memory (float activations)
    src_mem = jax.random.normal(k_mem, (B, S_SRC, D_MODEL), jnp.float32)

    # source pad pattern (what src_mask encodes)
    src_tok = jax.random.randint(k_src, (B, S_SRC), 1, VOCAB, dtype=jnp.int32)
    src_tok = src_tok.at[1, 13:].set(PAD_IDX)

    tgt_pad = (tgt != PAD_IDX).astype(jnp.float32)        # (B, St)
    src_pad = (src_tok != PAD_IDX).astype(jnp.float32)    # (B, Ss)

    fwd = jax.jit(functools.partial(decoder_forward, n_head=N_HEAD,
                                    d_model=D_MODEL, q_tile=Q_TILE))
    out = fwd(params, tgt, src_mem, tgt_pad, src_pad)
    jax.block_until_ready(out)

    ref = decoder_forward_ref(params, tgt, src_mem, tgt_pad, src_pad,
                              n_head=N_HEAD, d_model=D_MODEL)
    err = float(jnp.max(jnp.abs(out - ref)))

    assert out.shape == (B, S_TGT, D_MODEL)
    assert bool(jnp.all(jnp.isfinite(out)))
    assert err < 0.25, f"kernel vs reference mismatch: max abs err = {err}"
    print("KERNEL_OK")
</pallas_src>

<mosaic_0001>
module attributes {stable_mosaic.version = 11 : i64} {
  func.func @_probe_kernel(%arg0: i32, %arg1: memref<8x128xf32, #tpu.memory_space<vmem>>, %arg2: memref<8x128xf32, #tpu.memory_space<vmem>>) attributes {dimension_semantics = [#tpu.dimension_semantics<arbitrary>], iteration_bounds = array<i64: 1>, scalar_prefetch = 0 : i64, scratch_operands = 0 : i64, tpu.core_type = #tpu.core_type<tc>, window_params = [{pipeline_mode = #tpu.pipeline_mode<synchronous>, transform_indices = @transform_0, window_bounds = array<i64: 8, 128>}, {pipeline_mode = #tpu.pipeline_mode<synchronous>, transform_indices = @transform_1, window_bounds = array<i64: 8, 128>}]} {
    %c0 = arith.constant 0 : index
    %c0_0 = arith.constant 0 : index
    %0 = vector.load %arg1[%c0, %c0_0] : memref<8x128xf32, #tpu.memory_space<vmem>>, vector<8x128xf32>
    %cst = arith.constant 1.000000e+00 : f32
    %1 = vector.broadcast %cst : f32 to vector<8x128xf32>
    %2 = arith.addf %0, %1 : vector<8x128xf32>
    %c0_1 = arith.constant 0 : index
    %c0_2 = arith.constant 0 : index
    %3 = vector.load %arg2[%c0_1, %c0_2] : memref<8x128xf32, #tpu.memory_space<vmem>>, vector<8x128xf32>
    tpu.vector_store %arg2[%c0_1, %c0_2], %2 {strides = array<i32>} : memref<8x128xf32, #tpu.memory_space<vmem>>, vector<8x128xf32>,
    return
  }
  func.func @transform_0(%arg0: i32) -> (i32, i32) {
    %c0_i32 = arith.constant 0 : i32
    %c0_i32_0 = arith.constant 0 : i32
    %c0_i32_1 = arith.constant 0 : i32
    return %c0_i32, %c0_i32_0 : i32, i32
  }
  func.func @transform_1(%arg0: i32) -> (i32, i32) {
    %c0_i32 = arith.constant 0 : i32
    %c0_i32_0 = arith.constant 0 : i32
    %c0_i32_1 = arith.constant 0 : i32
    return %c0_i32, %c0_i32_0 : i32, i32
  }
}

module attributes {stable_mosaic.version = 11 : i64} {
  func.func @_attn_ln_kernel(%arg0: i32, %arg1: i32, %arg2: memref<1x8x128xbf16, #tpu.memory_space<vmem>>, %arg3: memref<1x16x128xbf16, #tpu.memory_space<vmem>>, %arg4: memref<1x1x16xf32, #tpu.memory_space<vmem>>, %arg5: memref<128x128xbf16, #tpu.memory_space<vmem>>, %arg6: memref<1x128xf32, #tpu.memory_space<vmem>>, %arg7: memref<128x256xbf16, #tpu.memory_space<vmem>>, %arg8: memref<1x256xf32, #tpu.memory_space<vmem>>, %arg9: memref<4x32x128xbf16, #tpu.memory_space<vmem>>, %arg10: memref<1x128xf32, #tpu.memory_space<vmem>>, %arg11: memref<1x128xf32, #tpu.memory_space<vmem>>, %arg12: memref<1x128xf32, #tpu.memory_space<vmem>>, %arg13: memref<1x8x128xbf16, #tpu.memory_space<vmem>>, %arg14: memref<4x16x32xbf16, #tpu.memory_space<vmem>>, %arg15: memref<4x16x32xbf16, #tpu.memory_space<vmem>>) attributes {dimension_semantics = [#tpu.dimension_semantics<parallel>, #tpu.dimension_semantics<arbitrary>], iteration_bounds = array<i64: 2, 2>, scalar_prefetch = 0 : i64, scratch_operands = 2 : i64, tpu.core_type = #tpu.core_type<tc>, window_params = [{transform_indices = @transform_0, window_bounds = array<i64: 1, 8, 128>}, {transform_indices = @transform_1, window_bounds = array<i64: 1, 16, 128>}, {transform_indices = @transform_2, window_bounds = array<i64: 1, 1, 16>}, {pipeline_mode = #tpu.pipeline_mode<synchronous>, transform_indices = @transform_3, window_bounds = array<i64: 128, 128>}, {pipeline_mode = #tpu.pipeline_mode<synchronous>, transform_indices = @transform_4, window_bounds = array<i64: 1, 128>}, {pipeline_mode = #tpu.pipeline_mode<synchronous>, transform_indices = @transform_5, window_bounds = array<i64: 128, 256>}, {pipeline_mode = #tpu.pipeline_mode<synchronous>, transform_indices = @transform_6, window_bounds = array<i64: 1, 256>}, {pipeline_mode = #tpu.pipeline_mode<synchronous>, transform_indices = @transform_7, window_bounds = array<i64: 4, 32, 128>}, {pipeline_mode = #tpu.pipeline_mode<synchronous>, transform_indices = @transform_8, window_bounds = array<i64: 1, 128>}, {pipeline_mode = #tpu.pipeline_mode<synchronous>, transform_indices = @transform_9, window_bounds = array<i64: 1, 128>}, {pipeline_mode = #tpu.pipeline_mode<synchronous>, transform_indices = @transform_10, window_bounds = array<i64: 1, 128>}, {transform_indices = @transform_11, window_bounds = array<i64: 1, 8, 128>}]} {
    %c0_i32 = arith.constant 0 : i32
    %0 = arith.cmpi eq, %arg1, %c0_i32 : i32
    %1 = arith.extui %0 : i1 to i32
    %c0_i32_0 = arith.constant 0 : i32
    %2 = arith.cmpi ne, %1, %c0_i32_0 : i32
    scf.if %2 {
      %c0_42 = arith.constant 0 : index
      %c0_43 = arith.constant 0 : index
      %c0_44 = arith.constant 0 : index
      %91 = vector.load %arg3[%c0_42, %c0_43, %c0_44] : memref<1x16x128xbf16, #tpu.memory_space<vmem>>, vector<1x16x128xbf16>
      %92 = vector.shape_cast %91 : vector<1x16x128xbf16> to vector<16x128xbf16>
      %c0_45 = arith.constant 0 : index
      %c0_46 = arith.constant 0 : index
      %93 = vector.load %arg7[%c0_45, %c0_46] : memref<128x256xbf16, #tpu.memory_space<vmem>>, vector<128x256xbf16>
      %cst_47 = arith.constant dense<0.000000e+00> : vector<16x256xf32>
      %94 = tpu.matmul %92, %93, %cst_47 {dimension_numbers = #tpu.dot_dimension_numbers<[1], [0], [0], [1], [0, 0, 1, 1], [], []>} : vector<16x128xbf16>, vector<128x256xbf16>, vector<16x256xf32> -> vector<16x256xf32>
      %c0_48 = arith.constant 0 : index
      %c0_49 = arith.constant 0 : index
      %95 = vector.load %arg8[%c0_48, %c0_49] : memref<1x256xf32, #tpu.memory_space<vmem>>, vector<1x256xf32>
      %96 = vector.broadcast %95 : vector<1x256xf32> to vector<16x256xf32>
      %97 = arith.addf %94, %96 : vector<16x256xf32>
      %98 = vector.extract_strided_slice %97 {offsets = [0, 0], sizes = [16, 32], strides = [1, 1]} : vector<16x256xf32> to vector<16x32xf32>
      %99 = arith.truncf %98 : vector<16x32xf32> to vector<16x32xbf16>
      %c0_50 = arith.constant 0 : index
      %c0_51 = arith.constant 0 : index
      %c0_52 = arith.constant 0 : index
      %100 = vector.load %arg14[%c0_50, %c0_51, %c0_52] : memref<4x16x32xbf16, #tpu.memory_space<vmem>>, vector<1x16x32xbf16>
      %101 = vector.shape_cast %100 : vector<1x16x32xbf16> to vector<16x32xbf16>
      %102 = vector.shape_cast %99 : vector<16x32xbf16> to vector<1x16x32xbf16>
      tpu.vector_store %arg14[%c0_50, %c0_51, %c0_52], %102 {strides = array<i32>} : memref<4x16x32xbf16, #tpu.memory_space<vmem>>, vector<1x16x32xbf16>,
      %103 = vector.extract_strided_slice %97 {offsets = [0, 128], sizes = [16, 32], strides = [1, 1]} : vector<16x256xf32> to vector<16x32xf32>
      %104 = arith.truncf %103 : vector<16x32xf32> to vector<16x32xbf16>
      %c0_53 = arith.constant 0 : index
      %c0_54 = arith.constant 0 : index
      %c0_55 = arith.constant 0 : index
      %105 = vector.load %arg15[%c0_53, %c0_54, %c0_55] : memref<4x16x32xbf16, #tpu.memory_space<vmem>>, vector<1x16x32xbf16>
      %106 = vector.shape_cast %105 : vector<1x16x32xbf16> to vector<16x32xbf16>
      %107 = vector.shape_cast %104 : vector<16x32xbf16> to vector<1x16x32xbf16>
      tpu.vector_store %arg15[%c0_53, %c0_54, %c0_55], %107 {strides = array<i32>} : memref<4x16x32xbf16, #tpu.memory_space<vmem>>, vector<1x16x32xbf16>,
      %108 = vector.extract_strided_slice %97 {offsets = [0, 32], sizes = [16, 32], strides = [1, 1]} : vector<16x256xf32> to vector<16x32xf32>
      %109 = arith.truncf %108 : vector<16x32xf32> to vector<16x32xbf16>
      %c1 = arith.constant 1 : index
      %c0_56 = arith.constant 0 : index
      %c0_57 = arith.constant 0 : index
      %110 = vector.load %arg14[%c1, %c0_56, %c0_57] : memref<4x16x32xbf16, #tpu.memory_space<vmem>>, vector<1x16x32xbf16>
      %111 = vector.shape_cast %110 : vector<1x16x32xbf16> to vector<16x32xbf16>
      %112 = vector.shape_cast %109 : vector<16x32xbf16> to vector<1x16x32xbf16>
      tpu.vector_store %arg14[%c1, %c0_56, %c0_57], %112 {strides = array<i32>} : memref<4x16x32xbf16, #tpu.memory_space<vmem>>, vector<1x16x32xbf16>,
      %113 = vector.extract_strided_slice %97 {offsets = [0, 160], sizes = [16, 32], strides = [1, 1]} : vector<16x256xf32> to vector<16x32xf32>
      %114 = arith.truncf %113 : vector<16x32xf32> to vector<16x32xbf16>
      %c1_58 = arith.constant 1 : index
      %c0_59 = arith.constant 0 : index
      %c0_60 = arith.constant 0 : index
      %115 = vector.load %arg15[%c1_58, %c0_59, %c0_60] : memref<4x16x32xbf16, #tpu.memory_space<vmem>>, vector<1x16x32xbf16>
      %116 = vector.shape_cast %115 : vector<1x16x32xbf16> to vector<16x32xbf16>
      %117 = vector.shape_cast %114 : vector<16x32xbf16> to vector<1x16x32xbf16>
      tpu.vector_store %arg15[%c1_58, %c0_59, %c0_60], %117 {strides = array<i32>} : memref<4x16x32xbf16, #tpu.memory_space<vmem>>, vector<1x16x32xbf16>,
      %118 = vector.extract_strided_slice %97 {offsets = [0, 64], sizes = [16, 32], strides = [1, 1]} : vector<16x256xf32> to vector<16x32xf32>
      %119 = arith.truncf %118 : vector<16x32xf32> to vector<16x32xbf16>
      %c2 = arith.constant 2 : index
      %c0_61 = arith.constant 0 : index
      %c0_62 = arith.constant 0 : index
      %120 = vector.load %arg14[%c2, %c0_61, %c0_62] : memref<4x16x32xbf16, #tpu.memory_space<vmem>>, vector<1x16x32xbf16>
      %121 = vector.shape_cast %120 : vector<1x16x32xbf16> to vector<16x32xbf16>
      %122 = vector.shape_cast %119 : vector<16x32xbf16> to vector<1x16x32xbf16>
      tpu.vector_store %arg14[%c2, %c0_61, %c0_62], %122 {strides = array<i32>} : memref<4x16x32xbf16, #tpu.memory_space<vmem>>, vector<1x16x32xbf16>,
      %123 = vector.extract_strided_slice %97 {offsets = [0, 192], sizes = [16, 32], strides = [1, 1]} : vector<16x256xf32> to vector<16x32xf32>
      %124 = arith.truncf %123 : vector<16x32xf32> to vector<16x32xbf16>
      %c2_63 = arith.constant 2 : index
      %c0_64 = arith.constant 0 : index
      %c0_65 = arith.constant 0 : index
      %125 = vector.load %arg15[%c2_63, %c0_64, %c0_65] : memref<4x16x32xbf16, #tpu.memory_space<vmem>>, vector<1x16x32xbf16>
      %126 = vector.shape_cast %125 : vector<1x16x32xbf16> to vector<16x32xbf16>
      %127 = vector.shape_cast %124 : vector<16x32xbf16> to vector<1x16x32xbf16>
      tpu.vector_store %arg15[%c2_63, %c0_64, %c0_65], %127 {strides = array<i32>} : memref<4x16x32xbf16, #tpu.memory_space<vmem>>, vector<1x16x32xbf16>,
      %128 = vector.extract_strided_slice %97 {offsets = [0, 96], sizes = [16, 32], strides = [1, 1]} : vector<16x256xf32> to vector<16x32xf32>
      %129 = arith.truncf %128 : vector<16x32xf32> to vector<16x32xbf16>
      %c3 = arith.constant 3 : index
      %c0_66 = arith.constant 0 : index
      %c0_67 = arith.constant 0 : index
      %130 = vector.load %arg14[%c3, %c0_66, %c0_67] : memref<4x16x32xbf16, #tpu.memory_space<vmem>>, vector<1x16x32xbf16>
      %131 = vector.shape_cast %130 : vector<1x16x32xbf16> to vector<16x32xbf16>
      %132 = vector.shape_cast %129 : vector<16x32xbf16> to vector<1x16x32xbf16>
      tpu.vector_store %arg14[%c3, %c0_66, %c0_67], %132 {strides = array<i32>} : memref<4x16x32xbf16, #tpu.memory_space<vmem>>, vector<1x16x32xbf16>,
      %133 = vector.extract_strided_slice %97 {offsets = [0, 224], sizes = [16, 32], strides = [1, 1]} : vector<16x256xf32> to vector<16x32xf32>
      %134 = arith.truncf %133 : vector<16x32xf32> to vector<16x32xbf16>
      %c3_68 = arith.constant 3 : index
      %c0_69 = arith.constant 0 : index
      %c0_70 = arith.constant 0 : index
      %135 = vector.load %arg15[%c3_68, %c0_69, %c0_70] : memref<4x16x32xbf16, #tpu.memory_space<vmem>>, vector<1x16x32xbf16>
      %136 = vector.shape_cast %135 : vector<1x16x32xbf16> to vector<16x32xbf16>
      %137 = vector.shape_cast %134 : vector<16x32xbf16> to vector<1x16x32xbf16>
      tpu.vector_store %arg15[%c3_68, %c0_69, %c0_70], %137 {strides = array<i32>} : memref<4x16x32xbf16, #tpu.memory_space<vmem>>, vector<1x16x32xbf16>,
    } else {
    }
    %c0 = arith.constant 0 : index
    %c0_1 = arith.constant 0 : index
    %c0_2 = arith.constant 0 : index
    %3 = vector.load %arg2[%c0, %c0_1, %c0_2] : memref<1x8x128xbf16, #tpu.memory_space<vmem>>, vector<1x8x128xbf16>
    %4 = vector.shape_cast %3 : vector<1x8x128xbf16> to vector<8x128xbf16>
    %c0_3 = arith.constant 0 : index
    %c0_4 = arith.constant 0 : index
    %5 = vector.load %arg5[%c0_3, %c0_4] : memref<128x128xbf16, #tpu.memory_space<vmem>>, vector<128x128xbf16>
    %cst = arith.constant dense<0.000000e+00> : vector<8x128xf32>
    %6 = tpu.matmul %4, %5, %cst {dimension_numbers = #tpu.dot_dimension_numbers<[1], [0], [0], [1], [0, 0, 1, 1], [], []>} : vector<8x128xbf16>, vector<128x128xbf16>, vector<8x128xf32> -> vector<8x128xf32>
    %c0_5 = arith.constant 0 : index
    %c0_6 = arith.constant 0 : index
    %7 = vector.load %arg6[%c0_5, %c0_6] : memref<1x128xf32, #tpu.memory_space<vmem>>, vector<1x128xf32>
    %8 = vector.broadcast %7 : vector<1x128xf32> to vector<8x128xf32>
    %9 = arith.addf %6, %8 : vector<8x128xf32>
    %cst_7 = arith.constant 0.176776692 : f32
    %10 = vector.broadcast %cst_7 : f32 to vector<8x128xf32>
    %11 = arith.mulf %9, %10 : vector<8x128xf32>
    %12 = vector.extract_strided_slice %11 {offsets = [0, 0], sizes = [8, 32], strides = [1, 1]} : vector<8x128xf32> to vector<8x32xf32>
    %13 = vector.extract_strided_slice %11 {offsets = [0, 32], sizes = [8, 32], strides = [1, 1]} : vector<8x128xf32> to vector<8x32xf32>
    %14 = vector.extract_strided_slice %11 {offsets = [0, 64], sizes = [8, 32], strides = [1, 1]} : vector<8x128xf32> to vector<8x32xf32>
    %15 = vector.extract_strided_slice %11 {offsets = [0, 96], sizes = [8, 32], strides = [1, 1]} : vector<8x128xf32> to vector<8x32xf32>
    %16 = vector.shape_cast %12 : vector<8x32xf32> to vector<1x8x32xf32>
    %17 = vector.shape_cast %13 : vector<8x32xf32> to vector<1x8x32xf32>
    %18 = vector.shape_cast %14 : vector<8x32xf32> to vector<1x8x32xf32>
    %19 = vector.shape_cast %15 : vector<8x32xf32> to vector<1x8x32xf32>
    %20 = tpu.concatenate %16, %17, %18, %19 in 0 : vector<1x8x32xf32>, vector<1x8x32xf32>, vector<1x8x32xf32>, vector<1x8x32xf32> -> vector<4x8x32xf32>
    %21 = arith.truncf %20 : vector<4x8x32xf32> to vector<4x8x32xbf16>
    %c8_i32 = arith.constant 8 : i32
    %22 = arith.muli %arg1, %c8_i32 : i32
    %23 = tpu.iota {dimensions = array<i32: 0>} : vector<8x16xi32>
    %24 = vector.broadcast %22 : i32 to vector<8x16xi32>
    %25 = arith.addi %24, %23 : vector<8x16xi32>
    %26 = tpu.iota {dimensions = array<i32: 1>} : vector<8x16xi32>
    %27 = arith.cmpi sle, %26, %25 : vector<8x16xi32>
    %c0_8 = arith.constant 0 : index
    %c0_9 = arith.constant 0 : index
    %c0_10 = arith.constant 0 : index
    %28 = vector.load %arg4[%c0_8, %c0_9, %c0_10] : memref<1x1x16xf32, #tpu.memory_space<vmem>>, vector<1x1x16xf32>
    %29 = vector.shape_cast %28 : vector<1x1x16xf32> to vector<1x16xf32>
    %cst_11 = arith.constant 0.000000e+00 : f32
    %30 = vector.broadcast %cst_11 : f32 to vector<1x16xf32>
    %31 = arith.cmpf ogt, %29, %30 : vector<1x16xf32>
    %32 = vector.broadcast %31 : vector<1x16xi1> to vector<8x16xi1>
    %33 = arith.andi %27, %32 : vector<8x16xi1>
    %c0_12 = arith.constant 0 : index
    %c0_13 = arith.constant 0 : index
    %c0_14 = arith.constant 0 : index
    %34 = vector.load %arg14[%c0_12, %c0_13, %c0_14] : memref<4x16x32xbf16, #tpu.memory_space<vmem>>, vector<4x16x32xbf16>
    "tpu.trace_start"() <{level = 10 : i32, message = "hqd,hkd->hqk"}> : () -> ()
    %cst_15 = arith.constant dense<0.000000e+00> : vector<4x8x16xf32>
    %35 = tpu.matmul %21, %34, %cst_15 {dimension_numbers = #tpu.dot_dimension_numbers<[2], [2], [1], [1], [0, 0, 0, 1, 1, 1], [0], [0]>} : vector<4x8x32xbf16>, vector<4x16x32xbf16>, vector<4x8x16xf32> -> vector<4x8x16xf32>
    "tpu.trace_stop"() : () -> ()
    %36 = vector.shape_cast %33 : vector<8x16xi1> to vector<1x8x16xi1>
    %cst_16 = arith.constant -1.000000e+09 : f32
    %37 = vector.shape_cast %36 : vector<1x8x16xi1> to vector<1x8x16xi1>
    %38 = vector.broadcast %37 : vector<1x8x16xi1> to vector<4x8x16xi1>
    %39 = vector.broadcast %cst_16 : f32 to vector<4x8x16xf32>
    %40 = arith.select %38, %35, %39 : vector<4x8x16xi1>, vector<4x8x16xf32>
    %cst_17 = arith.constant dense<0xFF800000> : vector<4x8xf32>
    %41 = vector.multi_reduction <maximumf>, %40, %cst_17 [2] : vector<4x8x16xf32> to vector<4x8xf32>
    %42 = vector.shape_cast %41 : vector<4x8xf32> to vector<4x8x1xf32>
    %43 = vector.broadcast %42 : vector<4x8x1xf32> to vector<4x8x16xf32>
    %44 = arith.subf %40, %43 : vector<4x8x16xf32>
    %45 = math.exp %44 : vector<4x8x16xf32>
    %cst_18 = arith.constant dense<0.000000e+00> : vector<4x8xf32>
    %46 = vector.multi_reduction <add>, %45, %cst_18 [2] : vector<4x8x16xf32> to vector<4x8xf32>
    %47 = vector.shape_cast %46 : vector<4x8xf32> to vector<4x8x1xf32>
    %48 = tpu.reciprocal %47 {approx = true} : vector<4x8x1xf32> -> vector<4x8x1xf32>
    %49 = vector.broadcast %48 : vector<4x8x1xf32> to vector<4x8x16xf32>
    %50 = arith.mulf %45, %49 : vector<4x8x16xf32>
    %51 = arith.truncf %50 : vector<4x8x16xf32> to vector<4x8x16xbf16>
    %c0_19 = arith.constant 0 : index
    %c0_20 = arith.constant 0 : index
    %c0_21 = arith.constant 0 : index
    %52 = vector.load %arg15[%c0_19, %c0_20, %c0_21] : memref<4x16x32xbf16, #tpu.memory_space<vmem>>, vector<4x16x32xbf16>
    "tpu.trace_start"() <{level = 10 : i32, message = "hqk,hkd->hqd"}> : () -> ()
    %cst_22 = arith.constant dense<0.000000e+00> : vector<4x8x32xf32>
    %53 = tpu.matmul %51, %52, %cst_22 {dimension_numbers = #tpu.dot_dimension_numbers<[2], [1], [1], [2], [0, 0, 0, 1, 1, 2], [0], [0]>} : vector<4x8x16xbf16>, vector<4x16x32xbf16>, vector<4x8x32xf32> -> vector<4x8x32xf32>
    "tpu.trace_stop"() : () -> ()
    %54 = arith.truncf %53 : vector<4x8x32xf32> to vector<4x8x32xbf16>
    %c0_23 = arith.constant 0 : index
    %c0_24 = arith.constant 0 : index
    %c0_25 = arith.constant 0 : index
    %55 = vector.load %arg9[%c0_23, %c0_24, %c0_25] : memref<4x32x128xbf16, #tpu.memory_space<vmem>>, vector<4x32x128xbf16>
    "tpu.trace_start"() <{level = 10 : i32, message = "hqd,hdn->hqn"}> : () -> ()
    %cst_26 = arith.constant dense<0.000000e+00> : vector<4x8x128xf32>
    %56 = tpu.matmul %54, %55, %cst_26 {dimension_numbers = #tpu.dot_dimension_numbers<[2], [1], [1], [2], [0, 0, 0, 1, 1, 2], [0], [0]>} : vector<4x8x32xbf16>, vector<4x32x128xbf16>, vector<4x8x128xf32> -> vector<4x8x128xf32>
    "tpu.trace_stop"() : () -> ()
    %cst_27 = arith.constant dense<0.000000e+00> : vector<8x128xf32>
    %57 = vector.multi_reduction <add>, %56, %cst_27 [0] : vector<4x8x128xf32> to vector<8x128xf32>
    %c0_28 = arith.constant 0 : index
    %c0_29 = arith.constant 0 : index
    %58 = vector.load %arg10[%c0_28, %c0_29] : memref<1x128xf32, #tpu.memory_space<vmem>>, vector<1x128xf32>
    %59 = vector.broadcast %58 : vector<1x128xf32> to vector<8x128xf32>
    %60 = arith.addf %57, %59 : vector<8x128xf32>
    %61 = arith.extf %4 : vector<8x128xbf16> to vector<8x128xf32>
    %62 = arith.addf %60, %61 : vector<8x128xf32>
    %c0_30 = arith.constant 0 : index
    %c0_31 = arith.constant 0 : index
    %63 = vector.load %arg11[%c0_30, %c0_31] : memref<1x128xf32, #tpu.memory_space<vmem>>, vector<1x128xf32>
    %c0_32 = arith.constant 0 : index
    %c0_33 = arith.constant 0 : index
    %64 = vector.load %arg12[%c0_32, %c0_33] : memref<1x128xf32, #tpu.memory_space<vmem>>, vector<1x128xf32>
    %cst_34 = arith.constant dense<0.000000e+00> : vector<8xf32>
    %65 = vector.multi_reduction <add>, %62, %cst_34 [1] : vector<8x128xf32> to vector<8xf32>
    %66 = vector.shape_cast %65 : vector<8xf32> to vector<8x1xf32>
    %cst_35 = arith.constant 1.280000e+02 : f32
    %67 = vector.broadcast %cst_35 : f32 to vector<8x1xf32>
    %68 = arith.divf %66, %67 : vector<8x1xf32>
    %69 = vector.broadcast %68 : vector<8x1xf32> to vector<8x128xf32>
    %70 = arith.subf %62, %69 : vector<8x128xf32>
    %71 = arith.mulf %70, %70 : vector<8x128xf32>
    %cst_36 = arith.constant dense<0.000000e+00> : vector<8xf32>
    %72 = vector.multi_reduction <add>, %71, %cst_36 [1] : vector<8x128xf32> to vector<8xf32>
    %73 = vector.shape_cast %72 : vector<8xf32> to vector<8x1xf32>
    %cst_37 = arith.constant 1.280000e+02 : f32
    %74 = vector.broadcast %cst_37 : f32 to vector<8x1xf32>
    %75 = arith.divf %73, %74 : vector<8x1xf32>
    %76 = vector.broadcast %68 : vector<8x1xf32> to vector<8x128xf32>
    %77 = arith.subf %62, %76 : vector<8x128xf32>
    %cst_38 = arith.constant 9.99999974E-6 : f32
    %78 = vector.broadcast %cst_38 : f32 to vector<8x1xf32>
    %79 = arith.addf %75, %78 : vector<8x1xf32>
    %80 = math.rsqrt %79 : vector<8x1xf32>
    %81 = vector.broadcast %80 : vector<8x1xf32> to vector<8x128xf32>
    %82 = arith.mulf %77, %81 : vector<8x128xf32>
    %83 = vector.broadcast %63 : vector<1x128xf32> to vector<8x128xf32>
    %84 = arith.mulf %82, %83 : vector<8x128xf32>
    %85 = vector.broadcast %64 : vector<1x128xf32> to vector<8x128xf32>
    %86 = arith.addf %84, %85 : vector<8x128xf32>
    %87 = arith.truncf %86 : vector<8x128xf32> to vector<8x128xbf16>
    %c0_39 = arith.constant 0 : index
    %c0_40 = arith.constant 0 : index
    %c0_41 = arith.constant 0 : index
    %88 = vector.load %arg13[%c0_39, %c0_40, %c0_41] : memref<1x8x128xbf16, #tpu.memory_space<vmem>>, vector<1x8x128xbf16>
    %89 = vector.shape_cast %88 : vector<1x8x128xbf16> to vector<8x128xbf16>
    %90 = vector.shape_cast %87 : vector<8x128xbf16> to vector<1x8x128xbf16>
    tpu.vector_store %arg13[%c0_39, %c0_40, %c0_41], %90 {strides = array<i32>} : memref<1x8x128xbf16, #tpu.memory_space<vmem>>, vector<1x8x128xbf16>,
    return
  }
  func.func @transform_0(%arg0: i32, %arg1: i32) -> (i32, i32, i32) {
    %c0_i32 = arith.constant 0 : i32
    %c0_i32_0 = arith.constant 0 : i32
    return %arg0, %arg1, %c0_i32 : i32, i32, i32
  }
  func.func @transform_1(%arg0: i32, %arg1: i32) -> (i32, i32, i32) {
    %c0_i32 = arith.constant 0 : i32
    %c0_i32_0 = arith.constant 0 : i32
    %c0_i32_1 = arith.constant 0 : i32
    return %arg0, %c0_i32, %c0_i32_0 : i32, i32, i32
  }
  func.func @transform_2(%arg0: i32, %arg1: i32) -> (i32, i32, i32) {
    %c0_i32 = arith.constant 0 : i32
    %c0_i32_0 = arith.constant 0 : i32
    %c0_i32_1 = arith.constant 0 : i32
    return %arg0, %c0_i32, %c0_i32_0 : i32, i32, i32
  }
  func.func @transform_3(%arg0: i32, %arg1: i32) -> (i32, i32) {
    %c0_i32 = arith.constant 0 : i32
    %c0_i32_0 = arith.constant 0 : i32
    %c0_i32_1 = arith.constant 0 : i32
    return %c0_i32, %c0_i32_0 : i32, i32
  }
  func.func @transform_4(%arg0: i32, %arg1: i32) -> (i32, i32) {
    %c0_i32 = arith.constant 0 : i32
    %c0_i32_0 = arith.constant 0 : i32
    %c0_i32_1 = arith.constant 0 : i32
    return %c0_i32, %c0_i32_0 : i32, i32
  }
  func.func @transform_5(%arg0: i32, %arg1: i32) -> (i32, i32) {
    %c0_i32 = arith.constant 0 : i32
    %c0_i32_0 = arith.constant 0 : i32
    %c0_i32_1 = arith.constant 0 : i32
    return %c0_i32, %c0_i32_0 : i32, i32
  }
  func.func @transform_6(%arg0: i32, %arg1: i32) -> (i32, i32) {
    %c0_i32 = arith.constant 0 : i32
    %c0_i32_0 = arith.constant 0 : i32
    %c0_i32_1 = arith.constant 0 : i32
    return %c0_i32, %c0_i32_0 : i32, i32
  }
  func.func @transform_7(%arg0: i32, %arg1: i32) -> (i32, i32, i32) {
    %c0_i32 = arith.constant 0 : i32
    %c0_i32_0 = arith.constant 0 : i32
    %c0_i32_1 = arith.constant 0 : i32
    %c0_i32_2 = arith.constant 0 : i32
    return %c0_i32, %c0_i32_0, %c0_i32_1 : i32, i32, i32
  }
  func.func @transform_8(%arg0: i32, %arg1: i32) -> (i32, i32) {
    %c0_i32 = arith.constant 0 : i32
    %c0_i32_0 = arith.constant 0 : i32
    %c0_i32_1 = arith.constant 0 : i32
    return %c0_i32, %c0_i32_0 : i32, i32
  }
  func.func @transform_9(%arg0: i32, %arg1: i32) -> (i32, i32) {
    %c0_i32 = arith.constant 0 : i32
    %c0_i32_0 = arith.constant 0 : i32
    %c0_i32_1 = arith.constant 0 : i32
    return %c0_i32, %c0_i32_0 : i32, i32
  }
  func.func @transform_10(%arg0: i32, %arg1: i32) -> (i32, i32) {
    %c0_i32 = arith.constant 0 : i32
    %c0_i32_0 = arith.constant 0 : i32
    %c0_i32_1 = arith.constant 0 : i32
    return %c0_i32, %c0_i32_0 : i32, i32
  }
  func.func @transform_11(%arg0: i32, %arg1: i32) -> (i32, i32, i32) {
    %c0_i32 = arith.constant 0 : i32
    %c0_i32_0 = arith.constant 0 : i32
    return %arg0, %arg1, %c0_i32 : i32, i32, i32
  }
}

module attributes {stable_mosaic.version = 11 : i64} {
  func.func @_embed_ln_kernel(%arg0: i32, %arg1: memref<1x16x128xf32, #tpu.memory_space<vmem>>, %arg2: memref<16x128xf32, #tpu.memory_space<vmem>>, %arg3: memref<1x128xf32, #tpu.memory_space<vmem>>, %arg4: memref<1x128xf32, #tpu.memory_space<vmem>>, %arg5: memref<1x16x128xbf16, #tpu.memory_space<vmem>>) attributes {dimension_semantics = [#tpu.dimension_semantics<parallel>], iteration_bounds = array<i64: 2>, scalar_prefetch = 0 : i64, scratch_operands = 0 : i64, tpu.core_type = #tpu.core_type<tc>, window_params = [{transform_indices = @transform_0, window_bounds = array<i64: 1, 16, 128>}, {pipeline_mode = #tpu.pipeline_mode<synchronous>, transform_indices = @transform_1, window_bounds = array<i64: 16, 128>}, {pipeline_mode = #tpu.pipeline_mode<synchronous>, transform_indices = @transform_2, window_bounds = array<i64: 1, 128>}, {pipeline_mode = #tpu.pipeline_mode<synchronous>, transform_indices = @transform_3, window_bounds = array<i64: 1, 128>}, {transform_indices = @transform_4, window_bounds = array<i64: 1, 16, 128>}]} {
    %c0 = arith.constant 0 : index
    %c0_0 = arith.constant 0 : index
    %c0_1 = arith.constant 0 : index
    %0 = vector.load %arg1[%c0, %c0_0, %c0_1] : memref<1x16x128xf32, #tpu.memory_space<vmem>>, vector<1x16x128xf32>
    %1 = vector.shape_cast %0 : vector<1x16x128xf32> to vector<16x128xf32>
    %cst = arith.constant 11.3137083 : f32
    %2 = vector.broadcast %cst : f32 to vector<16x128xf32>
    %3 = arith.mulf %1, %2 : vector<16x128xf32>
    %c0_2 = arith.constant 0 : index
    %c0_3 = arith.constant 0 : index
    %4 = vector.load %arg2[%c0_2, %c0_3] : memref<16x128xf32, #tpu.memory_space<vmem>>, vector<16x128xf32>
    %5 = arith.addf %3, %4 : vector<16x128xf32>
    %c0_4 = arith.constant 0 : index
    %c0_5 = arith.constant 0 : index
    %6 = vector.load %arg3[%c0_4, %c0_5] : memref<1x128xf32, #tpu.memory_space<vmem>>, vector<1x128xf32>
    %c0_6 = arith.constant 0 : index
    %c0_7 = arith.constant 0 : index
    %7 = vector.load %arg4[%c0_6, %c0_7] : memref<1x128xf32, #tpu.memory_space<vmem>>, vector<1x128xf32>
    %cst_8 = arith.constant dense<0.000000e+00> : vector<16xf32>
    %8 = vector.multi_reduction <add>, %5, %cst_8 [1] : vector<16x128xf32> to vector<16xf32>
    %9 = vector.shape_cast %8 : vector<16xf32> to vector<16x1xf32>
    %cst_9 = arith.constant 1.280000e+02 : f32
    %10 = vector.broadcast %cst_9 : f32 to vector<16x1xf32>
    %11 = arith.divf %9, %10 : vector<16x1xf32>
    %12 = vector.broadcast %11 : vector<16x1xf32> to vector<16x128xf32>
    %13 = arith.subf %5, %12 : vector<16x128xf32>
    %14 = arith.mulf %13, %13 : vector<16x128xf32>
    %cst_10 = arith.constant dense<0.000000e+00> : vector<16xf32>
    %15 = vector.multi_reduction <add>, %14, %cst_10 [1] : vector<16x128xf32> to vector<16xf32>
    %16 = vector.shape_cast %15 : vector<16xf32> to vector<16x1xf32>
    %cst_11 = arith.constant 1.280000e+02 : f32
    %17 = vector.broadcast %cst_11 : f32 to vector<16x1xf32>
    %18 = arith.divf %16, %17 : vector<16x1xf32>
    %19 = vector.broadcast %11 : vector<16x1xf32> to vector<16x128xf32>
    %20 = arith.subf %5, %19 : vector<16x128xf32>
    %cst_12 = arith.constant 9.99999974E-6 : f32
    %21 = vector.broadcast %cst_12 : f32 to vector<16x1xf32>
    %22 = arith.addf %18, %21 : vector<16x1xf32>
    %23 = math.rsqrt %22 : vector<16x1xf32>
    %24 = vector.broadcast %23 : vector<16x1xf32> to vector<16x128xf32>
    %25 = arith.mulf %20, %24 : vector<16x128xf32>
    %26 = vector.broadcast %6 : vector<1x128xf32> to vector<16x128xf32>
    %27 = arith.mulf %25, %26 : vector<16x128xf32>
    %28 = vector.broadcast %7 : vector<1x128xf32> to vector<16x128xf32>
    %29 = arith.addf %27, %28 : vector<16x128xf32>
    %30 = arith.truncf %29 : vector<16x128xf32> to vector<16x128xbf16>
    %c0_13 = arith.constant 0 : index
    %c0_14 = arith.constant 0 : index
    %c0_15 = arith.constant 0 : index
    %31 = vector.load %arg5[%c0_13, %c0_14, %c0_15] : memref<1x16x128xbf16, #tpu.memory_space<vmem>>, vector<1x16x128xbf16>
    %32 = vector.shape_cast %31 : vector<1x16x128xbf16> to vector<16x128xbf16>
    %33 = vector.shape_cast %30 : vector<16x128xbf16> to vector<1x16x128xbf16>
    tpu.vector_store %arg5[%c0_13, %c0_14, %c0_15], %33 {strides = array<i32>} : memref<1x16x128xbf16, #tpu.memory_space<vmem>>, vector<1x16x128xbf16>,
    return
  }
  func.func @transform_0(%arg0: i32) -> (i32, i32, i32) {
    %c0_i32 = arith.constant 0 : i32
    %c0_i32_0 = arith.constant 0 : i32
    %c0_i32_1 = arith.constant 0 : i32
    return %arg0, %c0_i32, %c0_i32_0 : i32, i32, i32
  }
  func.func @transform_1(%arg0: i32) -> (i32, i32) {
    %c0_i32 = arith.constant 0 : i32
    %c0_i32_0 = arith.constant 0 : i32
    %c0_i32_1 = arith.constant 0 : i32
    return %c0_i32, %c0_i32_0 : i32, i32
  }
  func.func @transform_2(%arg0: i32) -> (i32, i32) {
    %c0_i32 = arith.constant 0 : i32
    %c0_i32_0 = arith.constant 0 : i32
    %c0_i32_1 = arith.constant 0 : i32
    return %c0_i32, %c0_i32_0 : i32, i32
  }
  func.func @transform_3(%arg0: i32) -> (i32, i32) {
    %c0_i32 = arith.constant 0 : i32
    %c0_i32_0 = arith.constant 0 : i32
    %c0_i32_1 = arith.constant 0 : i32
    return %c0_i32, %c0_i32_0 : i32, i32
  }
  func.func @transform_4(%arg0: i32) -> (i32, i32, i32) {
    %c0_i32 = arith.constant 0 : i32
    %c0_i32_0 = arith.constant 0 : i32
    %c0_i32_1 = arith.constant 0 : i32
    return %arg0, %c0_i32, %c0_i32_0 : i32, i32, i32
  }
}

module attributes {stable_mosaic.version = 11 : i64} {
  func.func @_attn_ln_kernel(%arg0: i32, %arg1: i32, %arg2: memref<1x8x128xbf16, #tpu.memory_space<vmem>>, %arg3: memref<1x16x128xbf16, #tpu.memory_space<vmem>>, %arg4: memref<1x1x16xf32, #tpu.memory_space<vmem>>, %arg5: memref<128x128xbf16, #tpu.memory_space<vmem>>, %arg6: memref<1x128xf32, #tpu.memory_space<vmem>>, %arg7: memref<128x256xbf16, #tpu.memory_space<vmem>>, %arg8: memref<1x256xf32, #tpu.memory_space<vmem>>, %arg9: memref<4x32x128xbf16, #tpu.memory_space<vmem>>, %arg10: memref<1x128xf32, #tpu.memory_space<vmem>>, %arg11: memref<1x128xf32, #tpu.memory_space<vmem>>, %arg12: memref<1x128xf32, #tpu.memory_space<vmem>>, %arg13: memref<1x8x128xbf16, #tpu.memory_space<vmem>>, %arg14: memref<4x16x32xbf16, #tpu.memory_space<vmem>>, %arg15: memref<4x16x32xbf16, #tpu.memory_space<vmem>>) attributes {dimension_semantics = [#tpu.dimension_semantics<parallel>, #tpu.dimension_semantics<arbitrary>], iteration_bounds = array<i64: 2, 2>, scalar_prefetch = 0 : i64, scratch_operands = 2 : i64, tpu.core_type = #tpu.core_type<tc>, window_params = [{transform_indices = @transform_0, window_bounds = array<i64: 1, 8, 128>}, {transform_indices = @transform_1, window_bounds = array<i64: 1, 16, 128>}, {transform_indices = @transform_2, window_bounds = array<i64: 1, 1, 16>}, {pipeline_mode = #tpu.pipeline_mode<synchronous>, transform_indices = @transform_3, window_bounds = array<i64: 128, 128>}, {pipeline_mode = #tpu.pipeline_mode<synchronous>, transform_indices = @transform_4, window_bounds = array<i64: 1, 128>}, {pipeline_mode = #tpu.pipeline_mode<synchronous>, transform_indices = @transform_5, window_bounds = array<i64: 128, 256>}, {pipeline_mode = #tpu.pipeline_mode<synchronous>, transform_indices = @transform_6, window_bounds = array<i64: 1, 256>}, {pipeline_mode = #tpu.pipeline_mode<synchronous>, transform_indices = @transform_7, window_bounds = array<i64: 4, 32, 128>}, {pipeline_mode = #tpu.pipeline_mode<synchronous>, transform_indices = @transform_8, window_bounds = array<i64: 1, 128>}, {pipeline_mode = #tpu.pipeline_mode<synchronous>, transform_indices = @transform_9, window_bounds = array<i64: 1, 128>}, {pipeline_mode = #tpu.pipeline_mode<synchronous>, transform_indices = @transform_10, window_bounds = array<i64: 1, 128>}, {transform_indices = @transform_11, window_bounds = array<i64: 1, 8, 128>}]} {
    %c0_i32 = arith.constant 0 : i32
    %0 = arith.cmpi eq, %arg1, %c0_i32 : i32
    %1 = arith.extui %0 : i1 to i32
    %c0_i32_0 = arith.constant 0 : i32
    %2 = arith.cmpi ne, %1, %c0_i32_0 : i32
    scf.if %2 {
      %c0_42 = arith.constant 0 : index
      %c0_43 = arith.constant 0 : index
      %c0_44 = arith.constant 0 : index
      %83 = vector.load %arg3[%c0_42, %c0_43, %c0_44] : memref<1x16x128xbf16, #tpu.memory_space<vmem>>, vector<1x16x128xbf16>
      %84 = vector.shape_cast %83 : vector<1x16x128xbf16> to vector<16x128xbf16>
      %c0_45 = arith.constant 0 : index
      %c0_46 = arith.constant 0 : index
      %85 = vector.load %arg7[%c0_45, %c0_46] : memref<128x256xbf16, #tpu.memory_space<vmem>>, vector<128x256xbf16>
      %cst_47 = arith.constant dense<0.000000e+00> : vector<16x256xf32>
      %86 = tpu.matmul %84, %85, %cst_47 {dimension_numbers = #tpu.dot_dimension_numbers<[1], [0], [0], [1], [0, 0, 1, 1], [], []>} : vector<16x128xbf16>, vector<128x256xbf16>, vector<16x256xf32> -> vector<16x256xf32>
      %c0_48 = arith.constant 0 : index
      %c0_49 = arith.constant 0 : index
      %87 = vector.load %arg8[%c0_48, %c0_49] : memref<1x256xf32, #tpu.memory_space<vmem>>, vector<1x256xf32>
      %88 = vector.broadcast %87 : vector<1x256xf32> to vector<16x256xf32>
      %89 = arith.addf %86, %88 : vector<16x256xf32>
      %90 = vector.extract_strided_slice %89 {offsets = [0, 0], sizes = [16, 32], strides = [1, 1]} : vector<16x256xf32> to vector<16x32xf32>
      %91 = arith.truncf %90 : vector<16x32xf32> to vector<16x32xbf16>
      %c0_50 = arith.constant 0 : index
      %c0_51 = arith.constant 0 : index
      %c0_52 = arith.constant 0 : index
      %92 = vector.load %arg14[%c0_50, %c0_51, %c0_52] : memref<4x16x32xbf16, #tpu.memory_space<vmem>>, vector<1x16x32xbf16>
      %93 = vector.shape_cast %92 : vector<1x16x32xbf16> to vector<16x32xbf16>
      %94 = vector.shape_cast %91 : vector<16x32xbf16> to vector<1x16x32xbf16>
      tpu.vector_store %arg14[%c0_50, %c0_51, %c0_52], %94 {strides = array<i32>} : memref<4x16x32xbf16, #tpu.memory_space<vmem>>, vector<1x16x32xbf16>,
      %95 = vector.extract_strided_slice %89 {offsets = [0, 128], sizes = [16, 32], strides = [1, 1]} : vector<16x256xf32> to vector<16x32xf32>
      %96 = arith.truncf %95 : vector<16x32xf32> to vector<16x32xbf16>
      %c0_53 = arith.constant 0 : index
      %c0_54 = arith.constant 0 : index
      %c0_55 = arith.constant 0 : index
      %97 = vector.load %arg15[%c0_53, %c0_54, %c0_55] : memref<4x16x32xbf16, #tpu.memory_space<vmem>>, vector<1x16x32xbf16>
      %98 = vector.shape_cast %97 : vector<1x16x32xbf16> to vector<16x32xbf16>
      %99 = vector.shape_cast %96 : vector<16x32xbf16> to vector<1x16x32xbf16>
      tpu.vector_store %arg15[%c0_53, %c0_54, %c0_55], %99 {strides = array<i32>} : memref<4x16x32xbf16, #tpu.memory_space<vmem>>, vector<1x16x32xbf16>,
      %100 = vector.extract_strided_slice %89 {offsets = [0, 32], sizes = [16, 32], strides = [1, 1]} : vector<16x256xf32> to vector<16x32xf32>
      %101 = arith.truncf %100 : vector<16x32xf32> to vector<16x32xbf16>
      %c1 = arith.constant 1 : index
      %c0_56 = arith.constant 0 : index
      %c0_57 = arith.constant 0 : index
      %102 = vector.load %arg14[%c1, %c0_56, %c0_57] : memref<4x16x32xbf16, #tpu.memory_space<vmem>>, vector<1x16x32xbf16>
      %103 = vector.shape_cast %102 : vector<1x16x32xbf16> to vector<16x32xbf16>
      %104 = vector.shape_cast %101 : vector<16x32xbf16> to vector<1x16x32xbf16>
      tpu.vector_store %arg14[%c1, %c0_56, %c0_57], %104 {strides = array<i32>} : memref<4x16x32xbf16, #tpu.memory_space<vmem>>, vector<1x16x32xbf16>,
      %105 = vector.extract_strided_slice %89 {offsets = [0, 160], sizes = [16, 32], strides = [1, 1]} : vector<16x256xf32> to vector<16x32xf32>
      %106 = arith.truncf %105 : vector<16x32xf32> to vector<16x32xbf16>
      %c1_58 = arith.constant 1 : index
      %c0_59 = arith.constant 0 : index
      %c0_60 = arith.constant 0 : index
      %107 = vector.load %arg15[%c1_58, %c0_59, %c0_60] : memref<4x16x32xbf16, #tpu.memory_space<vmem>>, vector<1x16x32xbf16>
      %108 = vector.shape_cast %107 : vector<1x16x32xbf16> to vector<16x32xbf16>
      %109 = vector.shape_cast %106 : vector<16x32xbf16> to vector<1x16x32xbf16>
      tpu.vector_store %arg15[%c1_58, %c0_59, %c0_60], %109 {strides = array<i32>} : memref<4x16x32xbf16, #tpu.memory_space<vmem>>, vector<1x16x32xbf16>,
      %110 = vector.extract_strided_slice %89 {offsets = [0, 64], sizes = [16, 32], strides = [1, 1]} : vector<16x256xf32> to vector<16x32xf32>
      %111 = arith.truncf %110 : vector<16x32xf32> to vector<16x32xbf16>
      %c2 = arith.constant 2 : index
      %c0_61 = arith.constant 0 : index
      %c0_62 = arith.constant 0 : index
      %112 = vector.load %arg14[%c2, %c0_61, %c0_62] : memref<4x16x32xbf16, #tpu.memory_space<vmem>>, vector<1x16x32xbf16>
      %113 = vector.shape_cast %112 : vector<1x16x32xbf16> to vector<16x32xbf16>
      %114 = vector.shape_cast %111 : vector<16x32xbf16> to vector<1x16x32xbf16>
      tpu.vector_store %arg14[%c2, %c0_61, %c0_62], %114 {strides = array<i32>} : memref<4x16x32xbf16, #tpu.memory_space<vmem>>, vector<1x16x32xbf16>,
      %115 = vector.extract_strided_slice %89 {offsets = [0, 192], sizes = [16, 32], strides = [1, 1]} : vector<16x256xf32> to vector<16x32xf32>
      %116 = arith.truncf %115 : vector<16x32xf32> to vector<16x32xbf16>
      %c2_63 = arith.constant 2 : index
      %c0_64 = arith.constant 0 : index
      %c0_65 = arith.constant 0 : index
      %117 = vector.load %arg15[%c2_63, %c0_64, %c0_65] : memref<4x16x32xbf16, #tpu.memory_space<vmem>>, vector<1x16x32xbf16>
      %118 = vector.shape_cast %117 : vector<1x16x32xbf16> to vector<16x32xbf16>
      %119 = vector.shape_cast %116 : vector<16x32xbf16> to vector<1x16x32xbf16>
      tpu.vector_store %arg15[%c2_63, %c0_64, %c0_65], %119 {strides = array<i32>} : memref<4x16x32xbf16, #tpu.memory_space<vmem>>, vector<1x16x32xbf16>,
      %120 = vector.extract_strided_slice %89 {offsets = [0, 96], sizes = [16, 32], strides = [1, 1]} : vector<16x256xf32> to vector<16x32xf32>
      %121 = arith.truncf %120 : vector<16x32xf32> to vector<16x32xbf16>
      %c3 = arith.constant 3 : index
      %c0_66 = arith.constant 0 : index
      %c0_67 = arith.constant 0 : index
      %122 = vector.load %arg14[%c3, %c0_66, %c0_67] : memref<4x16x32xbf16, #tpu.memory_space<vmem>>, vector<1x16x32xbf16>
      %123 = vector.shape_cast %122 : vector<1x16x32xbf16> to vector<16x32xbf16>
      %124 = vector.shape_cast %121 : vector<16x32xbf16> to vector<1x16x32xbf16>
      tpu.vector_store %arg14[%c3, %c0_66, %c0_67], %124 {strides = array<i32>} : memref<4x16x32xbf16, #tpu.memory_space<vmem>>, vector<1x16x32xbf16>,
      %125 = vector.extract_strided_slice %89 {offsets = [0, 224], sizes = [16, 32], strides = [1, 1]} : vector<16x256xf32> to vector<16x32xf32>
      %126 = arith.truncf %125 : vector<16x32xf32> to vector<16x32xbf16>
      %c3_68 = arith.constant 3 : index
      %c0_69 = arith.constant 0 : index
      %c0_70 = arith.constant 0 : index
      %127 = vector.load %arg15[%c3_68, %c0_69, %c0_70] : memref<4x16x32xbf16, #tpu.memory_space<vmem>>, vector<1x16x32xbf16>
      %128 = vector.shape_cast %127 : vector<1x16x32xbf16> to vector<16x32xbf16>
      %129 = vector.shape_cast %126 : vector<16x32xbf16> to vector<1x16x32xbf16>
      tpu.vector_store %arg15[%c3_68, %c0_69, %c0_70], %129 {strides = array<i32>} : memref<4x16x32xbf16, #tpu.memory_space<vmem>>, vector<1x16x32xbf16>,
    } else {
    }
    %c0 = arith.constant 0 : index
    %c0_1 = arith.constant 0 : index
    %c0_2 = arith.constant 0 : index
    %3 = vector.load %arg2[%c0, %c0_1, %c0_2] : memref<1x8x128xbf16, #tpu.memory_space<vmem>>, vector<1x8x128xbf16>
    %4 = vector.shape_cast %3 : vector<1x8x128xbf16> to vector<8x128xbf16>
    %c0_3 = arith.constant 0 : index
    %c0_4 = arith.constant 0 : index
    %5 = vector.load %arg5[%c0_3, %c0_4] : memref<128x128xbf16, #tpu.memory_space<vmem>>, vector<128x128xbf16>
    %cst = arith.constant dense<0.000000e+00> : vector<8x128xf32>
    %6 = tpu.matmul %4, %5, %cst {dimension_numbers = #tpu.dot_dimension_numbers<[1], [0], [0], [1], [0, 0, 1, 1], [], []>} : vector<8x128xbf16>, vector<128x128xbf16>, vector<8x128xf32> -> vector<8x128xf32>
    %c0_5 = arith.constant 0 : index
    %c0_6 = arith.constant 0 : index
    %7 = vector.load %arg6[%c0_5, %c0_6] : memref<1x128xf32, #tpu.memory_space<vmem>>, vector<1x128xf32>
    %8 = vector.broadcast %7 : vector<1x128xf32> to vector<8x128xf32>
    %9 = arith.addf %6, %8 : vector<8x128xf32>
    %cst_7 = arith.constant 0.176776692 : f32
    %10 = vector.broadcast %cst_7 : f32 to vector<8x128xf32>
    %11 = arith.mulf %9, %10 : vector<8x128xf32>
    %12 = vector.extract_strided_slice %11 {offsets = [0, 0], sizes = [8, 32], strides = [1, 1]} : vector<8x128xf32> to vector<8x32xf32>
    %13 = vector.extract_strided_slice %11 {offsets = [0, 32], sizes = [8, 32], strides = [1, 1]} : vector<8x128xf32> to vector<8x32xf32>
    %14 = vector.extract_strided_slice %11 {offsets = [0, 64], sizes = [8, 32], strides = [1, 1]} : vector<8x128xf32> to vector<8x32xf32>
    %15 = vector.extract_strided_slice %11 {offsets = [0, 96], sizes = [8, 32], strides = [1, 1]} : vector<8x128xf32> to vector<8x32xf32>
    %16 = vector.shape_cast %12 : vector<8x32xf32> to vector<1x8x32xf32>
    %17 = vector.shape_cast %13 : vector<8x32xf32> to vector<1x8x32xf32>
    %18 = vector.shape_cast %14 : vector<8x32xf32> to vector<1x8x32xf32>
    %19 = vector.shape_cast %15 : vector<8x32xf32> to vector<1x8x32xf32>
    %20 = tpu.concatenate %16, %17, %18, %19 in 0 : vector<1x8x32xf32>, vector<1x8x32xf32>, vector<1x8x32xf32>, vector<1x8x32xf32> -> vector<4x8x32xf32>
    %21 = arith.truncf %20 : vector<4x8x32xf32> to vector<4x8x32xbf16>
    %c0_8 = arith.constant 0 : index
    %c0_9 = arith.constant 0 : index
    %c0_10 = arith.constant 0 : index
    %22 = vector.load %arg4[%c0_8, %c0_9, %c0_10] : memref<1x1x16xf32, #tpu.memory_space<vmem>>, vector<1x1x16xf32>
    %23 = vector.shape_cast %22 : vector<1x1x16xf32> to vector<1x16xf32>
    %cst_11 = arith.constant 0.000000e+00 : f32
    %24 = vector.broadcast %cst_11 : f32 to vector<1x16xf32>
    %25 = arith.cmpf ogt, %23, %24 : vector<1x16xf32>
    %c0_12 = arith.constant 0 : index
    %c0_13 = arith.constant 0 : index
    %c0_14 = arith.constant 0 : index
    %26 = vector.load %arg14[%c0_12, %c0_13, %c0_14] : memref<4x16x32xbf16, #tpu.memory_space<vmem>>, vector<4x16x32xbf16>
    "tpu.trace_start"() <{level = 10 : i32, message = "hqd,hkd->hqk"}> : () -> ()
    %cst_15 = arith.constant dense<0.000000e+00> : vector<4x8x16xf32>
    %27 = tpu.matmul %21, %26, %cst_15 {dimension_numbers = #tpu.dot_dimension_numbers<[2], [2], [1], [1], [0, 0, 0, 1, 1, 1], [0], [0]>} : vector<4x8x32xbf16>, vector<4x16x32xbf16>, vector<4x8x16xf32> -> vector<4x8x16xf32>
    "tpu.trace_stop"() : () -> ()
    %28 = vector.shape_cast %25 : vector<1x16xi1> to vector<1x1x16xi1>
    %cst_16 = arith.constant -1.000000e+09 : f32
    %29 = vector.shape_cast %28 : vector<1x1x16xi1> to vector<1x1x16xi1>
    %30 = vector.broadcast %29 : vector<1x1x16xi1> to vector<4x8x16xi1>
    %31 = vector.broadcast %cst_16 : f32 to vector<4x8x16xf32>
    %32 = arith.select %30, %27, %31 : vector<4x8x16xi1>, vector<4x8x16xf32>
    %cst_17 = arith.constant dense<0xFF800000> : vector<4x8xf32>
    %33 = vector.multi_reduction <maximumf>, %32, %cst_17 [2] : vector<4x8x16xf32> to vector<4x8xf32>
    %34 = vector.shape_cast %33 : vector<4x8xf32> to vector<4x8x1xf32>
    %35 = vector.broadcast %34 : vector<4x8x1xf32> to vector<4x8x16xf32>
    %36 = arith.subf %32, %35 : vector<4x8x16xf32>
    %37 = math.exp %36 : vector<4x8x16xf32>
    %cst_18 = arith.constant dense<0.000000e+00> : vector<4x8xf32>
    %38 = vector.multi_reduction <add>, %37, %cst_18 [2] : vector<4x8x16xf32> to vector<4x8xf32>
    %39 = vector.shape_cast %38 : vector<4x8xf32> to vector<4x8x1xf32>
    %40 = tpu.reciprocal %39 {approx = true} : vector<4x8x1xf32> -> vector<4x8x1xf32>
    %41 = vector.broadcast %40 : vector<4x8x1xf32> to vector<4x8x16xf32>
    %42 = arith.mulf %37, %41 : vector<4x8x16xf32>
    %43 = arith.truncf %42 : vector<4x8x16xf32> to vector<4x8x16xbf16>
    %c0_19 = arith.constant 0 : index
    %c0_20 = arith.constant 0 : index
    %c0_21 = arith.constant 0 : index
    %44 = vector.load %arg15[%c0_19, %c0_20, %c0_21] : memref<4x16x32xbf16, #tpu.memory_space<vmem>>, vector<4x16x32xbf16>
    "tpu.trace_start"() <{level = 10 : i32, message = "hqk,hkd->hqd"}> : () -> ()
    %cst_22 = arith.constant dense<0.000000e+00> : vector<4x8x32xf32>
    %45 = tpu.matmul %43, %44, %cst_22 {dimension_numbers = #tpu.dot_dimension_numbers<[2], [1], [1], [2], [0, 0, 0, 1, 1, 2], [0], [0]>} : vector<4x8x16xbf16>, vector<4x16x32xbf16>, vector<4x8x32xf32> -> vector<4x8x32xf32>
    "tpu.trace_stop"() : () -> ()
    %46 = arith.truncf %45 : vector<4x8x32xf32> to vector<4x8x32xbf16>
    %c0_23 = arith.constant 0 : index
    %c0_24 = arith.constant 0 : index
    %c0_25 = arith.constant 0 : index
    %47 = vector.load %arg9[%c0_23, %c0_24, %c0_25] : memref<4x32x128xbf16, #tpu.memory_space<vmem>>, vector<4x32x128xbf16>
    "tpu.trace_start"() <{level = 10 : i32, message = "hqd,hdn->hqn"}> : () -> ()
    %cst_26 = arith.constant dense<0.000000e+00> : vector<4x8x128xf32>
    %48 = tpu.matmul %46, %47, %cst_26 {dimension_numbers = #tpu.dot_dimension_numbers<[2], [1], [1], [2], [0, 0, 0, 1, 1, 2], [0], [0]>} : vector<4x8x32xbf16>, vector<4x32x128xbf16>, vector<4x8x128xf32> -> vector<4x8x128xf32>
    "tpu.trace_stop"() : () -> ()
    %cst_27 = arith.constant dense<0.000000e+00> : vector<8x128xf32>
    %49 = vector.multi_reduction <add>, %48, %cst_27 [0] : vector<4x8x128xf32> to vector<8x128xf32>
    %c0_28 = arith.constant 0 : index
    %c0_29 = arith.constant 0 : index
    %50 = vector.load %arg10[%c0_28, %c0_29] : memref<1x128xf32, #tpu.memory_space<vmem>>, vector<1x128xf32>
    %51 = vector.broadcast %50 : vector<1x128xf32> to vector<8x128xf32>
    %52 = arith.addf %49, %51 : vector<8x128xf32>
    %53 = arith.extf %4 : vector<8x128xbf16> to vector<8x128xf32>
    %54 = arith.addf %52, %53 : vector<8x128xf32>
    %c0_30 = arith.constant 0 : index
    %c0_31 = arith.constant 0 : index
    %55 = vector.load %arg11[%c0_30, %c0_31] : memref<1x128xf32, #tpu.memory_space<vmem>>, vector<1x128xf32>
    %c0_32 = arith.constant 0 : index
    %c0_33 = arith.constant 0 : index
    %56 = vector.load %arg12[%c0_32, %c0_33] : memref<1x128xf32, #tpu.memory_space<vmem>>, vector<1x128xf32>
    %cst_34 = arith.constant dense<0.000000e+00> : vector<8xf32>
    %57 = vector.multi_reduction <add>, %54, %cst_34 [1] : vector<8x128xf32> to vector<8xf32>
    %58 = vector.shape_cast %57 : vector<8xf32> to vector<8x1xf32>
    %cst_35 = arith.constant 1.280000e+02 : f32
    %59 = vector.broadcast %cst_35 : f32 to vector<8x1xf32>
    %60 = arith.divf %58, %59 : vector<8x1xf32>
    %61 = vector.broadcast %60 : vector<8x1xf32> to vector<8x128xf32>
    %62 = arith.subf %54, %61 : vector<8x128xf32>
    %63 = arith.mulf %62, %62 : vector<8x128xf32>
    %cst_36 = arith.constant dense<0.000000e+00> : vector<8xf32>
    %64 = vector.multi_reduction <add>, %63, %cst_36 [1] : vector<8x128xf32> to vector<8xf32>
    %65 = vector.shape_cast %64 : vector<8xf32> to vector<8x1xf32>
    %cst_37 = arith.constant 1.280000e+02 : f32
    %66 = vector.broadcast %cst_37 : f32 to vector<8x1xf32>
    %67 = arith.divf %65, %66 : vector<8x1xf32>
    %68 = vector.broadcast %60 : vector<8x1xf32> to vector<8x128xf32>
    %69 = arith.subf %54, %68 : vector<8x128xf32>
    %cst_38 = arith.constant 9.99999974E-6 : f32
    %70 = vector.broadcast %cst_38 : f32 to vector<8x1xf32>
    %71 = arith.addf %67, %70 : vector<8x1xf32>
    %72 = math.rsqrt %71 : vector<8x1xf32>
    %73 = vector.broadcast %72 : vector<8x1xf32> to vector<8x128xf32>
    %74 = arith.mulf %69, %73 : vector<8x128xf32>
    %75 = vector.broadcast %55 : vector<1x128xf32> to vector<8x128xf32>
    %76 = arith.mulf %74, %75 : vector<8x128xf32>
    %77 = vector.broadcast %56 : vector<1x128xf32> to vector<8x128xf32>
    %78 = arith.addf %76, %77 : vector<8x128xf32>
    %79 = arith.truncf %78 : vector<8x128xf32> to vector<8x128xbf16>
    %c0_39 = arith.constant 0 : index
    %c0_40 = arith.constant 0 : index
    %c0_41 = arith.constant 0 : index
    %80 = vector.load %arg13[%c0_39, %c0_40, %c0_41] : memref<1x8x128xbf16, #tpu.memory_space<vmem>>, vector<1x8x128xbf16>
    %81 = vector.shape_cast %80 : vector<1x8x128xbf16> to vector<8x128xbf16>
    %82 = vector.shape_cast %79 : vector<8x128xbf16> to vector<1x8x128xbf16>
    tpu.vector_store %arg13[%c0_39, %c0_40, %c0_41], %82 {strides = array<i32>} : memref<1x8x128xbf16, #tpu.memory_space<vmem>>, vector<1x8x128xbf16>,
    return
  }
  func.func @transform_0(%arg0: i32, %arg1: i32) -> (i32, i32, i32) {
    %c0_i32 = arith.constant 0 : i32
    %c0_i32_0 = arith.constant 0 : i32
    return %arg0, %arg1, %c0_i32 : i32, i32, i32
  }
  func.func @transform_1(%arg0: i32, %arg1: i32) -> (i32, i32, i32) {
    %c0_i32 = arith.constant 0 : i32
    %c0_i32_0 = arith.constant 0 : i32
    %c0_i32_1 = arith.constant 0 : i32
    return %arg0, %c0_i32, %c0_i32_0 : i32, i32, i32
  }
  func.func @transform_2(%arg0: i32, %arg1: i32) -> (i32, i32, i32) {
    %c0_i32 = arith.constant 0 : i32
    %c0_i32_0 = arith.constant 0 : i32
    %c0_i32_1 = arith.constant 0 : i32
    return %arg0, %c0_i32, %c0_i32_0 : i32, i32, i32
  }
  func.func @transform_3(%arg0: i32, %arg1: i32) -> (i32, i32) {
    %c0_i32 = arith.constant 0 : i32
    %c0_i32_0 = arith.constant 0 : i32
    %c0_i32_1 = arith.constant 0 : i32
    return %c0_i32, %c0_i32_0 : i32, i32
  }
  func.func @transform_4(%arg0: i32, %arg1: i32) -> (i32, i32) {
    %c0_i32 = arith.constant 0 : i32
    %c0_i32_0 = arith.constant 0 : i32
    %c0_i32_1 = arith.constant 0 : i32
    return %c0_i32, %c0_i32_0 : i32, i32
  }
  func.func @transform_5(%arg0: i32, %arg1: i32) -> (i32, i32) {
    %c0_i32 = arith.constant 0 : i32
    %c0_i32_0 = arith.constant 0 : i32
    %c0_i32_1 = arith.constant 0 : i32
    return %c0_i32, %c0_i32_0 : i32, i32
  }
  func.func @transform_6(%arg0: i32, %arg1: i32) -> (i32, i32) {
    %c0_i32 = arith.constant 0 : i32
    %c0_i32_0 = arith.constant 0 : i32
    %c0_i32_1 = arith.constant 0 : i32
    return %c0_i32, %c0_i32_0 : i32, i32
  }
  func.func @transform_7(%arg0: i32, %arg1: i32) -> (i32, i32, i32) {
    %c0_i32 = arith.constant 0 : i32
    %c0_i32_0 = arith.constant 0 : i32
    %c0_i32_1 = arith.constant 0 : i32
    %c0_i32_2 = arith.constant 0 : i32
    return %c0_i32, %c0_i32_0, %c0_i32_1 : i32, i32, i32
  }
  func.func @transform_8(%arg0: i32, %arg1: i32) -> (i32, i32) {
    %c0_i32 = arith.constant 0 : i32
    %c0_i32_0 = arith.constant 0 : i32
    %c0_i32_1 = arith.constant 0 : i32
    return %c0_i32, %c0_i32_0 : i32, i32
  }
  func.func @transform_9(%arg0: i32, %arg1: i32) -> (i32, i32) {
    %c0_i32 = arith.constant 0 : i32
    %c0_i32_0 = arith.constant 0 : i32
    %c0_i32_1 = arith.constant 0 : i32
    return %c0_i32, %c0_i32_0 : i32, i32
  }
  func.func @transform_10(%arg0: i32, %arg1: i32) -> (i32, i32) {
    %c0_i32 = arith.constant 0 : i32
    %c0_i32_0 = arith.constant 0 : i32
    %c0_i32_1 = arith.constant 0 : i32
    return %c0_i32, %c0_i32_0 : i32, i32
  }
  func.func @transform_11(%arg0: i32, %arg1: i32) -> (i32, i32, i32) {
    %c0_i32 = arith.constant 0 : i32
    %c0_i32_0 = arith.constant 0 : i32
    return %arg0, %arg1, %c0_i32 : i32, i32, i32
  }
}

module attributes {stable_mosaic.version = 11 : i64} {
  func.func @_ffn_ln_kernel(%arg0: i32, %arg1: memref<32x128xbf16, #tpu.memory_space<vmem>>, %arg2: memref<128x256xbf16, #tpu.memory_space<vmem>>, %arg3: memref<1x256xf32, #tpu.memory_space<vmem>>, %arg4: memref<256x128xbf16, #tpu.memory_space<vmem>>, %arg5: memref<1x128xf32, #tpu.memory_space<vmem>>, %arg6: memref<1x128xf32, #tpu.memory_space<vmem>>, %arg7: memref<1x128xf32, #tpu.memory_space<vmem>>, %arg8: memref<32x128xbf16, #tpu.memory_space<vmem>>) attributes {dimension_semantics = [#tpu.dimension_semantics<parallel>], iteration_bounds = array<i64: 1>, scalar_prefetch = 0 : i64, scratch_operands = 0 : i64, tpu.core_type = #tpu.core_type<tc>, window_params = [{transform_indices = @transform_0, window_bounds = array<i64: 32, 128>}, {pipeline_mode = #tpu.pipeline_mode<synchronous>, transform_indices = @transform_1, window_bounds = array<i64: 128, 256>}, {pipeline_mode = #tpu.pipeline_mode<synchronous>, transform_indices = @transform_2, window_bounds = array<i64: 1, 256>}, {pipeline_mode = #tpu.pipeline_mode<synchronous>, transform_indices = @transform_3, window_bounds = array<i64: 256, 128>}, {pipeline_mode = #tpu.pipeline_mode<synchronous>, transform_indices = @transform_4, window_bounds = array<i64: 1, 128>}, {pipeline_mode = #tpu.pipeline_mode<synchronous>, transform_indices = @transform_5, window_bounds = array<i64: 1, 128>}, {pipeline_mode = #tpu.pipeline_mode<synchronous>, transform_indices = @transform_6, window_bounds = array<i64: 1, 128>}, {transform_indices = @transform_7, window_bounds = array<i64: 32, 128>}]} {
    %c0 = arith.constant 0 : index
    %c0_0 = arith.constant 0 : index
    %0 = vector.load %arg1[%c0, %c0_0] : memref<32x128xbf16, #tpu.memory_space<vmem>>, vector<32x128xbf16>
    %c0_1 = arith.constant 0 : index
    %c0_2 = arith.constant 0 : index
    %1 = vector.load %arg2[%c0_1, %c0_2] : memref<128x256xbf16, #tpu.memory_space<vmem>>, vector<128x256xbf16>
    %cst = arith.constant dense<0.000000e+00> : vector<32x256xf32>
    %2 = tpu.matmul %0, %1, %cst {dimension_numbers = #tpu.dot_dimension_numbers<[1], [0], [0], [1], [0, 0, 1, 1], [], []>} : vector<32x128xbf16>, vector<128x256xbf16>, vector<32x256xf32> -> vector<32x256xf32>
    %c0_3 = arith.constant 0 : index
    %c0_4 = arith.constant 0 : index
    %3 = vector.load %arg3[%c0_3, %c0_4] : memref<1x256xf32, #tpu.memory_space<vmem>>, vector<1x256xf32>
    %4 = vector.broadcast %3 : vector<1x256xf32> to vector<32x256xf32>
    %5 = arith.addf %2, %4 : vector<32x256xf32>
    %cst_5 = arith.constant 0.000000e+00 : f32
    %6 = vector.broadcast %cst_5 : f32 to vector<32x256xf32>
    %7 = arith.maximumf %5, %6 : vector<32x256xf32>
    %8 = arith.truncf %7 : vector<32x256xf32> to vector<32x256xbf16>
    %c0_6 = arith.constant 0 : index
    %c0_7 = arith.constant 0 : index
    %9 = vector.load %arg4[%c0_6, %c0_7] : memref<256x128xbf16, #tpu.memory_space<vmem>>, vector<256x128xbf16>
    %cst_8 = arith.constant dense<0.000000e+00> : vector<32x128xf32>
    %10 = tpu.matmul %8, %9, %cst_8 {dimension_numbers = #tpu.dot_dimension_numbers<[1], [0], [0], [1], [0, 0, 1, 1], [], []>} : vector<32x256xbf16>, vector<256x128xbf16>, vector<32x128xf32> -> vector<32x128xf32>
    %c0_9 = arith.constant 0 : index
    %c0_10 = arith.constant 0 : index
    %11 = vector.load %arg5[%c0_9, %c0_10] : memref<1x128xf32, #tpu.memory_space<vmem>>, vector<1x128xf32>
    %12 = vector.broadcast %11 : vector<1x128xf32> to vector<32x128xf32>
    %13 = arith.addf %10, %12 : vector<32x128xf32>
    %14 = arith.extf %0 : vector<32x128xbf16> to vector<32x128xf32>
    %15 = arith.addf %13, %14 : vector<32x128xf32>
    %c0_11 = arith.constant 0 : index
    %c0_12 = arith.constant 0 : index
    %16 = vector.load %arg6[%c0_11, %c0_12] : memref<1x128xf32, #tpu.memory_space<vmem>>, vector<1x128xf32>
    %c0_13 = arith.constant 0 : index
    %c0_14 = arith.constant 0 : index
    %17 = vector.load %arg7[%c0_13, %c0_14] : memref<1x128xf32, #tpu.memory_space<vmem>>, vector<1x128xf32>
    %cst_15 = arith.constant dense<0.000000e+00> : vector<32xf32>
    %18 = vector.multi_reduction <add>, %15, %cst_15 [1] : vector<32x128xf32> to vector<32xf32>
    %19 = vector.shape_cast %18 : vector<32xf32> to vector<32x1xf32>
    %cst_16 = arith.constant 1.280000e+02 : f32
    %20 = vector.broadcast %cst_16 : f32 to vector<32x1xf32>
    %21 = arith.divf %19, %20 : vector<32x1xf32>
    %22 = vector.broadcast %21 : vector<32x1xf32> to vector<32x128xf32>
    %23 = arith.subf %15, %22 : vector<32x128xf32>
    %24 = arith.mulf %23, %23 : vector<32x128xf32>
    %cst_17 = arith.constant dense<0.000000e+00> : vector<32xf32>
    %25 = vector.multi_reduction <add>, %24, %cst_17 [1] : vector<32x128xf32> to vector<32xf32>
    %26 = vector.shape_cast %25 : vector<32xf32> to vector<32x1xf32>
    %cst_18 = arith.constant 1.280000e+02 : f32
    %27 = vector.broadcast %cst_18 : f32 to vector<32x1xf32>
    %28 = arith.divf %26, %27 : vector<32x1xf32>
    %29 = vector.broadcast %21 : vector<32x1xf32> to vector<32x128xf32>
    %30 = arith.subf %15, %29 : vector<32x128xf32>
    %cst_19 = arith.constant 9.99999974E-6 : f32
    %31 = vector.broadcast %cst_19 : f32 to vector<32x1xf32>
    %32 = arith.addf %28, %31 : vector<32x1xf32>
    %33 = math.rsqrt %32 : vector<32x1xf32>
    %34 = vector.broadcast %33 : vector<32x1xf32> to vector<32x128xf32>
    %35 = arith.mulf %30, %34 : vector<32x128xf32>
    %36 = vector.broadcast %16 : vector<1x128xf32> to vector<32x128xf32>
    %37 = arith.mulf %35, %36 : vector<32x128xf32>
    %38 = vector.broadcast %17 : vector<1x128xf32> to vector<32x128xf32>
    %39 = arith.addf %37, %38 : vector<32x128xf32>
    %40 = arith.truncf %39 : vector<32x128xf32> to vector<32x128xbf16>
    %c0_20 = arith.constant 0 : index
    %c0_21 = arith.constant 0 : index
    %41 = vector.load %arg8[%c0_20, %c0_21] : memref<32x128xbf16, #tpu.memory_space<vmem>>, vector<32x128xbf16>
    tpu.vector_store %arg8[%c0_20, %c0_21], %40 {strides = array<i32>} : memref<32x128xbf16, #tpu.memory_space<vmem>>, vector<32x128xbf16>,
    return
  }
  func.func @transform_0(%arg0: i32) -> (i32, i32) {
    %c0_i32 = arith.constant 0 : i32
    %c0_i32_0 = arith.constant 0 : i32
    return %arg0, %c0_i32 : i32, i32
  }
  func.func @transform_1(%arg0: i32) -> (i32, i32) {
    %c0_i32 = arith.constant 0 : i32
    %c0_i32_0 = arith.constant 0 : i32
    %c0_i32_1 = arith.constant 0 : i32
    return %c0_i32, %c0_i32_0 : i32, i32
  }
  func.func @transform_2(%arg0: i32) -> (i32, i32) {
    %c0_i32 = arith.constant 0 : i32
    %c0_i32_0 = arith.constant 0 : i32
    %c0_i32_1 = arith.constant 0 : i32
    return %c0_i32, %c0_i32_0 : i32, i32
  }
  func.func @transform_3(%arg0: i32) -> (i32, i32) {
    %c0_i32 = arith.constant 0 : i32
    %c0_i32_0 = arith.constant 0 : i32
    %c0_i32_1 = arith.constant 0 : i32
    return %c0_i32, %c0_i32_0 : i32, i32
  }
  func.func @transform_4(%arg0: i32) -> (i32, i32) {
    %c0_i32 = arith.constant 0 : i32
    %c0_i32_0 = arith.constant 0 : i32
    %c0_i32_1 = arith.constant 0 : i32
    return %c0_i32, %c0_i32_0 : i32, i32
  }
  func.func @transform_5(%arg0: i32) -> (i32, i32) {
    %c0_i32 = arith.constant 0 : i32
    %c0_i32_0 = arith.constant 0 : i32
    %c0_i32_1 = arith.constant 0 : i32
    return %c0_i32, %c0_i32_0 : i32, i32
  }
  func.func @transform_6(%arg0: i32) -> (i32, i32) {
    %c0_i32 = arith.constant 0 : i32
    %c0_i32_0 = arith.constant 0 : i32
    %c0_i32_1 = arith.constant 0 : i32
    return %c0_i32, %c0_i32_0 : i32, i32
  }
  func.func @transform_7(%arg0: i32) -> (i32, i32) {
    %c0_i32 = arith.constant 0 : i32
    %c0_i32_0 = arith.constant 0 : i32
    return %arg0, %c0_i32 : i32, i32
  }
}

</mosaic_0001>

<bundles_post_ra>
// kernel: tpu_custom_call.1
= control target key start
LH: loop header
LB: loop body
LE: loop exit
PB: predicated region body
PF: predicated region fallthrough
CT: control target
= control target key end

     0   :  { %6 = vsyncpa [#allocation3], 0  ;;  %s125_s0 = inlined_call_operand.hbm [shape: f32[8,128], index: 0, kind: input, shape index: {}]   ;;  %s126_s1 = inlined_call_operand.hbm [shape: f32[8,128], index: 1, kind: output, shape index: {}]  }
   0x1   :  { %7 = vsyncpa [#allocation4], 0  ;;  %s89_s6 = smov [#allocation2]   ;;  %s41_s10 = scalar_lea.hbm %s125_s0, 128 }
   0x2   :  { %s14_s7 = sshll.u32 %s89_s6, 4  ;;  %p42_p0 = scmp.ne.s32.totalorder %s125_s0, %s41_s10  ;;  %s15_s7 = int_to_ptr.vmem [resolvable:$true] %s14_s7 }
   0x3   :  { %p45_p1 = scmp.lt.u32.totalorder %s41_s10, %s125_s0 }
   0x5   :  { %p47_p2 = pnand %p45_p1, %p42_p0 }
   0x7   :  { %50 = shalt.err (!%p47_p2)
}
   0x8   :  { %s51_s15 = scalar_lea.vmem %s15_s7, 128  ;;  %p56_p4 = scmp.lt.s32.totalorder %s15_s7, %s15_s7 }
   0x9   :  { %p52_p3 = scmp.ne.s32.totalorder %s15_s7, %s51_s15  ;;  %p57_p5 = scmp.lt.s32.totalorder %s51_s15, %s51_s15 }
   0xb   :  { %p58_p6 = por %p57_p5, %p56_p4 }
   0xd   :  { %p59_p7 = pnand %p58_p6, %p52_p3 }
   0xf   :  { %62 = shalt.err (!%p59_p7)
}
  0x10   :  { %17 = dma.hbm_to_vmem [thread:$0]  %s125_s0, 128, %s15_s7, [#allocation3]  }
  0x11   :  { %85 = dma.done.wait [#allocation3], 128  }
  0x12   :  { %86 = vsyncadd [#allocation3], 4294967168  ;;  %s90_s18 = smov [#allocation5]   ;;  %v21_v0 = vld [vmem:[#allocation2] sm:$0xff] }
  0x13   :  { %s30_s19 = sshll.u32 %s90_s18, 4  ;;  %v22_v1 = vadd.f32 1.0, %v21_v0  ;;  %s31_s19 = int_to_ptr.vmem [resolvable:$true] %s30_s19 }
  0x14   :  { %s63_s20 = scalar_lea.vmem %s31_s19, 128  ;;  %p68_p9 = scmp.lt.s32.totalorder %s31_s19, %s31_s19 }
  0x15   :  { %23 = vst [vmem:[#allocation5] sm:$0xff] %v22_v1  ;;  %p64_p8 = scmp.ne.s32.totalorder %s31_s19, %s63_s20  ;;  %p69_p10 = scmp.lt.s32.totalorder %s63_s20, %s63_s20 }
  0x17   :  { %p70_p11 = por %p69_p10, %p68_p9 }
  0x19   :  { %p71_p12 = pnand %p70_p11, %p64_p8 }
  0x1b   :  { %74 = shalt.err (!%p71_p12)
}
  0x1c   :  { %s75_s23 = scalar_lea.hbm %s126_s1, 128 }
  0x1d   :  { %p76_p13 = scmp.ne.s32.totalorder %s126_s1, %s75_s23  ;;  %p79_p0 = scmp.lt.u32.totalorder %s75_s23, %s126_s1 }
  0x1f   :  { %p81_p1 = pnand %p79_p0, %p76_p13 }
  0x21   :  { %84 = shalt.err (!%p81_p1)
}
  0x22   :  { %33 = dma.vmem_to_hbm [thread:$0]  %s31_s19, 128, %s126_s1, [#allocation4]  }
  0x23   :  { %87 = dma.done.wait [#allocation4], 128  }
  0x24   :  { %88 = vsyncadd [#allocation4], 4294967168 }
  0x25   :  { %37 = vsyncpa [#allocation3], 1 }
  0x26   :  { %38 = vsyncpa [#allocation4], 1 }

// kernel: decoder_forward.7
= control target key start
LH: loop header
LB: loop body
LE: loop exit
PB: predicated region body
PF: predicated region fallthrough
CT: control target
= control target key end

     0   :  { %s381_s15 = smov 0   ;;  %s414_s0 = inlined_call_operand.vmem [shape: f32[2,16,128], index: 0, kind: input, shape index: {}]   ;;  %s415_s1 = inlined_call_operand.vmem [shape: f32[16,128], index: 1, kind: input, shape index: {}]   ;;  %s416_s2 = inlined_call_operand.vmem [shape: f32[1,128], index: 2, kind: input, shape index: {}]   ;;  %s417_s3 = inlined_call_operand.vmem [shape: f32[1,128], index: 3, kind: input, shape index: {}]   ;;  %s418_s4 = inlined_call_operand.vmem [shape: bf16[2,16,128], index: 4, kind: output, shape index: {}]  }
   0x1 LB: > { %s312_s16 = sadd.s32 4294967295, %s354_s15   ;;  %p316_p0 = scmp.ge.s32.totalorder %s354_s15, 1  ;;  %s354_s15 = sphi %s381_s15, %s14_s15  }
   0x2   : > { %p162_p1 = scmp.lt.s32.totalorder %s354_s15, 3 }
   0x4   : > { %p163_p2 = pnand %p316_p0, %p162_p1 }
   0x5   : > { %p188_p3 = scmp.lt.s32.totalorder (!%p163_p2), %s312_s16, 1  ;;  %v202_v1 = vld [vmem:[%s415_s1] sm:$0xff] (!%p163_p2)  ;;  %v203_v5 = vld [vmem:[%s415_s1 + $0x8] sm:$0xff] (!%p163_p2) }
   0x6   : > { %166 = sbr.rel (%p163_p2) target bundleno = 339 (0x153), region = 36  ;;  %v321_v24 = vld [vmem:[%s416_s2] ss:$0 sm:$0xff] (!%p163_p2) }
   0x7   : > { %v322_v28 = vld [vmem:[%s417_s3] ss:$0 sm:$0xff] (!%p163_p2) }
   0xd   : > { %s420_s16 = smov (!%p188_p3, %s312_s16), 1 }
   0xe   : > { %s327_s17 = sshll.u32 %s420_s16, 4  ;;  %s328_s29 = sshll.u32 %s420_s16, 3 }
   0xf   : > { %s192_s20 = scalar_lea.vmem %s414_s0, %s327_s17  ;;  %s197_s6 = scalar_lea.vmem %s418_s4, %s328_s29 }
  0x10   : > { %v198_v0 = vld [vmem:[%s192_s20] sm:$0xff]  ;;  %v199_v2 = vld [vmem:[%s192_s20 + $0x8] sm:$0xff] }
  0x11   : > { %v200_v3 = vmul.f32 11.313708, %v198_v0  ;;  %v201_v4 = vmul.f32 11.313708, %v199_v2 }
  0x13   : > { %v204_v6 = vadd.f32 %v202_v1, %v200_v3  ;;  %v205_v7 = vadd.f32 %v203_v5, %v201_v4 }
  0x15   : > { %208 = vadd.xlane.f32.xlu0 %v204_v6 }
  0x19   : > { %210 = vadd.xlane.f32.xlu0 %v205_v7 }
  0xa2   : > { %v209_v8 = vpop.xlane.xlu0 %208 }
  0xa3   : > { %v213_v9 = vmul.f32 0.0078125, %v209_v8 }
  0xa5   : > { %v215_v10 = vsub.f32 %v204_v6, %v213_v9 }
  0xa6   : > { %v211_v11 = vpop.xlane.xlu0 %210 }
  0xa7   : > { %v214_v12 = vmul.f32 0.0078125, %v211_v11  ;;  %v217_v13 = vmul.f32 %v215_v10, %v215_v10 }
  0xa9   : > { %v216_v14 = vsub.f32 %v205_v7, %v214_v12  ;;  %219 = vadd.xlane.f32.xlu1 %v217_v13 }
  0xab   : > { %v218_v15 = vmul.f32 %v216_v14, %v216_v14 }
  0xad   : > { %221 = vadd.xlane.f32.xlu1 %v218_v15 }
 0x136   : > { %v220_v16 = vpop.xlane.xlu1 %219 }
 0x137   : > { %v223_v17 = vmul.f32 0.0078125, %v220_v16 }
 0x139   : > { %v225_v18 = vadd.f32 1e-05, %v223_v17 }
 0x13a   : > { %v222_v19 = vpop.xlane.xlu1 %221 }
 0x13b   : > { %344 = vrsqrt.f32 %v225_v18  ;;  %v224_v20 = vmul.f32 0.0078125, %v222_v19 }
 0x13d   : > { %v226_v21 = vadd.f32 1e-05, %v224_v20 }
 0x13f   : > { %346 = vrsqrt.f32 %v226_v21 }
 0x145   : > { %v345_v22 = vpop.eup %344 }
 0x146   : > { %v229_v23 = vmul.f32 %v345_v22, %v215_v10 }
 0x148   : > { %v237_v26 = vmul.f32 %v321_v24, %v229_v23 }
 0x149   : > { %v347_v25 = vpop.eup %346 }
 0x14a   : > { %v230_v27 = vmul.f32 %v347_v25, %v216_v14  ;;  %v245_v30 = vadd.f32 %v322_v28, %v237_v26 }
 0x14c   : > { %v238_v29 = vmul.f32 %v321_v24, %v230_v27 }
 0x14e   : > { %v246_v31 = vadd.f32 %v322_v28, %v238_v29 }
 0x150   : > { %v334_v32 = vpack.c.bf16 %v246_v31, %v245_v30 }
 0x152   : > { %335 = vst [vmem:[%s197_s6] sm:$0xff] %v334_v32  }
 0x153 PF: > { %s14_s15 = sadd.s32 1, %s354_s15  }
 0x154   : > { %p11_p4 = scmp.ge.s32.totalorder %s14_s15, 4  }
 0x156   :  { %13 = sbr.rel (!%p11_p4) target bundleno = 1 (0x1), region = 66 }

// kernel: decoder_forward.8
= control target key start
LH: loop header
LB: loop body
LE: loop exit
PB: predicated region body
PF: predicated region fallthrough
CT: control target
= control target key end

     0   :  { %s2028_s17 = smov 0   ;;  %s2030_s18 = smov 0   ;;  %s2319_s0 = inlined_call_operand.vmem [shape: bf16[2,16,128], index: 0, kind: input, shape index: {}, may-alias: {0,1}]   ;;  %s2320_s1 = inlined_call_operand.vmem [shape: bf16[2,16,128], index: 1, kind: input, shape index: {}, may-alias: {0,1}]   ;;  %s2321_s2 = inlined_call_operand.vmem [shape: f32[2,1,16], index: 2, kind: input, shape index: {}]   ;;  %s2322_s3 = inlined_call_operand.vmem [shape: bf16[128,128], index: 3, kind: input, shape index: {}]   ;;  %s2323_s4 = inlined_call_operand.vmem [shape: f32[1,128], index: 4, kind: input, shape index: {}]   ;;  %s2324_s5 = inlined_call_operand.vmem [shape: bf16[128,256], index: 5, kind: input, shape index: {}]   ;;  %s2325_s6 = inlined_call_operand.vmem [shape: f32[1,256], index: 6, kind: input, shape index: {}]   ;;  %s2326_s7 = inlined_call_operand.vmem [shape: bf16[4,32,128], index: 7, kind: input, shape index: {}]   ;;  %s2327_s8 = inlined_call_operand.vmem [shape: f32[1,128], index: 8, kind: input, shape index: {}]   ;;  %s2328_s9 = inlined_call_operand.vmem [shape: f32[1,128], index: 9, kind: input, shape index: {}]   ;;  %s2329_s10 = inlined_call_operand.vmem [shape: f32[1,128], index: 10, kind: input, shape index: {}]   ;;  %s2330_s11 = inlined_call_operand.vmem [shape: bf16[2,16,128], index: 11, kind: output, shape index: {}]  }
   0x1   :  { %s2032_s19 = smov 0   ;;  %s2034_s20 = smov 0  }
   0x2   :  { %s2036_s21 = smov 0  }
   0x3 LB: > { %2334 = sst [smem:[#allocation4_spill]] %s1948_s19  ;;  %s30_s22 = sadd.s32 1, %s1948_s19  ;;  %s1956_s21 = sphi %s2036_s21, %s21_s21   ;;  %s1952_s20 = sphi %s2034_s20, %s2345_s20   ;;  %s1948_s19 = sphi %s2032_s19, %s2344_s19   ;;  %s1944_s18 = sphi %s2030_s18, %s2343_s18   ;;  %s1940_s17 = sphi %s2028_s17, %s2342_s17  }
   0x4   : > { %2335 = sst [smem:[#allocation5_spill]] %s1952_s20  ;;  %s33_s23 = sadd.s32 1, %s1952_s20 }
   0x5   : > { %2336 = sst [smem:[#allocation6_spill]] %s1956_s21  ;;  %p31_p0 = scmp.ge.s32.totalorder %s30_s22, 2 }
   0x6   : > { %p1611_p1 = scmp.ge.s32.totalorder %s1956_s21, 1  ;;  %p374_p2 = scmp.lt.s32.totalorder %s1956_s21, 5 }
   0x7   : > { %s2347_s22 = smov (%p31_p0, %s30_s22), 0  ;;  %s2349_s23 = smov (!%p31_p0, %s33_s23), %s1952_s20 }
   0x8   : > { %2337 = sst [smem:[#allocation7_spill]] %s2347_s22  ;;  %p375_p3 = pnand %p1611_p1, %p374_p2 }
   0x9   : > { %p35_p4 = scmp.ge.s32.totalorder %s2349_s23, 2  ;;  %p428_p5 = scmp.lt.s32.totalorder (!%p375_p3), %s1944_s18, 1 }
   0xa   : > { %378 = sbr.rel (%p375_p3) target bundleno = 2051 (0x803), region = 64  ;;  %p430_p6 = scmp.lt.s32.totalorder (!%p375_p3), %s1940_s17, 1 }
   0xb   : > { %s2351_s23 = smov (%p35_p4, %s2349_s23), 0  ;;  %p1618_p7 = scmp.ne.s32.totalorder (!%p375_p3), %s1940_s17, 0 }
   0xc   : > { %2338 = sst [smem:[#allocation8_spill]] %s2351_s23 }
  0x11   : > { %s2353_s18 = smov (!%p428_p5, %s1944_s18), 1  ;;  %456 = sbr.rel (%p1618_p7) target bundleno = 394 (0x18a), region = 68 }
  0x12   : > { %s431_s24 = scalar_select %p430_p6, %s1940_s17, 1 }
  0x13   : > { %s1612_s25 = sshll.u32 %s2353_s18, 1  ;;  %s1671_s26 = sshll.u32 %s2353_s18, 3  ;;  %v1859_v0 = vld [vmem:[%s2324_s5 + $0x4] ss:$8 sps:$4 sm:$0xff] (!%p1618_p7)   ;;  %v1861_v1 = vld [vmem:[%s2324_s5] ss:$8 sps:$4 sm:$0xff] (!%p1618_p7)   ;;  %v477_v18 = vlaneseq (!%p1618_p7) }
  0x14   : > { %s433_s27 = sadd.s32 %s1612_s25, %s431_s24  ;;  %s2069_s30 = scalar_lea.vmem %s2320_s1, %s1671_s26  ;;  %v1958_v2 = vmov (!%p1618_p7), 0   ;;  %573 = vmatprep.subr.bf16.mxu0 (!%p1618_p7), %v1859_v0  ;;  %v1862_v3 = vld [vmem:[%s2324_s5 + $0x14] ss:$8 sps:$4 sm:$0xff] (!%p1618_p7)   ;;  %v1864_v4 = vld [vmem:[%s2324_s5 + $0x10] ss:$8 sps:$4 sm:$0xff] (!%p1618_p7)   ;;  %vm617_vm0 = vcmask (!%p1618_p7), 261120  }
  0x15   : > { %s1613_s12 = sshll.u32 %s433_s27, 2  ;;  %s443_s15 = scalar_lea.vmem %s2321_s2, %s2353_s18  ;;  %605 = vmatprep.mubr.bf16.mxu0 (!%p1618_p7), %v1958_v2  ;;  %574 = vmatpush1.bf16.msra.mxu0 (!%p1618_p7), %v1861_v1  ;;  %v1865_v5 = vld [vmem:[%s2324_s5 + $0x24] ss:$8 sps:$4 sm:$0xff] (!%p1618_p7)   ;;  %v1867_v6 = vld [vmem:[%s2324_s5 + $0x20] ss:$8 sps:$4 sm:$0xff] (!%p1618_p7)   ;;  %v478_v19 = vshrl.u32 (!%p1618_p7), %v477_v18, 7 }
  0x16   : > { %s2078_s22 = scalar_lea.vmem %s2319_s0, %s1613_s12  ;;  %s2083_s21 = scalar_lea.vmem %s2330_s11, %s1613_s12  ;;  %575 = vmatprep.subr.bf16.mxu0 (!%p1618_p7), %v1862_v3  ;;  %v1868_v7 = vld [vmem:[%s2324_s5 + $0x34] ss:$8 sps:$4 sm:$0xff] (!%p1618_p7)   ;;  %v1870_v8 = vld [vmem:[%s2324_s5 + $0x30] ss:$8 sps:$4 sm:$0xff] (!%p1618_p7)   ;;  %v1871_v9 = vld [vmem:[%s2324_s5 + $0x44] ss:$8 sps:$4 sm:$0xff] (!%p1618_p7)  }
  0x17   : > { %v1873_v10 = vld [vmem:[%s2324_s5 + $0x40] ss:$8 sps:$4 sm:$0xff] (!%p1618_p7)   ;;  %v1874_v11 = vld [vmem:[%s2324_s5 + $0x54] ss:$8 sps:$4 sm:$0xff] (!%p1618_p7)   ;;  %v1876_v12 = vld [vmem:[%s2324_s5 + $0x50] ss:$8 sps:$4 sm:$0xff] (!%p1618_p7)  }
  0x18   : > { %v1877_v13 = vld [vmem:[%s2324_s5 + $0x64] ss:$8 sps:$4 sm:$0xff]   ;;  %v1879_v14 = vld [vmem:[%s2324_s5 + $0x60] ss:$8 sps:$4 sm:$0xff]   ;;  %v1880_v15 = vld [vmem:[%s2324_s5 + $0x74] ss:$8 sps:$4 sm:$0xff]  }
  0x19   : > { %576 = vmatpush1.bf16.msra.mxu0 %v1864_v4  ;;  %v1882_v16 = vld [vmem:[%s2324_s5 + $0x70] ss:$8 sps:$4 sm:$0xff]   ;;  %v1883_v17 = vld [vmem:[%s2069_s30] sm:$0xff]   ;;  %v479_v20 = vsub.s32 0, %v478_v19  ;;  %v483_v22 = vsub.s32 1, %v478_v19  ;;  %s1959_s30 = smov 64  }
  0x1a   : > { %577 = vmatprep.subr.bf16.mxu0 %v1865_v5  ;;  %v475_v21 = vld [vmem:[%s2325_s6] sm:$0x3]  ;;  %s1960_s29 = smov 96   ;;  %s1961_s12 = smov 32  }
  0x1b   : > { %v480_v23 = vrot.slane %v475_v21, %v479_v20  ;;  %v484_v25 = vrot.slane %v475_v21, %v483_v22 }
  0x1d   : > { %578 = vmatpush1.bf16.msra.mxu0 %v1867_v6 }
  0x1e   : > { %579 = vmatprep.subr.bf16.mxu0 %v1868_v7 }
  0x21   : > { %580 = vmatpush1.bf16.msra.mxu0 %v1870_v8 }
  0x22   : > { %581 = vmatprep.subr.bf16.mxu0 %v1871_v9 }
  0x25   : > { %582 = vmatpush1.bf16.msra.mxu0 %v1873_v10 }
  0x26   : > { %583 = vmatprep.subr.bf16.mxu0 %v1874_v11 }
  0x29   : > { %584 = vmatpush1.bf16.msra.mxu0 %v1876_v12 }
  0x2a   : > { %585 = vmatprep.subr.bf16.mxu0 %v1877_v13 }
  0x2d   : > { %586 = vmatpush1.bf16.msra.mxu0 %v1879_v14 }
  0x2e   : > { %587 = vmatprep.subr.bf16.mxu0 %v1880_v15 }
  0x31   : > { %588 = vmatpush1.bf16.msra.mxu0 %v1882_v16 }
  0x34   : > { %606 = vmatmul.mubr.bf16.vlgmr.msra.gmra.mrb[0].mxu0 %v1883_v17 }
 0x107   : > { %v607_v24 = vpop.f32.mrb[0].mxu0 }
 0x108   : > { %v609_v26 = vpop.f32.mrb[1].mxu0  ;;  %v608_v28 = vadd.f32 %v607_v24, %v480_v23 }
 0x109   : > { %v611_v27 = vpop.f32.mrb[2].mxu0  ;;  %v610_v31 = vadd.f32 %v609_v26, %v484_v25 }
 0x10a   : > { %v612_v29 = vadd.f32 %v611_v27, %v480_v23  ;;  %v613_v30 = vpop.f32.mrb[3].mxu0 }
 0x10b   : > { %v614_v32 = vadd.f32 %v613_v30, %v484_v25 }
 0x10c   : > { %v616_v33 = vpack.c.bf16 %v612_v29, %v608_v28 }
 0x10d   : > { %v619_v34 = vpack.c.bf16 %v614_v32, %v610_v31 }
 0x10e   : > { %618 = vst.msk [vmem:[#allocation2] sm:$0xff] %vm617_vm0, %v616_v33  ;;  %633 = vrot.lane.b32.xlu1 %v616_v33, %s1959_s30  ;;  %622 = vrot.lane.b32.xlu0 %v616_v33, %s1960_s29 }
 0x10f   : > { %620 = vst.msk [vmem:[#allocation3] sm:$0xff] %vm617_vm0, %v619_v34 }
 0x112   : > { %638 = vrot.lane.b32.xlu1 %v619_v34, %s1959_s30  ;;  %628 = vrot.lane.b32.xlu0 %v619_v34, %s1960_s29 }
 0x116   : > { %648 = vrot.lane.b32.xlu1 %v619_v34, %s1961_s12  ;;  %643 = vrot.lane.b32.xlu0 %v616_v33, %s1961_s12 }
 0x180   : > { %v634_v35 = vpop.permute.xlu1 %633  ;;  %v623_v36 = vpop.permute.xlu0 %622 }
 0x181   : > { %637 = vst.msk [vmem:[#allocation2 + $0x10] sm:$0xff] %vm617_vm0, %v634_v35  ;;  %626 = vst.msk [vmem:[#allocation2 + $0x8] sm:$0xff] %vm617_vm0, %v623_v36 }
 0x184   : > { %v639_v37 = vpop.permute.xlu1 %638  ;;  %v629_v38 = vpop.permute.xlu0 %628 }
 0x185   : > { %642 = vst.msk [vmem:[#allocation3 + $0x10] sm:$0xff] %vm617_vm0, %v639_v37  ;;  %632 = vst.msk [vmem:[#allocation3 + $0x8] sm:$0xff] %vm617_vm0, %v629_v38 }
 0x188   : > { %v649_v39 = vpop.permute.xlu1 %648  ;;  %v644_v40 = vpop.permute.xlu0 %643 }
 0x189   : > { %652 = vst.msk [vmem:[#allocation3 + $0x18] sm:$0xff] %vm617_vm0, %v649_v39  ;;  %647 = vst.msk [vmem:[#allocation2 + $0x18] sm:$0xff] %vm617_vm0, %v644_v40 }
 0x18a PF: > { %v1884_v41 = vld [vmem:[%s2322_s3] sm:$0xff]   ;;  %v1962_v42 = vmov 0.0   ;;  %v1885_v43 = vld [vmem:[%s2322_s3 + $0x8] sm:$0xff]   ;;  %vm1963_vm1 = vmmov 0   ;;  %v1886_v44 = vld [vmem:[%s2322_s3 + $0x10] sm:$0xff]   ;;  %vm801_vm2 = vcmask 261120   ;;  %v781_v9 = vlaneseq }
 0x18b   : > { %1709 = vmatprep.subr.bf16.mxu0 %v1962_v42  ;;  %1729 = vmatprep.subr.bf16.mxu1 %v1962_v42  ;;  %v1887_v45 = vld [vmem:[%s2322_s3 + $0x18] sm:$0xff]   ;;  %v1888_v46 = vld [vmem:[%s2322_s3 + $0x20] sm:$0xff]   ;;  %v1889_v47 = vld [vmem:[%s2322_s3 + $0x28] sm:$0xff]   ;;  %s1965_s25 = smov 96   ;;  %s1966_s26 = smov 64   ;;  %v1967_v14 = vmov 0  }
 0x18c   : > { %1710 = vmatpush3.bf16.msra.mxu0 %v1884_v41  ;;  %1725 = vmatprep.mubr.msk.bf16.mxu0 %vm1963_vm1, %v1962_v42  ;;  %v1890_v48 = vld [vmem:[%s2322_s3 + $0x30] sm:$0xff]   ;;  %v1891_v49 = vld [vmem:[%s2322_s3 + $0x38] sm:$0xff]   ;;  %v2184_v50 = vld [vmem:[%s2078_s22] sm:$0xf]  ;;  %s1964_s22 = smov 32   ;;  %v782_v11 = vshrl.u32 %v781_v9, 7 }
 0x18d   : > { %1711 = vmatprep.subr.bf16.mxu0 %v1962_v42  ;;  %1731 = vmatprep.mubr.msk.bf16.mxu1 %vm1963_vm1, %v1962_v42  ;;  %v797_v51 = vld [vmem:[#allocation2] sm:$0xff]  ;;  %v798_v58 = vld [vmem:[#allocation2 + $0x8] sm:$0xff]  ;;  %v799_v63 = vld [vmem:[#allocation2 + $0x10] sm:$0xff]  ;;  %s1645_s28 = sshll.u32 %s1940_s17, 3  ;;  %v786_v17 = vand.u32 127, %v781_v9  ;;  %vm992_vm7 = vcmask 130048  }
 0x18e   : > { %v806_v52 = vsel %vm801_vm2, %v797_v51, 0  ;;  %v1636_v53 = vld [vmem:[%s2323_s4] ss:$0 sm:$0xff]  ;;  %v852_v62 = vsel %vm801_vm2, %v798_v58, 0  ;;  %v898_v2 = vsel %vm801_vm2, %v799_v63, 0  ;;  %v793_v12 = vsub.s32 0, %v782_v11 }
 0x18f   : > { %1730 = vmatpush3.bf16.xpose.msra.mxu1 %v806_v52  ;;  %v788_v10 = vld [vmem:[%s443_s15] sm:$0x1]  ;;  %v783_v13 = vstv %s1645_s28 }
 0x190   : > { %1712 = vmatpush3.bf16.msra.mxu0 %v1885_v43  ;;  %1735 = vmatprep.subr.bf16.mxu1 %v1962_v42  ;;  %v800_v4 = vld [vmem:[#allocation2 + $0x18] sm:$0xff]  ;;  %vm789_vm3 = vcmp.gt.f32.partialorder %v788_v10, 0.0  ;;  %v784_v16 = vadd.s32 %v783_v13, %v782_v11  ;;  %v1041_v51 = vld [vmem:[#allocation3] sm:$0xff] }
 0x191   : > { %1713 = vmatprep.subr.bf16.mxu0 %v1962_v42  ;;  %v944_v6 = vsel %vm801_vm2, %v800_v4, 0  ;;  %v790_v15 = vsel %vm789_vm3, 1, %v1967_v14  ;;  %v1044_v14 = vld [vmem:[#allocation3 + $0x18] sm:$0xff] }
 0x192   : > { %v794_v18 = vrot.slane %v790_v15, %v793_v12  ;;  %vm787_vm4 = vcmp.le.s32.totalorder %v786_v17, %v784_v16 }
 0x194   : > { %1714 = vmatpush3.bf16.msra.mxu0 %v1886_v44  ;;  %vm795_vm5 = vcmp.eq.s32.totalorder %v794_v18, 1  ;;  %v1892_v18 = vld [vmem:[%s2326_s7] sm:$0xff]  }
 0x195   : > { %1715 = vmatprep.subr.bf16.mxu0 %v1962_v42  ;;  %vm2219_vm6 = vmand %vm787_vm4, %vm795_vm5 }
 0x198   : > { %1716 = vmatpush3.bf16.msra.mxu0 %v1887_v45 }
 0x199   : > { %1717 = vmatprep.subr.bf16.mxu0 %v1962_v42 }
 0x19c   : > { %1718 = vmatpush3.bf16.msra.mxu0 %v1888_v46 }
 0x19d   : > { %1719 = vmatprep.subr.bf16.mxu0 %v1962_v42 }
 0x1a0   : > { %1720 = vmatpush3.bf16.msra.mxu0 %v1889_v47 }
 0x1a1   : > { %1721 = vmatprep.subr.bf16.mxu0 %v1962_v42 }
 0x1a4   : > { %1722 = vmatpush3.bf16.msra.mxu0 %v1890_v48 }
 0x1a5   : > { %1723 = vmatprep.subr.bf16.mxu0 %v1962_v42 }
 0x1a8   : > { %1724 = vmatpush3.bf16.msra.mxu0 %v1891_v49 }
 0x1a9   : > { %1753 = vmatprep.subr.bf16.mxu0 %v1962_v42 }
 0x1ab   : > { %1726 = vmatmul.mubr.bf16.vlgmr.msra.gmra.mrb[0].mxu0 %v2184_v50 }
 0x1ac   : > { %1755 = vmatprep.mubr.msk.bf16.mxu0 %vm1963_vm1, %v1962_v42  ;;  %1754 = vmatpush3.bf16.msra.mxu0 %v1041_v51 }
 0x1ad   : > { %1765 = vmatprep.subr.bf16.mxu0 %v1962_v42 }
 0x27e   : > { %v759_v54 = vpop.f32.mrb[0].mxu0 }
 0x27f   : > { %v760_v55 = vadd.f32 %v1636_v53, %v759_v54  ;;  %v1727_v56 = vpop.f32.mrb[1].mxu0 }
 0x280   : > { %v762_v57 = vpop.f32.mrb[2].mxu0 }
 0x281   : > { %v765_v59 = vmul.f32 0.17677669, %v760_v55  ;;  %v1728_v60 = vpop.f32.mrb[3].mxu0 }
 0x283   : > { %773 = vrot.lane.b32.xlu1 %v765_v59, %s1964_s22  ;;  %767 = vrot.lane.b32.xlu0 %v765_v59, %s1965_s25  ;;  %v776_v61 = vpack.c.bf16 %v765_v59, %v765_v59 }
 0x285   : > { %1732 = vmatmul.mubr.msk.bf16.vlgmr.msra.gmra.mrb[0].mxu1 %vm801_vm2, %v776_v61 }
 0x286   : > { %1736 = vmatpush3.bf16.xpose.msra.mxu1 %v852_v62  ;;  %1737 = vmatprep.mubr.msk.bf16.mxu1 %vm1963_vm1, %v1962_v42 }
 0x287   : > { %770 = vrot.lane.b32.xlu0 %v765_v59, %s1966_s26  ;;  %1741 = vmatprep.subr.bf16.mxu1 %v1962_v42 }
 0x2f5   : > { %v768_v0 = vpop.permute.xlu0 %767  ;;  %v774_v7 = vpop.permute.xlu1 %773 }
 0x2f6   : > { %v777_v1 = vpack.c.bf16 %v768_v0, %v768_v0  ;;  %v779_v8 = vpack.c.bf16 %v774_v7, %v774_v7 }
 0x2f8   : > { %1738 = vmatmul.mubr.msk.bf16.vlgmr.msra.gmra.mrb[4].mxu1 %vm801_vm2, %v777_v1 }
 0x2f9   : > { %1742 = vmatpush3.bf16.xpose.msra.mxu1 %v898_v2  ;;  %1743 = vmatprep.mubr.msk.bf16.mxu1 %vm1963_vm1, %v1962_v42  ;;  %v771_v3 = vpop.permute.xlu0 %770 }
 0x2fa   : > { %1747 = vmatprep.subr.bf16.mxu1 %v1962_v42  ;;  %v778_v5 = vpack.c.bf16 %v771_v3, %v771_v3  ;;  %v1042_v3 = vld [vmem:[#allocation3 + $0x8] sm:$0xff] }
 0x300   : > { %1744 = vmatmul.mubr.msk.bf16.vlgmr.msra.gmra.mrb[8].mxu1 %vm801_vm2, %v778_v5 }
 0x301   : > { %1748 = vmatpush3.bf16.xpose.msra.mxu1 %v944_v6  ;;  %1749 = vmatprep.mubr.msk.bf16.mxu1 %vm1963_vm1, %v1962_v42 }
 0x302   : > { %1759 = vmatprep.subr.bf16.mxu1 %v1962_v42 }
 0x308   : > { %1750 = vmatmul.mubr.msk.bf16.vlgmr.msra.gmra.mrb[12].mxu1 %vm801_vm2, %v779_v8  ;;  %v1043_v8 = vld [vmem:[#allocation3 + $0x10] sm:$0xff] }
 0x309   : > { %1761 = vmatprep.mubr.msk.bf16.mxu1 %vm1963_vm1, %v1962_v42  ;;  %1760 = vmatpush3.bf16.msra.mxu1 %v1042_v3  ;;  %v1468_v3 = vunpack.c.l.bf16 %v2184_v50  ;;  %v1667_v50 = vld [vmem:[%s2328_s9] ss:$0 sm:$0xff] }
 0x30a   : > { %1771 = vmatprep.subr.bf16.mxu1 %v1962_v42 }
 0x358   : > { %v842_v20 = vpop.f32.mrb[0].mxu1 }
 0x359   : > { %v988_v21 = vsel %vm2219_vm6, %v842_v20, -1e+09  ;;  %v1733_v22 = vpop.f32.mrb[1].mxu1  ;;  %v1893_v20 = vld [vmem:[%s2326_s7 + $0x8] sm:$0xff]  }
 0x35a   : > { %v845_v23 = vpop.f32.mrb[2].mxu1  ;;  %v993_v24 = vsel %vm992_vm7, %v988_v21, -inf }
 0x35b   : > { %994 = vmax.xlane.f32.xlu1 %v993_v24  ;;  %v1734_v25 = vpop.f32.mrb[3].mxu1  ;;  %v1894_v23 = vld [vmem:[%s2326_s7 + $0x10] sm:$0xff]  }
 0x35c   : > { %v1895_v25 = vld [vmem:[%s2326_s7 + $0x18] sm:$0xff]  }
 0x3cb   : > { %v888_v26 = vpop.f32.mrb[4].mxu1 }
 0x3cc   : > { %v989_v27 = vsel %vm2219_vm6, %v888_v26, -1e+09  ;;  %v1739_v28 = vpop.f32.mrb[5].mxu1 }
 0x3cd   : > { %v891_v29 = vpop.f32.mrb[6].mxu1  ;;  %v996_v30 = vsel %vm992_vm7, %v989_v27, -inf }
 0x3ce   : > { %997 = vmax.xlane.f32.xlu0 %v996_v30  ;;  %v1740_v31 = vpop.f32.mrb[7].mxu1 }
 0x3d3   : > { %v934_v32 = vpop.f32.mrb[8].mxu1 }
 0x3d4   : > { %v990_v33 = vsel %vm2219_vm6, %v934_v32, -1e+09  ;;  %v1745_v34 = vpop.f32.mrb[9].mxu1  ;;  %v1897_v32 = vld [vmem:[%s2326_s7 + $0x28] sm:$0xff]  }
 0x3d5   : > { %v937_v35 = vpop.f32.mrb[10].mxu1  ;;  %v999_v36 = vsel %vm992_vm7, %v990_v33, -inf  ;;  %v1898_v34 = vld [vmem:[%s2326_s7 + $0x30] sm:$0xff]  }
 0x3d6   : > { %1000 = vmax.xlane.f32.xlu0 %v999_v36  ;;  %v1746_v37 = vpop.f32.mrb[11].mxu1 }
 0x3db   : > { %v980_v38 = vpop.f32.mrb[12].mxu1 }
 0x3dc   : > { %v991_v39 = vsel %vm2219_vm6, %v980_v38, -1e+09  ;;  %v1751_v40 = vpop.f32.mrb[13].mxu1 }
 0x3dd   : > { %v983_v41 = vpop.f32.mrb[14].mxu1  ;;  %v1002_v43 = vsel %vm992_vm7, %v991_v39, -inf }
 0x3de   : > { %1003 = vmax.xlane.f32.xlu1 %v1002_v43  ;;  %v1752_v44 = vpop.f32.mrb[15].mxu1 }
 0x3e8   : > { %v995_v45 = vpop.xlane.xlu1 %994 }
 0x3e9   : > { %v1005_v46 = vsub.f32 %v988_v21, %v995_v45 }
 0x3eb   : > { %v1009_v47 = vmul.f32 1.442695, %v1005_v46 }
 0x3ed   : > { %1900 = vpow2.f32 %v1009_v47 }
 0x3f7   : > { %v1901_v48 = vpop.eup %1900 }
 0x3f8   : > { %v1017_v49 = vsel %vm992_vm7, %v1901_v48, 0.0 }
 0x3f9   : > { %1018 = vadd.xlane.f32.xlu0 %v1017_v49 }
 0x45b   : > { %v998_v52 = vpop.xlane.xlu0 %997 }
 0x45c   : > { %v1006_v53 = vsub.f32 %v989_v27, %v998_v52  ;;  %v1896_v27 = vld [vmem:[%s2326_s7 + $0x20] sm:$0xff]  }
 0x45e   : > { %v1011_v54 = vmul.f32 1.442695, %v1006_v53 }
 0x460   : > { %1902 = vpow2.f32 %v1011_v54 }
 0x463   : > { %v1001_v55 = vpop.xlane.xlu0 %1000 }
 0x464   : > { %v1007_v56 = vsub.f32 %v990_v33, %v1001_v55 }
 0x466   : > { %v1013_v57 = vmul.f32 1.442695, %v1007_v56 }
 0x468   : > { %1904 = vpow2.f32 %v1013_v57 }
 0x46a   : > { %v1903_v58 = vpop.eup %1902 }
 0x46b   : > { %v1004_v59 = vpop.xlane.xlu1 %1003  ;;  %v1020_v60 = vsel %vm992_vm7, %v1903_v58, 0.0 }
 0x46c   : > { %v1008_v61 = vsub.f32 %v991_v39, %v1004_v59  ;;  %1021 = vadd.xlane.f32.xlu1 %v1020_v60  ;;  %v1899_v39 = vld [vmem:[%s2326_s7 + $0x38] sm:$0xff]  }
 0x46e   : > { %v1015_v62 = vmul.f32 1.442695, %v1008_v61 }
 0x470   : > { %1906 = vpow2.f32 %v1015_v62 }
 0x472   : > { %v1905_v63 = vpop.eup %1904 }
 0x473   : > { %v1023_v0 = vsel %vm992_vm7, %v1905_v63, 0.0 }
 0x474   : > { %1024 = vadd.xlane.f32.xlu0 %v1023_v0 }
 0x47a   : > { %v1907_v1 = vpop.eup %1906 }
 0x47b   : > { %v1026_v2 = vsel %vm992_vm7, %v1907_v1, 0.0 }
 0x47c   : > { %1027 = vadd.xlane.f32.xlu1 %v1026_v2  ;;  %v1666_v2 = vld [vmem:[%s2327_s8] ss:$0 sm:$0xff] }
 0x486   : > { %v1019_v4 = vpop.xlane.xlu0 %1018 }
 0x487   : > { %1908 = vrcp.f32 %v1019_v4 }
 0x491   : > { %v1909_v5 = vpop.eup %1908 }
 0x492   : > { %v1033_v6 = vmul.f32 %v1909_v5, %v1901_v48 }
 0x494   : > { %v1037_v7 = vpack.c.bf16 %v1033_v6, %v1033_v6 }
 0x496   : > { %1756 = vmatmul.mubr.msk.bf16.vlgmr.msra.gmra.mrb[4].mxu0 %vm992_vm7, %v1037_v7 }
 0x497   : > { %1766 = vmatpush3.bf16.msra.mxu0 %v1043_v8  ;;  %1767 = vmatprep.mubr.msk.bf16.mxu0 %vm1963_vm1, %v1962_v42 }
 0x498   : > { %1777 = vmatprep.subr.bf16.mxu0 %v1962_v42 }
 0x4f9   : > { %v1022_v9 = vpop.xlane.xlu1 %1021 }
 0x4fa   : > { %1910 = vrcp.f32 %v1022_v9 }
 0x501   : > { %v1025_v10 = vpop.xlane.xlu0 %1024 }
 0x502   : > { %1912 = vrcp.f32 %v1025_v10 }
 0x504   : > { %v1911_v11 = vpop.eup %1910 }
 0x505   : > { %v1034_v12 = vmul.f32 %v1911_v11, %v1903_v58 }
 0x507   : > { %v1038_v13 = vpack.c.bf16 %v1034_v12, %v1034_v12 }
 0x509   : > { %1762 = vmatmul.mubr.msk.bf16.vlgmr.msra.gmra.mrb[16].mxu1 %vm992_vm7, %v1038_v13  ;;  %v1028_v15 = vpop.xlane.xlu1 %1027 }
 0x50a   : > { %1914 = vrcp.f32 %v1028_v15  ;;  %1772 = vmatpush3.bf16.msra.mxu1 %v1044_v14  ;;  %1773 = vmatprep.mubr.msk.bf16.mxu1 %vm1963_vm1, %v1962_v42 }
 0x50b   : > { %1785 = vmatprep.subr.bf16.mxu1 %v1962_v42 }
 0x50c   : > { %v1913_v16 = vpop.eup %1912 }
 0x50d   : > { %v1035_v17 = vmul.f32 %v1913_v16, %v1905_v63 }
 0x50f   : > { %v1039_v19 = vpack.c.bf16 %v1035_v17, %v1035_v17 }
 0x511   : > { %1768 = vmatmul.mubr.msk.bf16.vlgmr.msra.gmra.mrb[8].mxu0 %vm992_vm7, %v1039_v19  ;;  %v1668_v19 = vld [vmem:[%s2329_s10] ss:$0 sm:$0xff] }
 0x512   : > { %1778 = vmatpush3.bf16.msra.mxu0 %v1892_v18  ;;  %1781 = vmatprep.mubr.msk.bf16.mxu0 %vm1963_vm1, %v1962_v42 }
 0x513   : > { %1779 = vmatprep.subr.bf16.mxu0 %v1962_v42 }
 0x514   : > { %v1915_v21 = vpop.eup %1914 }
 0x515   : > { %v1036_v22 = vmul.f32 %v1915_v21, %v1907_v1 }
 0x516   : > { %1780 = vmatpush3.bf16.msra.mxu0 %v1893_v20 }
 0x517   : > { %v1040_v24 = vpack.c.bf16 %v1036_v22, %v1036_v22  ;;  %1793 = vmatprep.subr.bf16.mxu0 %v1962_v42 }
 0x519   : > { %1774 = vmatmul.mubr.msk.bf16.vlgmr.msra.gmra.mrb[20].mxu1 %vm992_vm7, %v1040_v24 }
 0x51a   : > { %1786 = vmatpush3.bf16.msra.mxu1 %v1894_v23  ;;  %1789 = vmatprep.mubr.msk.bf16.mxu1 %vm1963_vm1, %v1962_v42 }
 0x51b   : > { %1787 = vmatprep.subr.bf16.mxu1 %v1962_v42 }
 0x51e   : > { %1788 = vmatpush3.bf16.msra.mxu1 %v1895_v25 }
 0x51f   : > { %1801 = vmatprep.subr.bf16.mxu1 %v1962_v42 }
 0x569   : > { %v1082_v26 = vpop.f32.mrb[4].mxu0 }
 0x56a   : > { %v1217_v28 = vpack.c.bf16 %v1082_v26, %v1082_v26  ;;  %v1757_v29 = vpop.f32.mrb[5].mxu0 }
 0x56b   : > { %v1085_v30 = vpop.f32.mrb[6].mxu0 }
 0x56c   : > { %v1758_v31 = vpop.f32.mrb[7].mxu0  ;;  %1782 = vmatmul.mubr.msk.bf16.vlgmr.msra.gmra.mrb[12].mxu0 %vm801_vm2, %v1217_v28 }
 0x56d   : > { %1794 = vmatpush3.bf16.msra.mxu0 %v1896_v27  ;;  %1797 = vmatprep.mubr.msk.bf16.mxu0 %vm1963_vm1, %v1962_v42 }
 0x56e   : > { %1795 = vmatprep.subr.bf16.mxu0 %v1962_v42 }
 0x571   : > { %1796 = vmatpush3.bf16.msra.mxu0 %v1897_v32 }
 0x5dc   : > { %v1125_v33 = vpop.f32.mrb[16].mxu1 }
 0x5dd   : > { %v1218_v35 = vpack.c.bf16 %v1125_v33, %v1125_v33  ;;  %v1763_v36 = vpop.f32.mrb[17].mxu1 }
 0x5de   : > { %v1128_v37 = vpop.f32.mrb[18].mxu1 }
 0x5df   : > { %v1764_v38 = vpop.f32.mrb[19].mxu1  ;;  %1790 = vmatmul.mubr.msk.bf16.vlgmr.msra.gmra.mrb[24].mxu1 %vm801_vm2, %v1218_v35 }
 0x5e0   : > { %1802 = vmatpush3.bf16.msra.mxu1 %v1898_v34  ;;  %1805 = vmatprep.mubr.msk.bf16.mxu1 %vm1963_vm1, %v1962_v42 }
 0x5e1   : > { %1803 = vmatprep.subr.bf16.mxu1 %v1962_v42 }
 0x5e4   : > { %v1168_v40 = vpop.f32.mrb[8].mxu0  ;;  %1804 = vmatpush3.bf16.msra.mxu1 %v1899_v39 }
 0x5e5   : > { %v1219_v41 = vpack.c.bf16 %v1168_v40, %v1168_v40  ;;  %v1769_v43 = vpop.f32.mrb[9].mxu0 }
 0x5e6   : > { %v1171_v44 = vpop.f32.mrb[10].mxu0 }
 0x5e7   : > { %v1770_v45 = vpop.f32.mrb[11].mxu0  ;;  %1798 = vmatmul.mubr.msk.bf16.vlgmr.msra.gmra.mrb[16].mxu0 %vm801_vm2, %v1219_v41 }
 0x5ec   : > { %v1211_v46 = vpop.f32.mrb[20].mxu1 }
 0x5ed   : > { %v1220_v47 = vpack.c.bf16 %v1211_v46, %v1211_v46  ;;  %v1775_v48 = vpop.f32.mrb[21].mxu1 }
 0x5ee   : > { %v1214_v49 = vpop.f32.mrb[22].mxu1 }
 0x5ef   : > { %v1776_v51 = vpop.f32.mrb[23].mxu1  ;;  %1806 = vmatmul.mubr.msk.bf16.vlgmr.msra.gmra.mrb[28].mxu1 %vm801_vm2, %v1220_v47 }
 0x63f   : > { %v1286_v52 = vpop.f32.mrb[12].mxu0 }
 0x640   : > { %v1783_v53 = vpop.f32.mrb[13].mxu0 }
 0x641   : > { %v1289_v54 = vpop.f32.mrb[14].mxu0 }
 0x642   : > { %v1784_v55 = vpop.f32.mrb[15].mxu0 }
 0x6b2   : > { %v1341_v42 = vpop.f32.mrb[24].mxu1 }
 0x6b3   : > { %v1457_v56 = vadd.f32 %v1341_v42, %v1286_v52  ;;  %v1791_v57 = vpop.f32.mrb[25].mxu1 }
 0x6b4   : > { %v1344_v58 = vpop.f32.mrb[26].mxu1 }
 0x6b5   : > { %v1792_v59 = vpop.f32.mrb[27].mxu1 }
 0x6ba   : > { %v1396_v60 = vpop.f32.mrb[16].mxu0 }
 0x6bb   : > { %v1458_v61 = vadd.f32 %v1457_v56, %v1396_v60  ;;  %v1799_v62 = vpop.f32.mrb[17].mxu0 }
 0x6bc   : > { %v1399_v63 = vpop.f32.mrb[18].mxu0 }
 0x6bd   : > { %v1800_v0 = vpop.f32.mrb[19].mxu0 }
 0x6c2   : > { %v1451_v1 = vpop.f32.mrb[28].mxu1 }
 0x6c3   : > { %v1459_v4 = vadd.f32 %v1458_v61, %v1451_v1  ;;  %v1807_v5 = vpop.f32.mrb[29].mxu1 }
 0x6c4   : > { %v1454_v6 = vpop.f32.mrb[30].mxu1 }
 0x6c5   : > { %v1467_v7 = vadd.f32 %v1666_v2, %v1459_v4  ;;  %v1808_v8 = vpop.f32.mrb[31].mxu1 }
 0x6c7   : > { %v1469_v9 = vadd.f32 %v1468_v3, %v1467_v7 }
 0x6c9   : > { %1472 = vadd.xlane.f32.xlu0 %v1469_v9 }
 0x756   : > { %v1473_v10 = vpop.xlane.xlu0 %1472 }
 0x757   : > { %v1475_v11 = vmul.f32 0.0078125, %v1473_v10 }
 0x759   : > { %v1476_v12 = vsub.f32 %v1469_v9, %v1475_v11 }
 0x75b   : > { %v1477_v13 = vmul.f32 %v1476_v12, %v1476_v12 }
 0x75d   : > { %1478 = vadd.xlane.f32.xlu1 %v1477_v13 }
 0x7ea   : > { %v1479_v14 = vpop.xlane.xlu1 %1478 }
 0x7eb   : > { %v1480_v15 = vmul.f32 0.0078125, %v1479_v14 }
 0x7ed   : > { %v1481_v16 = vadd.f32 1e-05, %v1480_v15 }
 0x7ef   : > { %1916 = vrsqrt.f32 %v1481_v16 }
 0x7f9   : > { %v1917_v17 = vpop.eup %1916 }
 0x7fa   : > { %v1483_v18 = vmul.f32 %v1917_v17, %v1476_v12 }
 0x7fc   : > { %v1490_v20 = vmul.f32 %v1667_v50, %v1483_v18 }
 0x7fe   : > { %v1497_v21 = vadd.f32 %v1668_v19, %v1490_v20 }
 0x800   : > { %v1498_v22 = vpack.c.bf16 %v1497_v21, %v1497_v21 }
 0x802   : > { %1499 = vst [vmem:[%s2083_s21] sm:$0xf] %v1498_v22 }
 0x803 PF: > { %s2341_s20 = sld [smem:[#allocation6_spill]]  ;;  %s2342_s17 = sld [smem:[#allocation4_spill]] }
 0x804   : > { %s2343_s18 = sld [smem:[#allocation5_spill]]  ;;  %s2344_s19 = sld [smem:[#allocation7_spill]] }
 0x809   : > { %s21_s21 = sadd.s32 1, %s2341_s20   ;;  %s2345_s20 = sld [smem:[#allocation8_spill]] }
 0x80a   : > { %p18_p8 = scmp.ge.s32.totalorder %s21_s21, 6  }
 0x80c   :  { %20 = sbr.rel (!%p18_p8) target bundleno = 3 (0x3), region = 110 }

// kernel: decoder_forward.10
= control target key start
LH: loop header
LB: loop body
LE: loop exit
PB: predicated region body
PF: predicated region fallthrough
CT: control target
= control target key end

     0   :  { %v636_v1 = vmov 0   ;;  %v49_v35 = vlaneseq  ;;  %s807_s1 = inlined_call_operand.vmem [shape: bf16[128,256], index: 1, kind: input, shape index: {}]   ;;  %s808_s3 = inlined_call_operand.vmem [shape: bf16[256,128], index: 3, kind: input, shape index: {}]   ;;  %s809_s0 = inlined_call_operand.vmem [shape: bf16[32,128], index: 0, kind: input, shape index: {}]   ;;  %s810_s2 = inlined_call_operand.vmem [shape: f32[1,256], index: 2, kind: input, shape index: {}]   ;;  %s811_s4 = inlined_call_operand.vmem [shape: f32[1,128], index: 4, kind: input, shape index: {}]   ;;  %s812_s5 = inlined_call_operand.vmem [shape: f32[1,128], index: 5, kind: input, shape index: {}]   ;;  %s813_s6 = inlined_call_operand.vmem [shape: f32[1,128], index: 6, kind: input, shape index: {}]   ;;  %s814_s7 = inlined_call_operand.vmem [shape: bf16[32,128], index: 7, kind: output, shape index: {}]  }
   0x1   :  { %v584_v0 = vld [vmem:[%s807_s1 + $0x4] ss:$8 sps:$4 sm:$0xff]   ;;  %183 = vmatprep.mubr.bf16.mxu0 %v636_v1  ;;  %v586_v2 = vld [vmem:[%s807_s1] ss:$8 sps:$4 sm:$0xff]   ;;  %v587_v3 = vld [vmem:[%s807_s1 + $0x14] ss:$8 sps:$4 sm:$0xff]  }
   0x2   :  { %151 = vmatprep.subr.bf16.mxu0 %v584_v0  ;;  %v589_v4 = vld [vmem:[%s807_s1 + $0x10] ss:$8 sps:$4 sm:$0xff]   ;;  %v590_v5 = vld [vmem:[%s807_s1 + $0x24] ss:$8 sps:$4 sm:$0xff]   ;;  %v592_v6 = vld [vmem:[%s807_s1 + $0x20] ss:$8 sps:$4 sm:$0xff]  }
   0x3   :  { %152 = vmatpush1.bf16.msra.mxu0 %v586_v2  ;;  %v593_v7 = vld [vmem:[%s807_s1 + $0x34] ss:$8 sps:$4 sm:$0xff]   ;;  %v595_v8 = vld [vmem:[%s807_s1 + $0x30] ss:$8 sps:$4 sm:$0xff]   ;;  %v596_v9 = vld [vmem:[%s807_s1 + $0x44] ss:$8 sps:$4 sm:$0xff]  }
   0x4   :  { %153 = vmatprep.subr.bf16.mxu0 %v587_v3  ;;  %v610_v10 = vld [vmem:[%s808_s3 + $0x40] sm:$0xff]   ;;  %v599_v13 = vld [vmem:[%s807_s1 + $0x54] ss:$8 sps:$4 sm:$0xff]   ;;  %v612_v14 = vld [vmem:[%s808_s3 + $0x48] sm:$0xff]   ;;  %v50_v36 = vshrl.u32 %v49_v35, 7 }
   0x5   :  { %v598_v11 = vld [vmem:[%s807_s1 + $0x40] ss:$8 sps:$4 sm:$0xff]   ;;  %555 = vmatprep.subr.bf16.mxu1 %v610_v10  ;;  %v614_v16 = vld [vmem:[%s808_s3 + $0x50] sm:$0xff]   ;;  %v602_v18 = vld [vmem:[%s807_s1 + $0x64] ss:$8 sps:$4 sm:$0xff]  }
   0x6   :  { %v611_v12 = vld [vmem:[%s808_s3] sm:$0xff]   ;;  %v613_v15 = vld [vmem:[%s808_s3 + $0x8] sm:$0xff]   ;;  %v601_v17 = vld [vmem:[%s807_s1 + $0x50] ss:$8 sps:$4 sm:$0xff]   ;;  %v51_v37 = vsub.s32 0, %v50_v36  ;;  %v55_v39 = vsub.s32 1, %v50_v36 }
   0x7   :  { %154 = vmatpush1.bf16.msra.mxu0 %v589_v4  ;;  %556 = vmatpush3.bf16.msra.mxu1 %v611_v12  ;;  %v615_v19 = vld [vmem:[%s808_s3 + $0x10] sm:$0xff]   ;;  %v616_v20 = vld [vmem:[%s808_s3 + $0x58] sm:$0xff]   ;;  %v604_v21 = vld [vmem:[%s807_s1 + $0x60] ss:$8 sps:$4 sm:$0xff]  }
   0x8   :  { %155 = vmatprep.subr.bf16.mxu0 %v590_v5  ;;  %557 = vmatprep.subr.bf16.mxu1 %v612_v14  ;;  %v605_v22 = vld [vmem:[%s807_s1 + $0x74] ss:$8 sps:$4 sm:$0xff]   ;;  %v618_v24 = vld [vmem:[%s808_s3 + $0x60] sm:$0xff]   ;;  %v607_v25 = vld [vmem:[%s807_s1 + $0x70] ss:$8 sps:$4 sm:$0xff]  }
   0x9   :  { %v617_v23 = vld [vmem:[%s808_s3 + $0x18] sm:$0xff]   ;;  %v755_v26 = vld [vmem:[%s809_s0] sm:$0xff]   ;;  %v620_v28 = vld [vmem:[%s808_s3 + $0x68] sm:$0xff]  }
   0xa   :  { %v619_v27 = vld [vmem:[%s808_s3 + $0x20] sm:$0xff]   ;;  %v767_v29 = vld [vmem:[%s809_s0 + $0x8] sm:$0xff]   ;;  %v622_v31 = vld [vmem:[%s808_s3 + $0x70] sm:$0xff]  }
   0xb   :  { %156 = vmatpush1.bf16.msra.mxu0 %v592_v6  ;;  %558 = vmatpush3.bf16.msra.mxu1 %v613_v15  ;;  %v621_v30 = vld [vmem:[%s808_s3 + $0x28] sm:$0xff]   ;;  %v623_v32 = vld [vmem:[%s808_s3 + $0x30] sm:$0xff]   ;;  %v624_v33 = vld [vmem:[%s808_s3 + $0x78] sm:$0xff]  }
   0xc   :  { %157 = vmatprep.subr.bf16.mxu0 %v593_v7  ;;  %559 = vmatprep.subr.bf16.mxu1 %v614_v16  ;;  %v625_v34 = vld [vmem:[%s808_s3 + $0x38] sm:$0xff]   ;;  %v47_v38 = vld [vmem:[%s810_s2] sm:$0x3] }
   0xd   :  { %v52_v40 = vrot.slane %v47_v38, %v51_v37  ;;  %v56_v41 = vrot.slane %v47_v38, %v55_v39  ;;  %v517_v7 = vld [vmem:[%s811_s4] ss:$0 sm:$0xff] }
   0xf   :  { %158 = vmatpush1.bf16.msra.mxu0 %v595_v8  ;;  %560 = vmatpush3.bf16.msra.mxu1 %v615_v19 }
  0x10   :  { %159 = vmatprep.subr.bf16.mxu0 %v596_v9  ;;  %561 = vmatprep.subr.bf16.mxu1 %v616_v20 }
  0x13   :  { %160 = vmatpush1.bf16.msra.mxu0 %v598_v11  ;;  %562 = vmatpush3.bf16.msra.mxu1 %v617_v23  ;;  %v400_v11 = vunpack.c.l.bf16 %v755_v26  ;;  %v402_v23 = vunpack.c.l.bf16 %v767_v29 }
  0x14   :  { %161 = vmatprep.subr.bf16.mxu0 %v599_v13  ;;  %563 = vmatprep.subr.bf16.mxu1 %v618_v24 }
  0x17   :  { %162 = vmatpush1.bf16.msra.mxu0 %v601_v17  ;;  %564 = vmatpush3.bf16.msra.mxu1 %v619_v27  ;;  %v401_v17 = vunpack.c.h.bf16 %v755_v26 }
  0x18   :  { %163 = vmatprep.subr.bf16.mxu0 %v602_v18  ;;  %565 = vmatprep.subr.bf16.mxu1 %v620_v28 }
  0x1b   :  { %164 = vmatpush1.bf16.msra.mxu0 %v604_v21  ;;  %566 = vmatpush3.bf16.msra.mxu1 %v621_v30 }
  0x1c   :  { %165 = vmatprep.subr.bf16.mxu0 %v605_v22  ;;  %567 = vmatprep.subr.bf16.mxu1 %v622_v31  ;;  %v403_v31 = vunpack.c.h.bf16 %v767_v29 }
  0x1f   :  { %166 = vmatpush1.bf16.msra.mxu0 %v607_v25  ;;  %568 = vmatpush3.bf16.msra.mxu1 %v623_v32 }
  0x20   :  { %569 = vmatprep.subr.bf16.mxu1 %v624_v33 }
  0x22   :  { %184 = vmatmul.mubr.bf16.vlgmr.msra.gmra.mrb[0].mxu0 %v755_v26 }
  0x23   :  { %193 = vmatprep.mubr.bf16.mxu0 %v636_v1  ;;  %570 = vmatpush3.bf16.msra.mxu1 %v625_v34 }
  0x2a   :  { %194 = vmatmul.mubr.bf16.gmra.mrb[4].mxu0 %v767_v29 }
  0xf5   :  { %v185_v42 = vpop.f32.mrb[0].mxu0 }
  0xf6   :  { %v186_v43 = vadd.f32 %v185_v42, %v52_v40  ;;  %v187_v44 = vpop.f32.mrb[1].mxu0 }
  0xf7   :  { %v188_v45 = vadd.f32 %v187_v44, %v56_v41  ;;  %v189_v46 = vpop.f32.mrb[2].mxu0 }
  0xf8   :  { %v190_v47 = vadd.f32 %v189_v46, %v52_v40  ;;  %v191_v48 = vpop.f32.mrb[3].mxu0  ;;  %v204_v50 = vmax.f32 %v186_v43, 0.0 }
  0xf9   :  { %v192_v49 = vadd.f32 %v191_v48, %v56_v41  ;;  %v205_v52 = vmax.f32 %v188_v45, 0.0 }
  0xfa   :  { %v206_v51 = vmax.f32 %v190_v47, 0.0 }
  0xfb   :  { %v207_v53 = vmax.f32 %v192_v49, 0.0 }
  0xfc   :  { %v212_v54 = vpack.c.bf16 %v206_v51, %v204_v50 }
  0xfd   :  { %v195_v55 = vpop.f32.mrb[4].mxu0  ;;  %v213_v56 = vpack.c.bf16 %v207_v53, %v205_v52 }
  0xfe   :  { %v196_v57 = vadd.f32 %v195_v55, %v52_v40  ;;  %v197_v58 = vpop.f32.mrb[5].mxu0 }
  0xff   :  { %v198_v59 = vadd.f32 %v197_v58, %v56_v41  ;;  %v199_v60 = vpop.f32.mrb[6].mxu0  ;;  %383 = vmatprep.mubr.bf16.mxu1 %v213_v56 }
 0x100   :  { %v200_v61 = vadd.f32 %v199_v60, %v52_v40  ;;  %v201_v62 = vpop.f32.mrb[7].mxu0  ;;  %384 = vmatmul.mubr.bf16.vlgmr.msra.gmra.mrb[0].mxu1 %v212_v54  ;;  %v208_v0 = vmax.f32 %v196_v57, 0.0 }
 0x101   :  { %v202_v63 = vadd.f32 %v201_v62, %v56_v41  ;;  %v209_v2 = vmax.f32 %v198_v59, 0.0 }
 0x102   :  { %v210_v1 = vmax.f32 %v200_v61, 0.0  ;;  %v534_v61 = vld [vmem:[%s812_s5] ss:$0 sm:$0xff] }
 0x103   :  { %v211_v3 = vmax.f32 %v202_v63, 0.0 }
 0x104   :  { %v214_v4 = vpack.c.bf16 %v210_v1, %v208_v0  ;;  %v535_v1 = vld [vmem:[%s813_s6] ss:$0 sm:$0xff] }
 0x105   :  { %v215_v5 = vpack.c.bf16 %v211_v3, %v209_v2 }
 0x107   :  { %391 = vmatprep.mubr.bf16.mxu1 %v215_v5 }
 0x108   :  { %392 = vmatmul.mubr.bf16.gmra.mrb[4].mxu1 %v214_v4 }
 0x1d3   :  { %v571_v6 = vpop.f32.mrb[0].mxu1 }
 0x1d4   :  { %v572_v8 = vpop.f32.mrb[1].mxu1 }
 0x1d5   :  { %v573_v9 = vadd.f32 %v572_v8, %v571_v6  ;;  %v574_v10 = vpop.f32.mrb[2].mxu1 }
 0x1d6   :  { %v575_v12 = vpop.f32.mrb[3].mxu1 }
 0x1d7   :  { %v386_v13 = vadd.f32 %v573_v9, %v517_v7  ;;  %v576_v14 = vadd.f32 %v575_v12, %v574_v10 }
 0x1d9   :  { %v389_v15 = vadd.f32 %v576_v14, %v517_v7  ;;  %v404_v16 = vadd.f32 %v400_v11, %v386_v13 }
 0x1db   :  { %v577_v18 = vpop.f32.mrb[4].mxu1  ;;  %410 = vadd.xlane.f32.xlu0 %v404_v16  ;;  %v405_v22 = vadd.f32 %v401_v17, %v389_v15 }
 0x1dc   :  { %v578_v19 = vpop.f32.mrb[5].mxu1 }
 0x1dd   :  { %v579_v20 = vadd.f32 %v578_v19, %v577_v18  ;;  %v580_v21 = vpop.f32.mrb[6].mxu1 }
 0x1de   :  { %v581_v24 = vpop.f32.mrb[7].mxu1 }
 0x1df   :  { %v394_v25 = vadd.f32 %v579_v20, %v517_v7  ;;  %v582_v27 = vadd.f32 %v581_v24, %v580_v21  ;;  %412 = vadd.xlane.f32.xlu0 %v405_v22 }
 0x1e1   :  { %v397_v28 = vadd.f32 %v582_v27, %v517_v7  ;;  %v406_v30 = vadd.f32 %v402_v23, %v394_v25 }
 0x1e3   :  { %414 = vadd.xlane.f32.xlu1 %v406_v30  ;;  %v407_v32 = vadd.f32 %v403_v31, %v397_v28 }
 0x1e7   :  { %416 = vadd.xlane.f32.xlu1 %v407_v32 }
 0x268   :  { %v411_v26 = vpop.xlane.xlu0 %410 }
 0x269   :  { %v419_v33 = vmul.f32 0.0078125, %v411_v26 }
 0x26b   :  { %v423_v34 = vsub.f32 %v404_v16, %v419_v33 }
 0x26c   :  { %v413_v35 = vpop.xlane.xlu0 %412 }
 0x26d   :  { %v420_v36 = vmul.f32 0.0078125, %v413_v35  ;;  %v427_v37 = vmul.f32 %v423_v34, %v423_v34 }
 0x26f   :  { %v424_v38 = vsub.f32 %v405_v22, %v420_v36  ;;  %431 = vadd.xlane.f32.xlu0 %v427_v37 }
 0x270   :  { %v415_v39 = vpop.xlane.xlu1 %414 }
 0x271   :  { %v421_v40 = vmul.f32 0.0078125, %v415_v39  ;;  %v428_v41 = vmul.f32 %v424_v38, %v424_v38 }
 0x273   :  { %v425_v42 = vsub.f32 %v406_v30, %v421_v40  ;;  %433 = vadd.xlane.f32.xlu1 %v428_v41 }
 0x274   :  { %v417_v43 = vpop.xlane.xlu1 %416 }
 0x275   :  { %v422_v44 = vmul.f32 0.0078125, %v417_v43  ;;  %v429_v45 = vmul.f32 %v425_v42, %v425_v42 }
 0x277   :  { %v426_v29 = vsub.f32 %v407_v32, %v422_v44  ;;  %435 = vadd.xlane.f32.xlu0 %v429_v45 }
 0x279   :  { %v430_v46 = vmul.f32 %v426_v29, %v426_v29 }
 0x27b   :  { %437 = vadd.xlane.f32.xlu1 %v430_v46 }
 0x2fc   :  { %v432_v47 = vpop.xlane.xlu0 %431 }
 0x2fd   :  { %v439_v48 = vmul.f32 0.0078125, %v432_v47 }
 0x2ff   :  { %v443_v49 = vadd.f32 1e-05, %v439_v48 }
 0x300   :  { %v434_v50 = vpop.xlane.xlu1 %433 }
 0x301   :  { %628 = vrsqrt.f32 %v443_v49  ;;  %v440_v51 = vmul.f32 0.0078125, %v434_v50 }
 0x303   :  { %v444_v52 = vadd.f32 1e-05, %v440_v51 }
 0x304   :  { %v436_v53 = vpop.xlane.xlu0 %435 }
 0x305   :  { %630 = vrsqrt.f32 %v444_v52  ;;  %v441_v54 = vmul.f32 0.0078125, %v436_v53 }
 0x307   :  { %v445_v55 = vadd.f32 1e-05, %v441_v54 }
 0x308   :  { %v438_v56 = vpop.xlane.xlu1 %437 }
 0x309   :  { %632 = vrsqrt.f32 %v445_v55  ;;  %v442_v57 = vmul.f32 0.0078125, %v438_v56 }
 0x30b   :  { %v629_v58 = vpop.eup %628  ;;  %v446_v59 = vadd.f32 1e-05, %v442_v57 }
 0x30c   :  { %v451_v60 = vmul.f32 %v629_v58, %v423_v34 }
 0x30d   :  { %634 = vrsqrt.f32 %v446_v59 }
 0x30e   :  { %v461_v63 = vmul.f32 %v534_v61, %v451_v60 }
 0x30f   :  { %v631_v62 = vpop.eup %630 }
 0x310   :  { %v452_v0 = vmul.f32 %v631_v62, %v424_v38  ;;  %v471_v4 = vadd.f32 %v535_v1, %v461_v63 }
 0x312   :  { %v462_v2 = vmul.f32 %v534_v61, %v452_v0 }
 0x313   :  { %v633_v3 = vpop.eup %632 }
 0x314   :  { %v472_v5 = vadd.f32 %v535_v1, %v462_v2  ;;  %v453_v6 = vmul.f32 %v633_v3, %v425_v42 }
 0x316   :  { %v547_v7 = vpack.c.bf16 %v472_v5, %v471_v4  ;;  %v463_v9 = vmul.f32 %v534_v61, %v453_v6 }
 0x317   :  { %v635_v8 = vpop.eup %634 }
 0x318   :  { %548 = vst [vmem:[%s814_s7] sm:$0xff] %v547_v7   ;;  %v454_v10 = vmul.f32 %v635_v8, %v426_v29  ;;  %v473_v12 = vadd.f32 %v535_v1, %v463_v9 }
 0x31a   :  { %v464_v11 = vmul.f32 %v534_v61, %v454_v10 }
 0x31c   :  { %v474_v13 = vadd.f32 %v535_v1, %v464_v11 }
 0x31e   :  { %v552_v14 = vpack.c.bf16 %v474_v13, %v473_v12 }
 0x320   :  { %554 = vst [vmem:[%s814_s7 + $0x8] sm:$0xff] %v552_v14  }

// kernel: decoder_forward.9
= control target key start
LH: loop header
LB: loop body
LE: loop exit
PB: predicated region body
PF: predicated region fallthrough
CT: control target
= control target key end

     0   :  { %s2016_s17 = smov 0   ;;  %s2018_s18 = smov 0   ;;  %s2293_s0 = inlined_call_operand.vmem [shape: bf16[2,16,128], index: 0, kind: input, shape index: {}]   ;;  %s2294_s1 = inlined_call_operand.vmem [shape: bf16[2,16,128], index: 1, kind: input, shape index: {}]   ;;  %s2295_s2 = inlined_call_operand.vmem [shape: f32[2,1,16], index: 2, kind: input, shape index: {}]   ;;  %s2296_s3 = inlined_call_operand.vmem [shape: bf16[128,128], index: 3, kind: input, shape index: {}]   ;;  %s2297_s4 = inlined_call_operand.vmem [shape: f32[1,128], index: 4, kind: input, shape index: {}]   ;;  %s2298_s5 = inlined_call_operand.vmem [shape: bf16[128,256], index: 5, kind: input, shape index: {}]   ;;  %s2299_s6 = inlined_call_operand.vmem [shape: f32[1,256], index: 6, kind: input, shape index: {}]   ;;  %s2300_s7 = inlined_call_operand.vmem [shape: bf16[4,32,128], index: 7, kind: input, shape index: {}]   ;;  %s2301_s8 = inlined_call_operand.vmem [shape: f32[1,128], index: 8, kind: input, shape index: {}]   ;;  %s2302_s9 = inlined_call_operand.vmem [shape: f32[1,128], index: 9, kind: input, shape index: {}]   ;;  %s2303_s10 = inlined_call_operand.vmem [shape: f32[1,128], index: 10, kind: input, shape index: {}]   ;;  %s2304_s11 = inlined_call_operand.vmem [shape: bf16[2,16,128], index: 11, kind: output, shape index: {}]  }
   0x1   :  { %s2020_s19 = smov 0   ;;  %s2022_s20 = smov 0  }
   0x2   :  { %s2024_s21 = smov 0  }
   0x3 LB: > { %2308 = sst [smem:[#allocation4_spill]] %s1936_s19  ;;  %s30_s22 = sadd.s32 1, %s1936_s19  ;;  %s1944_s21 = sphi %s2024_s21, %s21_s21   ;;  %s1940_s20 = sphi %s2022_s20, %s2317_s20   ;;  %s1936_s19 = sphi %s2020_s19, %s2316_s19   ;;  %s1932_s18 = sphi %s2018_s18, %s2315_s18   ;;  %s1928_s17 = sphi %s2016_s17, %s2314_s17  }
   0x4   : > { %2309 = sst [smem:[#allocation5_spill]] %s1940_s20  ;;  %s33_s23 = sadd.s32 1, %s1940_s20 }
   0x5   : > { %2310 = sst [smem:[#allocation6_spill]] %s1944_s21  ;;  %p31_p0 = scmp.ge.s32.totalorder %s30_s22, 2 }
   0x6   : > { %p1600_p1 = scmp.ge.s32.totalorder %s1944_s21, 1  ;;  %p374_p2 = scmp.lt.s32.totalorder %s1944_s21, 5 }
   0x7   : > { %s2319_s22 = smov (%p31_p0, %s30_s22), 0  ;;  %s2321_s23 = smov (!%p31_p0, %s33_s23), %s1940_s20 }
   0x8   : > { %2311 = sst [smem:[#allocation7_spill]] %s2319_s22  ;;  %p375_p3 = pnand %p1600_p1, %p374_p2 }
   0x9   : > { %p35_p4 = scmp.ge.s32.totalorder %s2321_s23, 2  ;;  %p428_p5 = scmp.lt.s32.totalorder (!%p375_p3), %s1932_s18, 1 }
   0xa   : > { %378 = sbr.rel (%p375_p3) target bundleno = 2051 (0x803), region = 64  ;;  %p430_p6 = scmp.lt.s32.totalorder (!%p375_p3), %s1928_s17, 1 }
   0xb   : > { %s2323_s23 = smov (%p35_p4, %s2321_s23), 0  ;;  %p1607_p7 = scmp.ne.s32.totalorder (!%p375_p3), %s1928_s17, 0 }
   0xc   : > { %2312 = sst [smem:[#allocation8_spill]] %s2323_s23 }
  0x11   : > { %s2325_s18 = smov (!%p428_p5, %s1932_s18), 1  ;;  %456 = sbr.rel (%p1607_p7) target bundleno = 394 (0x18a), region = 68 }
  0x12   : > { %s431_s24 = scalar_select %p430_p6, %s1928_s17, 1 }
  0x13   : > { %s1601_s25 = sshll.u32 %s2325_s18, 1  ;;  %s1659_s26 = sshll.u32 %s2325_s18, 3  ;;  %v1847_v0 = vld [vmem:[%s2298_s5 + $0x4] ss:$8 sps:$4 sm:$0xff] (!%p1607_p7)   ;;  %v1849_v1 = vld [vmem:[%s2298_s5] ss:$8 sps:$4 sm:$0xff] (!%p1607_p7)   ;;  %v477_v18 = vlaneseq (!%p1607_p7) }
  0x14   : > { %s433_s27 = sadd.s32 %s1601_s25, %s431_s24  ;;  %s2053_s30 = scalar_lea.vmem %s2294_s1, %s1659_s26  ;;  %v1946_v2 = vmov (!%p1607_p7), 0   ;;  %573 = vmatprep.subr.bf16.mxu0 (!%p1607_p7), %v1847_v0  ;;  %v1850_v3 = vld [vmem:[%s2298_s5 + $0x14] ss:$8 sps:$4 sm:$0xff] (!%p1607_p7)   ;;  %v1852_v4 = vld [vmem:[%s2298_s5 + $0x10] ss:$8 sps:$4 sm:$0xff] (!%p1607_p7)   ;;  %vm617_vm0 = vcmask (!%p1607_p7), 261120  }
  0x15   : > { %s1602_s12 = sshll.u32 %s433_s27, 2  ;;  %s443_s15 = scalar_lea.vmem %s2295_s2, %s2325_s18  ;;  %605 = vmatprep.mubr.bf16.mxu0 (!%p1607_p7), %v1946_v2  ;;  %574 = vmatpush1.bf16.msra.mxu0 (!%p1607_p7), %v1849_v1  ;;  %v1853_v5 = vld [vmem:[%s2298_s5 + $0x24] ss:$8 sps:$4 sm:$0xff] (!%p1607_p7)   ;;  %v1855_v6 = vld [vmem:[%s2298_s5 + $0x20] ss:$8 sps:$4 sm:$0xff] (!%p1607_p7)   ;;  %v478_v19 = vshrl.u32 (!%p1607_p7), %v477_v18, 7 }
  0x16   : > { %s2062_s22 = scalar_lea.vmem %s2293_s0, %s1602_s12  ;;  %s2067_s21 = scalar_lea.vmem %s2304_s11, %s1602_s12  ;;  %575 = vmatprep.subr.bf16.mxu0 (!%p1607_p7), %v1850_v3  ;;  %v1856_v7 = vld [vmem:[%s2298_s5 + $0x34] ss:$8 sps:$4 sm:$0xff] (!%p1607_p7)   ;;  %v1858_v8 = vld [vmem:[%s2298_s5 + $0x30] ss:$8 sps:$4 sm:$0xff] (!%p1607_p7)   ;;  %v1859_v9 = vld [vmem:[%s2298_s5 + $0x44] ss:$8 sps:$4 sm:$0xff] (!%p1607_p7)  }
  0x17   : > { %v1861_v10 = vld [vmem:[%s2298_s5 + $0x40] ss:$8 sps:$4 sm:$0xff] (!%p1607_p7)   ;;  %v1862_v11 = vld [vmem:[%s2298_s5 + $0x54] ss:$8 sps:$4 sm:$0xff] (!%p1607_p7)   ;;  %v1864_v12 = vld [vmem:[%s2298_s5 + $0x50] ss:$8 sps:$4 sm:$0xff] (!%p1607_p7)  }
  0x18   : > { %v1865_v13 = vld [vmem:[%s2298_s5 + $0x64] ss:$8 sps:$4 sm:$0xff]   ;;  %v1867_v14 = vld [vmem:[%s2298_s5 + $0x60] ss:$8 sps:$4 sm:$0xff]   ;;  %v1868_v15 = vld [vmem:[%s2298_s5 + $0x74] ss:$8 sps:$4 sm:$0xff]  }
  0x19   : > { %576 = vmatpush1.bf16.msra.mxu0 %v1852_v4  ;;  %v1870_v16 = vld [vmem:[%s2298_s5 + $0x70] ss:$8 sps:$4 sm:$0xff]   ;;  %v1871_v17 = vld [vmem:[%s2053_s30] sm:$0xff]   ;;  %v479_v20 = vsub.s32 0, %v478_v19  ;;  %v483_v22 = vsub.s32 1, %v478_v19  ;;  %s1947_s30 = smov 64  }
  0x1a   : > { %577 = vmatprep.subr.bf16.mxu0 %v1853_v5  ;;  %v475_v21 = vld [vmem:[%s2299_s6] sm:$0x3]  ;;  %s1948_s19 = smov 96   ;;  %s1949_s20 = smov 32  }
  0x1b   : > { %v480_v23 = vrot.slane %v475_v21, %v479_v20  ;;  %v484_v25 = vrot.slane %v475_v21, %v483_v22 }
  0x1d   : > { %578 = vmatpush1.bf16.msra.mxu0 %v1855_v6 }
  0x1e   : > { %579 = vmatprep.subr.bf16.mxu0 %v1856_v7 }
  0x21   : > { %580 = vmatpush1.bf16.msra.mxu0 %v1858_v8 }
  0x22   : > { %581 = vmatprep.subr.bf16.mxu0 %v1859_v9 }
  0x25   : > { %582 = vmatpush1.bf16.msra.mxu0 %v1861_v10 }
  0x26   : > { %583 = vmatprep.subr.bf16.mxu0 %v1862_v11 }
  0x29   : > { %584 = vmatpush1.bf16.msra.mxu0 %v1864_v12 }
  0x2a   : > { %585 = vmatprep.subr.bf16.mxu0 %v1865_v13 }
  0x2d   : > { %586 = vmatpush1.bf16.msra.mxu0 %v1867_v14 }
  0x2e   : > { %587 = vmatprep.subr.bf16.mxu0 %v1868_v15 }
  0x31   : > { %588 = vmatpush1.bf16.msra.mxu0 %v1870_v16 }
  0x34   : > { %606 = vmatmul.mubr.bf16.vlgmr.msra.gmra.mrb[0].mxu0 %v1871_v17 }
 0x107   : > { %v607_v24 = vpop.f32.mrb[0].mxu0 }
 0x108   : > { %v609_v26 = vpop.f32.mrb[1].mxu0  ;;  %v608_v28 = vadd.f32 %v607_v24, %v480_v23 }
 0x109   : > { %v611_v27 = vpop.f32.mrb[2].mxu0  ;;  %v610_v31 = vadd.f32 %v609_v26, %v484_v25 }
 0x10a   : > { %v612_v29 = vadd.f32 %v611_v27, %v480_v23  ;;  %v613_v30 = vpop.f32.mrb[3].mxu0 }
 0x10b   : > { %v614_v32 = vadd.f32 %v613_v30, %v484_v25 }
 0x10c   : > { %v616_v33 = vpack.c.bf16 %v612_v29, %v608_v28 }
 0x10d   : > { %v619_v34 = vpack.c.bf16 %v614_v32, %v610_v31 }
 0x10e   : > { %618 = vst.msk [vmem:[#allocation2] sm:$0xff] %vm617_vm0, %v616_v33  ;;  %633 = vrot.lane.b32.xlu1 %v616_v33, %s1947_s30  ;;  %622 = vrot.lane.b32.xlu0 %v616_v33, %s1948_s19 }
 0x10f   : > { %620 = vst.msk [vmem:[#allocation3] sm:$0xff] %vm617_vm0, %v619_v34 }
 0x112   : > { %638 = vrot.lane.b32.xlu1 %v619_v34, %s1947_s30  ;;  %628 = vrot.lane.b32.xlu0 %v619_v34, %s1948_s19 }
 0x116   : > { %648 = vrot.lane.b32.xlu1 %v619_v34, %s1949_s20  ;;  %643 = vrot.lane.b32.xlu0 %v616_v33, %s1949_s20 }
 0x180   : > { %v634_v35 = vpop.permute.xlu1 %633  ;;  %v623_v36 = vpop.permute.xlu0 %622 }
 0x181   : > { %637 = vst.msk [vmem:[#allocation2 + $0x10] sm:$0xff] %vm617_vm0, %v634_v35  ;;  %626 = vst.msk [vmem:[#allocation2 + $0x8] sm:$0xff] %vm617_vm0, %v623_v36 }
 0x184   : > { %v639_v37 = vpop.permute.xlu1 %638  ;;  %v629_v38 = vpop.permute.xlu0 %628 }
 0x185   : > { %642 = vst.msk [vmem:[#allocation3 + $0x10] sm:$0xff] %vm617_vm0, %v639_v37  ;;  %632 = vst.msk [vmem:[#allocation3 + $0x8] sm:$0xff] %vm617_vm0, %v629_v38 }
 0x188   : > { %v649_v39 = vpop.permute.xlu1 %648  ;;  %v644_v40 = vpop.permute.xlu0 %643 }
 0x189   : > { %652 = vst.msk [vmem:[#allocation3 + $0x18] sm:$0xff] %vm617_vm0, %v649_v39  ;;  %647 = vst.msk [vmem:[#allocation2 + $0x18] sm:$0xff] %vm617_vm0, %v644_v40 }
 0x18a PF: > { %v1872_v41 = vld [vmem:[%s2296_s3] sm:$0xff]   ;;  %v1950_v42 = vmov 0.0   ;;  %v1873_v43 = vld [vmem:[%s2296_s3 + $0x8] sm:$0xff]   ;;  %vm1951_vm1 = vmmov 0   ;;  %v1874_v44 = vld [vmem:[%s2296_s3 + $0x10] sm:$0xff]   ;;  %vm786_vm2 = vcmask 261120   ;;  %v972_v9 = vlaneseq }
 0x18b   : > { %1697 = vmatprep.subr.bf16.mxu0 %v1950_v42  ;;  %1717 = vmatprep.subr.bf16.mxu1 %v1950_v42  ;;  %v1875_v45 = vld [vmem:[%s2296_s3 + $0x18] sm:$0xff]   ;;  %v1876_v46 = vld [vmem:[%s2296_s3 + $0x20] sm:$0xff]   ;;  %v1877_v47 = vld [vmem:[%s2296_s3 + $0x28] sm:$0xff]   ;;  %s1953_s13 = smov 96   ;;  %s1954_s14 = smov 64   ;;  %v1955_v13 = vmov 0  }
 0x18c   : > { %1698 = vmatpush3.bf16.msra.mxu0 %v1872_v41  ;;  %1713 = vmatprep.mubr.msk.bf16.mxu0 %vm1951_vm1, %v1950_v42  ;;  %v1878_v48 = vld [vmem:[%s2296_s3 + $0x30] sm:$0xff]   ;;  %v1879_v49 = vld [vmem:[%s2296_s3 + $0x38] sm:$0xff]   ;;  %v2167_v50 = vld [vmem:[%s2062_s22] sm:$0xf]  ;;  %s1952_s22 = smov 32   ;;  %v973_v11 = vshrl.u32 %v972_v9, 7 }
 0x18d   : > { %1699 = vmatprep.subr.bf16.mxu0 %v1950_v42  ;;  %1719 = vmatprep.mubr.msk.bf16.mxu1 %vm1951_vm1, %v1950_v42  ;;  %v782_v51 = vld [vmem:[#allocation2] sm:$0xff]  ;;  %v783_v58 = vld [vmem:[#allocation2 + $0x8] sm:$0xff]  ;;  %v784_v63 = vld [vmem:[#allocation2 + $0x10] sm:$0xff]  ;;  %vm981_vm5 = vcmask 130048  }
 0x18e   : > { %v791_v52 = vsel %vm786_vm2, %v782_v51, 0  ;;  %v1625_v53 = vld [vmem:[%s2297_s4] ss:$0 sm:$0xff]  ;;  %v837_v62 = vsel %vm786_vm2, %v783_v58, 0  ;;  %v883_v2 = vsel %vm786_vm2, %v784_v63, 0  ;;  %v974_v12 = vsub.s32 0, %v973_v11 }
 0x18f   : > { %1718 = vmatpush3.bf16.xpose.msra.mxu1 %v791_v52  ;;  %v780_v10 = vld [vmem:[%s443_s15] sm:$0x1]  ;;  %v1031_v63 = vld [vmem:[#allocation3 + $0x8] sm:$0xff] }
 0x190   : > { %1700 = vmatpush3.bf16.msra.mxu0 %v1873_v43  ;;  %1723 = vmatprep.subr.bf16.mxu1 %v1950_v42  ;;  %v785_v4 = vld [vmem:[#allocation2 + $0x18] sm:$0xff]  ;;  %vm781_vm3 = vcmp.gt.f32.partialorder %v780_v10, 0.0 }
 0x191   : > { %1701 = vmatprep.subr.bf16.mxu0 %v1950_v42  ;;  %v929_v6 = vsel %vm786_vm2, %v785_v4, 0  ;;  %v971_v14 = vsel %vm781_vm3, 1, %v1955_v13  ;;  %v1032_v4 = vld [vmem:[#allocation3 + $0x10] sm:$0xff]  ;;  %v1033_v10 = vld [vmem:[#allocation3 + $0x18] sm:$0xff] }
 0x192   : > { %v975_v15 = vrot.slane %v971_v14, %v974_v12  ;;  %v1880_v14 = vld [vmem:[%s2300_s7] sm:$0xff]  }
 0x194   : > { %1702 = vmatpush3.bf16.msra.mxu0 %v1874_v44  ;;  %vm976_vm4 = vcmp.eq.s32.totalorder %v975_v15, 1 }
 0x195   : > { %1703 = vmatprep.subr.bf16.mxu0 %v1950_v42 }
 0x198   : > { %1704 = vmatpush3.bf16.msra.mxu0 %v1875_v45 }
 0x199   : > { %1705 = vmatprep.subr.bf16.mxu0 %v1950_v42 }
 0x19c   : > { %1706 = vmatpush3.bf16.msra.mxu0 %v1876_v46  ;;  %v1030_v46 = vld [vmem:[#allocation3] sm:$0xff] }
 0x19d   : > { %1707 = vmatprep.subr.bf16.mxu0 %v1950_v42 }
 0x1a0   : > { %1708 = vmatpush3.bf16.msra.mxu0 %v1877_v47 }
 0x1a1   : > { %1709 = vmatprep.subr.bf16.mxu0 %v1950_v42 }
 0x1a4   : > { %1710 = vmatpush3.bf16.msra.mxu0 %v1878_v48 }
 0x1a5   : > { %1711 = vmatprep.subr.bf16.mxu0 %v1950_v42 }
 0x1a8   : > { %1712 = vmatpush3.bf16.msra.mxu0 %v1879_v49 }
 0x1a9   : > { %1741 = vmatprep.subr.bf16.mxu0 %v1950_v42 }
 0x1ab   : > { %1714 = vmatmul.mubr.bf16.vlgmr.msra.gmra.mrb[0].mxu0 %v2167_v50 }
 0x1ac   : > { %1743 = vmatprep.mubr.msk.bf16.mxu0 %vm1951_vm1, %v1950_v42  ;;  %1742 = vmatpush3.bf16.msra.mxu0 %v1030_v46 }
 0x1ad   : > { %1753 = vmatprep.subr.bf16.mxu0 %v1950_v42 }
 0x27e   : > { %v759_v54 = vpop.f32.mrb[0].mxu0 }
 0x27f   : > { %v760_v55 = vadd.f32 %v1625_v53, %v759_v54  ;;  %v1715_v56 = vpop.f32.mrb[1].mxu0 }
 0x280   : > { %v762_v57 = vpop.f32.mrb[2].mxu0 }
 0x281   : > { %v765_v59 = vmul.f32 0.17677669, %v760_v55  ;;  %v1716_v60 = vpop.f32.mrb[3].mxu0 }
 0x283   : > { %773 = vrot.lane.b32.xlu1 %v765_v59, %s1952_s22  ;;  %767 = vrot.lane.b32.xlu0 %v765_v59, %s1953_s13  ;;  %v776_v61 = vpack.c.bf16 %v765_v59, %v765_v59 }
 0x285   : > { %1720 = vmatmul.mubr.msk.bf16.vlgmr.msra.gmra.mrb[0].mxu1 %vm786_vm2, %v776_v61 }
 0x286   : > { %1724 = vmatpush3.bf16.xpose.msra.mxu1 %v837_v62  ;;  %1725 = vmatprep.mubr.msk.bf16.mxu1 %vm1951_vm1, %v1950_v42 }
 0x287   : > { %770 = vrot.lane.b32.xlu0 %v765_v59, %s1954_s14  ;;  %1729 = vmatprep.subr.bf16.mxu1 %v1950_v42 }
 0x2f5   : > { %v768_v0 = vpop.permute.xlu0 %767  ;;  %v774_v7 = vpop.permute.xlu1 %773 }
 0x2f6   : > { %v777_v1 = vpack.c.bf16 %v768_v0, %v768_v0  ;;  %v779_v8 = vpack.c.bf16 %v774_v7, %v774_v7 }
 0x2f8   : > { %1726 = vmatmul.mubr.msk.bf16.vlgmr.msra.gmra.mrb[4].mxu1 %vm786_vm2, %v777_v1 }
 0x2f9   : > { %1730 = vmatpush3.bf16.xpose.msra.mxu1 %v883_v2  ;;  %1731 = vmatprep.mubr.msk.bf16.mxu1 %vm1951_vm1, %v1950_v42  ;;  %v771_v3 = vpop.permute.xlu0 %770 }
 0x2fa   : > { %1735 = vmatprep.subr.bf16.mxu1 %v1950_v42  ;;  %v778_v5 = vpack.c.bf16 %v771_v3, %v771_v3 }
 0x300   : > { %1732 = vmatmul.mubr.msk.bf16.vlgmr.msra.gmra.mrb[8].mxu1 %vm786_vm2, %v778_v5 }
 0x301   : > { %1736 = vmatpush3.bf16.xpose.msra.mxu1 %v929_v6  ;;  %1737 = vmatprep.mubr.msk.bf16.mxu1 %vm1951_vm1, %v1950_v42 }
 0x302   : > { %1747 = vmatprep.subr.bf16.mxu1 %v1950_v42 }
 0x308   : > { %1738 = vmatmul.mubr.msk.bf16.vlgmr.msra.gmra.mrb[12].mxu1 %vm786_vm2, %v779_v8 }
 0x309   : > { %1749 = vmatprep.mubr.msk.bf16.mxu1 %vm1951_vm1, %v1950_v42  ;;  %1748 = vmatpush3.bf16.msra.mxu1 %v1031_v63  ;;  %v1457_v63 = vunpack.c.l.bf16 %v2167_v50  ;;  %v1655_v50 = vld [vmem:[%s2302_s9] ss:$0 sm:$0xff] }
 0x30a   : > { %1759 = vmatprep.subr.bf16.mxu1 %v1950_v42 }
 0x358   : > { %v827_v16 = vpop.f32.mrb[0].mxu1 }
 0x359   : > { %v977_v17 = vsel %vm976_vm4, %v827_v16, -1e+09  ;;  %v1721_v18 = vpop.f32.mrb[1].mxu1  ;;  %v1881_v16 = vld [vmem:[%s2300_s7 + $0x8] sm:$0xff]  }
 0x35a   : > { %v830_v19 = vpop.f32.mrb[2].mxu1  ;;  %v982_v20 = vsel %vm981_vm5, %v977_v17, -inf }
 0x35b   : > { %983 = vmax.xlane.f32.xlu1 %v982_v20  ;;  %v1722_v21 = vpop.f32.mrb[3].mxu1  ;;  %v1882_v19 = vld [vmem:[%s2300_s7 + $0x10] sm:$0xff]  }
 0x35c   : > { %v1883_v21 = vld [vmem:[%s2300_s7 + $0x18] sm:$0xff]  }
 0x3cb   : > { %v873_v22 = vpop.f32.mrb[4].mxu1 }
 0x3cc   : > { %v978_v23 = vsel %vm976_vm4, %v873_v22, -1e+09  ;;  %v1727_v24 = vpop.f32.mrb[5].mxu1 }
 0x3cd   : > { %v876_v25 = vpop.f32.mrb[6].mxu1  ;;  %v985_v26 = vsel %vm981_vm5, %v978_v23, -inf }
 0x3ce   : > { %986 = vmax.xlane.f32.xlu0 %v985_v26  ;;  %v1728_v27 = vpop.f32.mrb[7].mxu1 }
 0x3d3   : > { %v919_v28 = vpop.f32.mrb[8].mxu1 }
 0x3d4   : > { %v979_v29 = vsel %vm976_vm4, %v919_v28, -1e+09  ;;  %v1733_v30 = vpop.f32.mrb[9].mxu1  ;;  %v1885_v28 = vld [vmem:[%s2300_s7 + $0x28] sm:$0xff]  }
 0x3d5   : > { %v922_v31 = vpop.f32.mrb[10].mxu1  ;;  %v988_v32 = vsel %vm981_vm5, %v979_v29, -inf  ;;  %v1886_v30 = vld [vmem:[%s2300_s7 + $0x30] sm:$0xff]  }
 0x3d6   : > { %989 = vmax.xlane.f32.xlu0 %v988_v32  ;;  %v1734_v33 = vpop.f32.mrb[11].mxu1 }
 0x3db   : > { %v965_v34 = vpop.f32.mrb[12].mxu1 }
 0x3dc   : > { %v980_v35 = vsel %vm976_vm4, %v965_v34, -1e+09  ;;  %v1739_v36 = vpop.f32.mrb[13].mxu1 }
 0x3dd   : > { %v968_v37 = vpop.f32.mrb[14].mxu1  ;;  %v991_v38 = vsel %vm981_vm5, %v980_v35, -inf }
 0x3de   : > { %992 = vmax.xlane.f32.xlu1 %v991_v38  ;;  %v1740_v39 = vpop.f32.mrb[15].mxu1 }
 0x3e8   : > { %v984_v40 = vpop.xlane.xlu1 %983 }
 0x3e9   : > { %v994_v41 = vsub.f32 %v977_v17, %v984_v40 }
 0x3eb   : > { %v998_v43 = vmul.f32 1.442695, %v994_v41 }
 0x3ed   : > { %1888 = vpow2.f32 %v998_v43 }
 0x3f7   : > { %v1889_v44 = vpop.eup %1888 }
 0x3f8   : > { %v1006_v45 = vsel %vm981_vm5, %v1889_v44, 0.0 }
 0x3f9   : > { %1007 = vadd.xlane.f32.xlu0 %v1006_v45 }
 0x45b   : > { %v987_v47 = vpop.xlane.xlu0 %986 }
 0x45c   : > { %v995_v48 = vsub.f32 %v978_v23, %v987_v47  ;;  %v1884_v23 = vld [vmem:[%s2300_s7 + $0x20] sm:$0xff]  }
 0x45e   : > { %v1000_v49 = vmul.f32 1.442695, %v995_v48 }
 0x460   : > { %1890 = vpow2.f32 %v1000_v49 }
 0x463   : > { %v990_v51 = vpop.xlane.xlu0 %989 }
 0x464   : > { %v996_v52 = vsub.f32 %v979_v29, %v990_v51 }
 0x466   : > { %v1002_v53 = vmul.f32 1.442695, %v996_v52 }
 0x468   : > { %1892 = vpow2.f32 %v1002_v53 }
 0x46a   : > { %v1891_v54 = vpop.eup %1890 }
 0x46b   : > { %v993_v55 = vpop.xlane.xlu1 %992  ;;  %v1009_v56 = vsel %vm981_vm5, %v1891_v54, 0.0 }
 0x46c   : > { %v997_v57 = vsub.f32 %v980_v35, %v993_v55  ;;  %1010 = vadd.xlane.f32.xlu1 %v1009_v56  ;;  %v1887_v35 = vld [vmem:[%s2300_s7 + $0x38] sm:$0xff]  }
 0x46e   : > { %v1004_v58 = vmul.f32 1.442695, %v997_v57 }
 0x470   : > { %1894 = vpow2.f32 %v1004_v58 }
 0x472   : > { %v1893_v59 = vpop.eup %1892 }
 0x473   : > { %v1012_v60 = vsel %vm981_vm5, %v1893_v59, 0.0 }
 0x474   : > { %1013 = vadd.xlane.f32.xlu0 %v1012_v60 }
 0x47a   : > { %v1895_v61 = vpop.eup %1894 }
 0x47b   : > { %v1015_v62 = vsel %vm981_vm5, %v1895_v61, 0.0 }
 0x47c   : > { %1016 = vadd.xlane.f32.xlu1 %v1015_v62  ;;  %v1654_v62 = vld [vmem:[%s2301_s8] ss:$0 sm:$0xff] }
 0x486   : > { %v1008_v0 = vpop.xlane.xlu0 %1007 }
 0x487   : > { %1896 = vrcp.f32 %v1008_v0 }
 0x491   : > { %v1897_v1 = vpop.eup %1896 }
 0x492   : > { %v1022_v2 = vmul.f32 %v1897_v1, %v1889_v44 }
 0x494   : > { %v1026_v3 = vpack.c.bf16 %v1022_v2, %v1022_v2 }
 0x496   : > { %1744 = vmatmul.mubr.msk.bf16.vlgmr.msra.gmra.mrb[4].mxu0 %vm981_vm5, %v1026_v3 }
 0x497   : > { %1754 = vmatpush3.bf16.msra.mxu0 %v1032_v4  ;;  %1755 = vmatprep.mubr.msk.bf16.mxu0 %vm1951_vm1, %v1950_v42 }
 0x498   : > { %1765 = vmatprep.subr.bf16.mxu0 %v1950_v42 }
 0x4f9   : > { %v1011_v5 = vpop.xlane.xlu1 %1010 }
 0x4fa   : > { %1898 = vrcp.f32 %v1011_v5 }
 0x501   : > { %v1014_v6 = vpop.xlane.xlu0 %1013 }
 0x502   : > { %1900 = vrcp.f32 %v1014_v6 }
 0x504   : > { %v1899_v7 = vpop.eup %1898 }
 0x505   : > { %v1023_v8 = vmul.f32 %v1899_v7, %v1891_v54 }
 0x507   : > { %v1027_v9 = vpack.c.bf16 %v1023_v8, %v1023_v8 }
 0x509   : > { %1750 = vmatmul.mubr.msk.bf16.vlgmr.msra.gmra.mrb[16].mxu1 %vm981_vm5, %v1027_v9  ;;  %v1017_v11 = vpop.xlane.xlu1 %1016 }
 0x50a   : > { %1902 = vrcp.f32 %v1017_v11  ;;  %1760 = vmatpush3.bf16.msra.mxu1 %v1033_v10  ;;  %1761 = vmatprep.mubr.msk.bf16.mxu1 %vm1951_vm1, %v1950_v42 }
 0x50b   : > { %1773 = vmatprep.subr.bf16.mxu1 %v1950_v42 }
 0x50c   : > { %v1901_v12 = vpop.eup %1900 }
 0x50d   : > { %v1024_v13 = vmul.f32 %v1901_v12, %v1893_v59 }
 0x50f   : > { %v1028_v15 = vpack.c.bf16 %v1024_v13, %v1024_v13 }
 0x511   : > { %1756 = vmatmul.mubr.msk.bf16.vlgmr.msra.gmra.mrb[8].mxu0 %vm981_vm5, %v1028_v15  ;;  %v1656_v15 = vld [vmem:[%s2303_s10] ss:$0 sm:$0xff] }
 0x512   : > { %1766 = vmatpush3.bf16.msra.mxu0 %v1880_v14  ;;  %1769 = vmatprep.mubr.msk.bf16.mxu0 %vm1951_vm1, %v1950_v42 }
 0x513   : > { %1767 = vmatprep.subr.bf16.mxu0 %v1950_v42 }
 0x514   : > { %v1903_v17 = vpop.eup %1902 }
 0x515   : > { %v1025_v18 = vmul.f32 %v1903_v17, %v1895_v61 }
 0x516   : > { %1768 = vmatpush3.bf16.msra.mxu0 %v1881_v16 }
 0x517   : > { %v1029_v20 = vpack.c.bf16 %v1025_v18, %v1025_v18  ;;  %1781 = vmatprep.subr.bf16.mxu0 %v1950_v42 }
 0x519   : > { %1762 = vmatmul.mubr.msk.bf16.vlgmr.msra.gmra.mrb[20].mxu1 %vm981_vm5, %v1029_v20 }
 0x51a   : > { %1774 = vmatpush3.bf16.msra.mxu1 %v1882_v19  ;;  %1777 = vmatprep.mubr.msk.bf16.mxu1 %vm1951_vm1, %v1950_v42 }
 0x51b   : > { %1775 = vmatprep.subr.bf16.mxu1 %v1950_v42 }
 0x51e   : > { %1776 = vmatpush3.bf16.msra.mxu1 %v1883_v21 }
 0x51f   : > { %1789 = vmatprep.subr.bf16.mxu1 %v1950_v42 }
 0x569   : > { %v1071_v22 = vpop.f32.mrb[4].mxu0 }
 0x56a   : > { %v1206_v24 = vpack.c.bf16 %v1071_v22, %v1071_v22  ;;  %v1745_v25 = vpop.f32.mrb[5].mxu0 }
 0x56b   : > { %v1074_v26 = vpop.f32.mrb[6].mxu0 }
 0x56c   : > { %v1746_v27 = vpop.f32.mrb[7].mxu0  ;;  %1770 = vmatmul.mubr.msk.bf16.vlgmr.msra.gmra.mrb[12].mxu0 %vm786_vm2, %v1206_v24 }
 0x56d   : > { %1782 = vmatpush3.bf16.msra.mxu0 %v1884_v23  ;;  %1785 = vmatprep.mubr.msk.bf16.mxu0 %vm1951_vm1, %v1950_v42 }
 0x56e   : > { %1783 = vmatprep.subr.bf16.mxu0 %v1950_v42 }
 0x571   : > { %1784 = vmatpush3.bf16.msra.mxu0 %v1885_v28 }
 0x5dc   : > { %v1114_v29 = vpop.f32.mrb[16].mxu1 }
 0x5dd   : > { %v1207_v31 = vpack.c.bf16 %v1114_v29, %v1114_v29  ;;  %v1751_v32 = vpop.f32.mrb[17].mxu1 }
 0x5de   : > { %v1117_v33 = vpop.f32.mrb[18].mxu1 }
 0x5df   : > { %v1752_v34 = vpop.f32.mrb[19].mxu1  ;;  %1778 = vmatmul.mubr.msk.bf16.vlgmr.msra.gmra.mrb[24].mxu1 %vm786_vm2, %v1207_v31 }
 0x5e0   : > { %1790 = vmatpush3.bf16.msra.mxu1 %v1886_v30  ;;  %1793 = vmatprep.mubr.msk.bf16.mxu1 %vm1951_vm1, %v1950_v42 }
 0x5e1   : > { %1791 = vmatprep.subr.bf16.mxu1 %v1950_v42 }
 0x5e4   : > { %v1157_v36 = vpop.f32.mrb[8].mxu0  ;;  %1792 = vmatpush3.bf16.msra.mxu1 %v1887_v35 }
 0x5e5   : > { %v1208_v37 = vpack.c.bf16 %v1157_v36, %v1157_v36  ;;  %v1757_v38 = vpop.f32.mrb[9].mxu0 }
 0x5e6   : > { %v1160_v39 = vpop.f32.mrb[10].mxu0 }
 0x5e7   : > { %v1758_v40 = vpop.f32.mrb[11].mxu0  ;;  %1786 = vmatmul.mubr.msk.bf16.vlgmr.msra.gmra.mrb[16].mxu0 %vm786_vm2, %v1208_v37 }
 0x5ec   : > { %v1200_v41 = vpop.f32.mrb[20].mxu1 }
 0x5ed   : > { %v1209_v43 = vpack.c.bf16 %v1200_v41, %v1200_v41  ;;  %v1763_v44 = vpop.f32.mrb[21].mxu1 }
 0x5ee   : > { %v1203_v45 = vpop.f32.mrb[22].mxu1 }
 0x5ef   : > { %v1764_v46 = vpop.f32.mrb[23].mxu1  ;;  %1794 = vmatmul.mubr.msk.bf16.vlgmr.msra.gmra.mrb[28].mxu1 %vm786_vm2, %v1209_v43 }
 0x63f   : > { %v1275_v47 = vpop.f32.mrb[12].mxu0 }
 0x640   : > { %v1771_v48 = vpop.f32.mrb[13].mxu0 }
 0x641   : > { %v1278_v49 = vpop.f32.mrb[14].mxu0 }
 0x642   : > { %v1772_v51 = vpop.f32.mrb[15].mxu0 }
 0x6b2   : > { %v1330_v42 = vpop.f32.mrb[24].mxu1 }
 0x6b3   : > { %v1446_v52 = vadd.f32 %v1330_v42, %v1275_v47  ;;  %v1779_v53 = vpop.f32.mrb[25].mxu1 }
 0x6b4   : > { %v1333_v54 = vpop.f32.mrb[26].mxu1 }
 0x6b5   : > { %v1780_v55 = vpop.f32.mrb[27].mxu1 }
 0x6ba   : > { %v1385_v56 = vpop.f32.mrb[16].mxu0 }
 0x6bb   : > { %v1447_v57 = vadd.f32 %v1446_v52, %v1385_v56  ;;  %v1787_v58 = vpop.f32.mrb[17].mxu0 }
 0x6bc   : > { %v1388_v59 = vpop.f32.mrb[18].mxu0 }
 0x6bd   : > { %v1788_v60 = vpop.f32.mrb[19].mxu0 }
 0x6c2   : > { %v1440_v61 = vpop.f32.mrb[28].mxu1 }
 0x6c3   : > { %v1448_v0 = vadd.f32 %v1447_v57, %v1440_v61  ;;  %v1795_v1 = vpop.f32.mrb[29].mxu1 }
 0x6c4   : > { %v1443_v2 = vpop.f32.mrb[30].mxu1 }
 0x6c5   : > { %v1456_v3 = vadd.f32 %v1654_v62, %v1448_v0  ;;  %v1796_v4 = vpop.f32.mrb[31].mxu1 }
 0x6c7   : > { %v1458_v5 = vadd.f32 %v1457_v63, %v1456_v3 }
 0x6c9   : > { %1461 = vadd.xlane.f32.xlu0 %v1458_v5 }
 0x756   : > { %v1462_v6 = vpop.xlane.xlu0 %1461 }
 0x757   : > { %v1464_v7 = vmul.f32 0.0078125, %v1462_v6 }
 0x759   : > { %v1465_v8 = vsub.f32 %v1458_v5, %v1464_v7 }
 0x75b   : > { %v1466_v9 = vmul.f32 %v1465_v8, %v1465_v8 }
 0x75d   : > { %1467 = vadd.xlane.f32.xlu1 %v1466_v9 }
 0x7ea   : > { %v1468_v10 = vpop.xlane.xlu1 %1467 }
 0x7eb   : > { %v1469_v11 = vmul.f32 0.0078125, %v1468_v10 }
 0x7ed   : > { %v1470_v12 = vadd.f32 1e-05, %v1469_v11 }
 0x7ef   : > { %1904 = vrsqrt.f32 %v1470_v12 }
 0x7f9   : > { %v1905_v13 = vpop.eup %1904 }
 0x7fa   : > { %v1472_v14 = vmul.f32 %v1905_v13, %v1465_v8 }
 0x7fc   : > { %v1479_v16 = vmul.f32 %v1655_v50, %v1472_v14 }
 0x7fe   : > { %v1486_v17 = vadd.f32 %v1656_v15, %v1479_v16 }
 0x800   : > { %v1487_v18 = vpack.c.bf16 %v1486_v17, %v1486_v17 }
 0x802   : > { %1488 = vst [vmem:[%s2067_s21] sm:$0xf] %v1487_v18 }
 0x803 PF: > { %s2313_s27 = sld [smem:[#allocation6_spill]]  ;;  %s2314_s17 = sld [smem:[#allocation4_spill]] }
 0x804   : > { %s2315_s18 = sld [smem:[#allocation5_spill]]  ;;  %s2316_s19 = sld [smem:[#allocation7_spill]] }
 0x805   : > { %s2317_s20 = sld [smem:[#allocation8_spill]] }
 0x809   : > { %s21_s21 = sadd.s32 1, %s2313_s27  }
 0x80a   : > { %p18_p8 = scmp.ge.s32.totalorder %s21_s21, 6  }
 0x80c   :  { %20 = sbr.rel (!%p18_p8) target bundleno = 3 (0x3), region = 110 }

</bundles_post_ra>
